<compile_context>
chip_gen: v7x
topology: tpu7x:2x2x1
jax: 0.10.0
libtpu: 0.0.40
codegen_flags: <defaults>
</compile_context>

<pallas_src>
import functools

import jax
import jax.numpy as jnp
from jax.experimental import pallas as pl
from jax.experimental.pallas import tpu as pltpu


def node_cl_loss_kernel(node_ref, pos_ref, neg_ref, mask_ref, out_ref, acc_ref, *,
                        inv_t, eps):
    # node_ref: (TB, D, 1)   pos_ref: (TB, D, 1)
    # neg_ref:  (TB, D, TN)  mask_ref: (TB, 1, TN)
    # out_ref:  (TB, 1, 1)   acc_ref:  (TB, 1, 1) f32 scratch (negative-sum accumulator)
    j = pl.program_id(1)

    node = node_ref[...].astype(jnp.float32)                               # (TB, D, 1)
    node_norm = jnp.sqrt(jnp.sum(node * node, axis=1, keepdims=True))      # (TB, 1, 1)

    @pl.when(j == 0)
    def _init():
        acc_ref[...] = jnp.zeros_like(acc_ref)

    # --- negative chunk: D-contraction over the sublane axis (VPU adds) ---
    negf = neg_ref[...].astype(jnp.float32)                                # (TB, D, TN)
    neg_dot = jnp.sum(negf * node, axis=1, keepdims=True)                  # (TB, 1, TN)
    neg_sq = jnp.sum(negf * negf, axis=1, keepdims=True)                   # (TB, 1, TN)
    den = jnp.maximum(jnp.sqrt(neg_sq) * node_norm, eps)                   # (TB, 1, TN)
    # exp(cos/t) with 1/t folded into the numerator: one pass, exact divide.
    contrib = jnp.exp((neg_dot * inv_t) / den) * mask_ref[...].astype(jnp.float32)
    acc_ref[...] += jnp.sum(contrib, axis=2, keepdims=True)                # (TB, 1, 1)

    @pl.when(j == pl.num_programs(1) - 1)
    def _finalize():
        pos = pos_ref[...].astype(jnp.float32)                             # (TB, D, 1)
        pos_norm = jnp.sqrt(jnp.sum(pos * pos, axis=1, keepdims=True))     # (TB, 1, 1)
        pos_dot = jnp.sum(node * pos, axis=1, keepdims=True)               # (TB, 1, 1)
        cos_pos = pos_dot / jnp.maximum(node_norm * pos_norm, eps)
        # score = -log(exp(cos_pos/t) / neg_sum) == log(neg_sum) - cos_pos/t
        out_ref[...] = jnp.log(acc_ref[...]) - cos_pos * inv_t


def _round_up(x, m):
    return ((x + m - 1) // m) * m


def _pick_block_bs(bs, cap=64):
    # Largest multiple of 8 that divides bs (<= cap); otherwise whole batch in one block.
    start = (min(cap, bs) // 8) * 8
    for tb in range(start, 7, -8):
        if bs % tb == 0:
            return tb
    return bs


def _pick_block_n(n, cap=512):
    # Lane tile for the negatives: multiple of 128 dividing round_up(n, 128), <= cap.
    n_pad = _round_up(n, 128)
    start = (min(cap, n_pad) // 128) * 128
    for cand in range(start, 127, -128):
        if n_pad % cand == 0:
            return cand, n_pad
    return 128, n_pad


def node_cl_loss(node_emd, positive_graph_emd, negative_graph_emd, mask,
                 t=0.5, eps=1e-8, block_bs=None, block_n=None,
                 negatives_are_dn=False):
    """JAX/Pallas equivalent of NodeCLLoss.forward.

    node_emd:            (bs, D)
    positive_graph_emd:  (bs, D)
    negative_graph_emd:  (bs, N, D)  [or (bs, D, N) if negatives_are_dn=True]
    mask:                (bs, N)
    returns: scalar f32 loss
    """
    bs, D = node_emd.shape
    if negatives_are_dn:
        neg_t = negative_graph_emd                      # already (bs, D, N)
        N = neg_t.shape[2]
    else:
        N = negative_graph_emd.shape[1]
        # TODO(synk): have upstream produce (bs, D, N) directly to skip this extra HBM pass.
        neg_t = jnp.transpose(negative_graph_emd, (0, 2, 1))   # (bs, D, N)

    if block_n is None:
        block_n, n_pad = _pick_block_n(N)
    else:
        n_pad = _round_up(N, block_n)
    if block_bs is None:
        block_bs = _pick_block_bs(bs)
    assert bs % block_bs == 0, (bs, block_bs)

    # Zero-pad N so every negative chunk is exact; zero columns contribute exactly 0
    # (dot=0, norm=0 -> cos=0/eps=0 -> exp(0)=1 times mask=0).
    if n_pad != N:
        neg_t = jnp.pad(neg_t, ((0, 0), (0, 0), (0, n_pad - N)))
        mask = jnp.pad(mask, ((0, 0), (0, n_pad - N)))

    # Pre-shape the small tensors so the kernel never needs a lane<->sublane relayout.
    node3 = node_emd[:, :, None]                        # (bs, D, 1)
    pos3 = positive_graph_emd[:, :, None]               # (bs, D, 1)
    mask3 = mask[:, None, :]                            # (bs, 1, n_pad)

    grid = (bs // block_bs, n_pad // block_n)

    kernel = functools.partial(
        node_cl_loss_kernel,
        inv_t=float(1.0 / t),
        eps=float(eps),
    )

    scores = pl.pallas_call(
        kernel,
        out_shape=jax.ShapeDtypeStruct((bs, 1, 1), jnp.float32),
        grid=grid,
        in_specs=[
            pl.BlockSpec((block_bs, D, 1), lambda i, j: (i, 0, 0)),        # node
            pl.BlockSpec((block_bs, D, 1), lambda i, j: (i, 0, 0)),        # positive
            pl.BlockSpec((block_bs, D, block_n), lambda i, j: (i, 0, j)),  # negatives (D,N)
            pl.BlockSpec((block_bs, 1, block_n), lambda i, j: (i, 0, j)),  # mask
        ],
        out_specs=pl.BlockSpec((block_bs, 1, 1), lambda i, j: (i, 0, 0)),
        scratch_shapes=[pltpu.VMEM((block_bs, 1, 1), jnp.float32)],
        compiler_params=pltpu.CompilerParams(
            dimension_semantics=("parallel", "arbitrary")),
    )(node3, pos3, neg_t, mask3)

    return jnp.mean(scores)


def _reference(node_emd, positive_graph_emd, negative_graph_emd, mask,
               t=0.5, eps=1e-8):
    # Pure-JAX reference mirroring the PyTorch module (F.cosine_similarity
    # clamps the product of the norms by eps).
    def cos(a, b):
        num = jnp.sum(a * b, axis=-1)
        den = jnp.maximum(
            jnp.sqrt(jnp.sum(a * a, axis=-1)) * jnp.sqrt(jnp.sum(b * b, axis=-1)),
            eps)
        return num / den

    positive_score = jnp.exp(cos(node_emd, positive_graph_emd) / t)
    negative_score = jnp.exp(cos(node_emd[:, None, :], negative_graph_emd) / t)
    negative_score = jnp.sum(negative_score * mask, axis=-1)
    score = -jnp.log(positive_score / negative_score)
    return score.mean()


if __name__ == "__main__":
    key = jax.random.PRNGKey(0)
    k_node, k_pos, k_neg, k_mask = jax.random.split(key, 4)

    # Module-native feature sizes (D=96, N=600), small batch.
    bs, N, D = 16, 600, 96
    node = jax.random.normal(k_node, (bs, D), dtype=jnp.float32)
    pos = jax.random.normal(k_pos, (bs, D), dtype=jnp.float32)
    neg = jax.random.normal(k_neg, (bs, N, D), dtype=jnp.float32)
    mask = (jax.random.uniform(k_mask, (bs, N)) > 0.3).astype(jnp.float32)
    mask = mask.at[:, 0].set(1.0)  # guarantee at least one active negative per row

    # block_bs=8 -> grid (2, 5): exercises the parallel batch axis and the
    # init/accumulate/finalize path over the negative chunks.
    loss = node_cl_loss(node, pos, neg, mask, t=0.5, block_bs=8)
    loss = jax.block_until_ready(loss)

    ref = _reference(node, pos, neg, mask, t=0.5)
    assert jnp.allclose(loss, ref, rtol=2e-5, atol=2e-5), (loss, ref)

    print("KERNEL_OK")
</pallas_src>

<mosaic_0001>
module attributes {stable_mosaic.version = 11 : i64} {
  func.func @node_cl_loss_kernel(%arg0: i32, %arg1: i32, %arg2: memref<8x96x1xf32, #tpu.memory_space<vmem>>, %arg3: memref<8x96x1xf32, #tpu.memory_space<vmem>>, %arg4: memref<8x96x128xf32, #tpu.memory_space<vmem>>, %arg5: memref<8x1x128xf32, #tpu.memory_space<vmem>>, %arg6: memref<8x1x1xf32, #tpu.memory_space<vmem>>, %arg7: memref<8x1x1xf32, #tpu.memory_space<vmem>>) attributes {dimension_semantics = [#tpu.dimension_semantics<parallel>, #tpu.dimension_semantics<arbitrary>], iteration_bounds = array<i64: 2, 5>, scalar_prefetch = 0 : i64, scratch_operands = 1 : i64, tpu.core_type = #tpu.core_type<tc>, window_params = [{transform_indices = @transform_0, window_bounds = array<i64: 8, 96, 1>}, {transform_indices = @transform_1, window_bounds = array<i64: 8, 96, 1>}, {transform_indices = @transform_2, window_bounds = array<i64: 8, 96, 128>}, {transform_indices = @transform_3, window_bounds = array<i64: 8, 1, 128>}, {transform_indices = @transform_4, window_bounds = array<i64: 8, 1, 1>}]} {
    %c0 = arith.constant 0 : index
    %c0_0 = arith.constant 0 : index
    %c0_1 = arith.constant 0 : index
    %0 = vector.load %arg2[%c0, %c0_0, %c0_1] : memref<8x96x1xf32, #tpu.memory_space<vmem>>, vector<8x96x1xf32>
    %1 = arith.mulf %0, %0 : vector<8x96x1xf32>
    %cst = arith.constant dense<0.000000e+00> : vector<8x1xf32>
    %2 = vector.multi_reduction <add>, %1, %cst [1] : vector<8x96x1xf32> to vector<8x1xf32>
    %3 = vector.shape_cast %2 : vector<8x1xf32> to vector<8x1x1xf32>
    %4 = math.sqrt %3 : vector<8x1x1xf32>
    %c0_i32 = arith.constant 0 : i32
    %5 = arith.cmpi eq, %arg1, %c0_i32 : i32
    %6 = arith.extui %5 : i1 to i32
    %c0_i32_2 = arith.constant 0 : i32
    %7 = arith.cmpi ne, %6, %c0_i32_2 : i32
    scf.if %7 {
      %cst_21 = arith.constant 0.000000e+00 : f32
      %35 = vector.broadcast %cst_21 : f32 to vector<8x1x1xf32>
      %c0_22 = arith.constant 0 : index
      %c0_23 = arith.constant 0 : index
      %c0_24 = arith.constant 0 : index
      %36 = vector.load %arg7[%c0_22, %c0_23, %c0_24] : memref<8x1x1xf32, #tpu.memory_space<vmem>>, vector<8x1x1xf32>
      tpu.vector_store %arg7[%c0_22, %c0_23, %c0_24], %35 {strides = array<i32>} : memref<8x1x1xf32, #tpu.memory_space<vmem>>, vector<8x1x1xf32>,
    } else {
    }
    %c0_3 = arith.constant 0 : index
    %c0_4 = arith.constant 0 : index
    %c0_5 = arith.constant 0 : index
    %8 = vector.load %arg4[%c0_3, %c0_4, %c0_5] : memref<8x96x128xf32, #tpu.memory_space<vmem>>, vector<8x96x128xf32>
    %9 = vector.broadcast %0 : vector<8x96x1xf32> to vector<8x96x128xf32>
    %10 = arith.mulf %8, %9 : vector<8x96x128xf32>
    %cst_6 = arith.constant dense<0.000000e+00> : vector<8x128xf32>
    %11 = vector.multi_reduction <add>, %10, %cst_6 [1] : vector<8x96x128xf32> to vector<8x128xf32>
    %12 = vector.shape_cast %11 : vector<8x128xf32> to vector<8x1x128xf32>
    %13 = arith.mulf %8, %8 : vector<8x96x128xf32>
    %cst_7 = arith.constant dense<0.000000e+00> : vector<8x128xf32>
    %14 = vector.multi_reduction <add>, %13, %cst_7 [1] : vector<8x96x128xf32> to vector<8x128xf32>
    %15 = vector.shape_cast %14 : vector<8x128xf32> to vector<8x1x128xf32>
    %16 = math.sqrt %15 : vector<8x1x128xf32>
    %17 = vector.broadcast %4 : vector<8x1x1xf32> to vector<8x1x128xf32>
    %18 = arith.mulf %16, %17 : vector<8x1x128xf32>
    %cst_8 = arith.constant 9.99999993E-9 : f32
    %19 = vector.broadcast %cst_8 : f32 to vector<8x1x128xf32>
    %20 = arith.maximumf %18, %19 : vector<8x1x128xf32>
    %cst_9 = arith.constant 2.000000e+00 : f32
    %21 = vector.broadcast %cst_9 : f32 to vector<8x1x128xf32>
    %22 = arith.mulf %12, %21 : vector<8x1x128xf32>
    %23 = arith.divf %22, %20 : vector<8x1x128xf32>
    %24 = math.exp %23 : vector<8x1x128xf32>
    %c0_10 = arith.constant 0 : index
    %c0_11 = arith.constant 0 : index
    %c0_12 = arith.constant 0 : index
    %25 = vector.load %arg5[%c0_10, %c0_11, %c0_12] : memref<8x1x128xf32, #tpu.memory_space<vmem>>, vector<8x1x128xf32>
    %26 = arith.mulf %24, %25 : vector<8x1x128xf32>
    %c0_13 = arith.constant 0 : index
    %c0_14 = arith.constant 0 : index
    %c0_15 = arith.constant 0 : index
    %27 = vector.load %arg7[%c0_13, %c0_14, %c0_15] : memref<8x1x1xf32, #tpu.memory_space<vmem>>, vector<8x1x1xf32>
    %cst_16 = arith.constant dense<0.000000e+00> : vector<8x1xf32>
    %28 = vector.multi_reduction <add>, %26, %cst_16 [2] : vector<8x1x128xf32> to vector<8x1xf32>
    %29 = vector.shape_cast %28 : vector<8x1xf32> to vector<8x1x1xf32>
    %30 = arith.addf %27, %29 : vector<8x1x1xf32>
    %c0_17 = arith.constant 0 : index
    %c0_18 = arith.constant 0 : index
    %c0_19 = arith.constant 0 : index
    %31 = vector.load %arg7[%c0_17, %c0_18, %c0_19] : memref<8x1x1xf32, #tpu.memory_space<vmem>>, vector<8x1x1xf32>
    tpu.vector_store %arg7[%c0_17, %c0_18, %c0_19], %30 {strides = array<i32>} : memref<8x1x1xf32, #tpu.memory_space<vmem>>, vector<8x1x1xf32>,
    %c4_i32 = arith.constant 4 : i32
    %32 = arith.cmpi eq, %arg1, %c4_i32 : i32
    %33 = arith.extui %32 : i1 to i32
    %c0_i32_20 = arith.constant 0 : i32
    %34 = arith.cmpi ne, %33, %c0_i32_20 : i32
    scf.if %34 {
      %c0_21 = arith.constant 0 : index
      %c0_22 = arith.constant 0 : index
      %c0_23 = arith.constant 0 : index
      %35 = vector.load %arg3[%c0_21, %c0_22, %c0_23] : memref<8x96x1xf32, #tpu.memory_space<vmem>>, vector<8x96x1xf32>
      %36 = arith.mulf %35, %35 : vector<8x96x1xf32>
      %cst_24 = arith.constant dense<0.000000e+00> : vector<8x1xf32>
      %37 = vector.multi_reduction <add>, %36, %cst_24 [1] : vector<8x96x1xf32> to vector<8x1xf32>
      %38 = vector.shape_cast %37 : vector<8x1xf32> to vector<8x1x1xf32>
      %39 = math.sqrt %38 : vector<8x1x1xf32>
      %40 = arith.mulf %0, %35 : vector<8x96x1xf32>
      %cst_25 = arith.constant dense<0.000000e+00> : vector<8x1xf32>
      %41 = vector.multi_reduction <add>, %40, %cst_25 [1] : vector<8x96x1xf32> to vector<8x1xf32>
      %42 = vector.shape_cast %41 : vector<8x1xf32> to vector<8x1x1xf32>
      %43 = arith.mulf %4, %39 : vector<8x1x1xf32>
      %cst_26 = arith.constant 9.99999993E-9 : f32
      %44 = vector.broadcast %cst_26 : f32 to vector<8x1x1xf32>
      %45 = arith.maximumf %43, %44 : vector<8x1x1xf32>
      %46 = arith.divf %42, %45 : vector<8x1x1xf32>
      %c0_27 = arith.constant 0 : index
      %c0_28 = arith.constant 0 : index
      %c0_29 = arith.constant 0 : index
      %47 = vector.load %arg7[%c0_27, %c0_28, %c0_29] : memref<8x1x1xf32, #tpu.memory_space<vmem>>, vector<8x1x1xf32>
      %48 = math.log %47 : vector<8x1x1xf32>
      %cst_30 = arith.constant 2.000000e+00 : f32
      %49 = vector.broadcast %cst_30 : f32 to vector<8x1x1xf32>
      %50 = arith.mulf %46, %49 : vector<8x1x1xf32>
      %51 = arith.subf %48, %50 : vector<8x1x1xf32>
      %c0_31 = arith.constant 0 : index
      %c0_32 = arith.constant 0 : index
      %c0_33 = arith.constant 0 : index
      %52 = vector.load %arg6[%c0_31, %c0_32, %c0_33] : memref<8x1x1xf32, #tpu.memory_space<vmem>>, vector<8x1x1xf32>
      tpu.vector_store %arg6[%c0_31, %c0_32, %c0_33], %51 {strides = array<i32>} : memref<8x1x1xf32, #tpu.memory_space<vmem>>, vector<8x1x1xf32>,
    } else {
    }
    return
  }
  func.func @transform_0(%arg0: i32, %arg1: i32) -> (i32, i32, i32) {
    %c0_i32 = arith.constant 0 : i32
    %c0_i32_0 = arith.constant 0 : i32
    %c0_i32_1 = arith.constant 0 : i32
    return %arg0, %c0_i32, %c0_i32_0 : i32, i32, i32
  }
  func.func @transform_1(%arg0: i32, %arg1: i32) -> (i32, i32, i32) {
    %c0_i32 = arith.constant 0 : i32
    %c0_i32_0 = arith.constant 0 : i32
    %c0_i32_1 = arith.constant 0 : i32
    return %arg0, %c0_i32, %c0_i32_0 : i32, i32, i32
  }
  func.func @transform_2(%arg0: i32, %arg1: i32) -> (i32, i32, i32) {
    %c0_i32 = arith.constant 0 : i32
    %c0_i32_0 = arith.constant 0 : i32
    return %arg0, %c0_i32, %arg1 : i32, i32, i32
  }
  func.func @transform_3(%arg0: i32, %arg1: i32) -> (i32, i32, i32) {
    %c0_i32 = arith.constant 0 : i32
    %c0_i32_0 = arith.constant 0 : i32
    return %arg0, %c0_i32, %arg1 : i32, i32, i32
  }
  func.func @transform_4(%arg0: i32, %arg1: i32) -> (i32, i32, i32) {
    %c0_i32 = arith.constant 0 : i32
    %c0_i32_0 = arith.constant 0 : i32
    %c0_i32_1 = arith.constant 0 : i32
    return %arg0, %c0_i32, %c0_i32_0 : i32, i32, i32
  }
}

</mosaic_0001>

<bundles_post_ra>
// kernel: tpu_custom_call.1
= control target key start
LH: loop header
LB: loop body
LE: loop exit
PB: predicated region body
PF: predicated region fallthrough
CT: control target
= control target key end

     0   :  { %s7104_s0 = inlined_call_operand.vmem [shape: f32[16,96,1], index: 0, kind: input, shape index: {}]   ;;  %s7105_s1 = inlined_call_operand.vmem [shape: f32[16,96,1], index: 1, kind: input, shape index: {}]   ;;  %s7106_s2 = inlined_call_operand.hbm [shape: f32[16,96,640], index: 2, kind: input, shape index: {}]   ;;  %s7107_s3 = inlined_call_operand.hbm [shape: f32[16,1,640], index: 3, kind: input, shape index: {}]   ;;  %s7108_s4 = inlined_call_operand.vmem [shape: f32[16,1,1], index: 4, kind: output, shape index: {}]  }
   0x1   :  { %7337 = sst [smem:[#allocation261_spill]] %s7106_s2 }
   0x2   :  { %9 = vsyncpa [#allocation4], 0 }
   0x3   :  { %11 = vsyncpa [#allocation4 + $0x1], 0 }
   0x4   :  { %12 = vsyncpa [#allocation6], 0 }
   0x5   :  { %14 = vsyncpa [#allocation6 + $0x1], 0  ;;  %s3489_s15 = smov 0   ;;  %s3491_s16 = smov 0  }
   0x6   :  { %s3493_s17 = smov 0   ;;  %s3495_s18 = smov 0  }
   0x7   :  { %s3497_s19 = smov 0   ;;  %s3499_s20 = smov 0  }
   0x8   :  { %s3501_s21 = smov 0   ;;  %s3503_s22 = smov 0  }
   0x9 LB: > { %s3097_s23 = sadd.s32 4294967295, %s3452_s22   ;;  %s29_s24 = sadd.s32 1, %s3444_s20  ;;  %s3452_s22 = sphi %s3503_s22, %s20_s22   ;;  %s3448_s21 = sphi %s3501_s21, %s8082_s21   ;;  %s3444_s20 = sphi %s3499_s20, %s8081_s20   ;;  %s3440_s19 = sphi %s3497_s19, %s8080_s19   ;;  %s3436_s18 = sphi %s3495_s18, %s8079_s18   ;;  %s3432_s17 = sphi %s3493_s17, %s8078_s17   ;;  %s3428_s16 = sphi %s3491_s16, %s8077_s16   ;;  %s3424_s15 = sphi %s3489_s15, %s8076_s15  }
   0xa   : > { %p30_p0 = scmp.ge.s32.totalorder %s29_s24, 5  ;;  %s32_s25 = sadd.s32 1, %s3448_s21 }
   0xb   : > { %s93_s26 = sadd.s32 1, %s3432_s17  ;;  %p100_p1 = scmp.ne.s32.totalorder %s3432_s17, %s3428_s16 }
   0xc   : > { %s8084_s24 = smov (%p30_p0, %s29_s24), 0  ;;  %s8086_s25 = smov (!%p30_p0, %s32_s25), %s3448_s21 }
   0xd   : > { %7338 = sst [smem:[#allocation9_spill]] %s8084_s24  ;;  %s89_s27 = ssub.s32 %s3444_s20, %s8084_s24 }
   0xe   : > { %p101_p2 = scmp.eq.s32.totalorder %s3452_s22, 0  ;;  %p34_p3 = scmp.ge.s32.totalorder %s8086_s25, 2 }
   0xf   : > { %p106_p4 = scmp.ne.s32.totalorder %s3428_s16, %s3424_s15  ;;  %p107_p6 = scmp.eq.s32.totalorder %s3097_s23, 0 }
  0x10   : > { %p102_p5 = por %p101_p2, %p100_p1  ;;  %s8088_s25 = smov (%p34_p3, %s8086_s25), 0 }
  0x11   : > { %7339 = sst [smem:[#allocation10_spill]] %s8088_s25  ;;  %p3542_p7 = por %p107_p6, %p106_p4 }
  0x12   : > { %s88_s29 = ssub.s32 %s3448_s21, %s8088_s25  ;;  %p3135_p8 = scmp.lt.s32.totalorder %s3452_s22, 10 }
  0x13   : > { %s7340_s28 = scalar_select %p3542_p7, 1, 0 }
  0x14   : > { %s90_s30 = sor.u32 %s89_s27, %s88_s29  ;;  %s3550_s5 = sand.u32 1, %s3432_s17  }
  0x15   : > { %p91_p9 = scmp.eq.s32.totalorder %s90_s30, 0  ;;  %s3119_s6 = smul.u32 768, %s3550_s5 }
  0x16   : > { %p3553_p10 = pnand %p3135_p8, %p102_p5  ;;  %s3120_s9 = smul.u32 480, %s3448_s21 }
  0x17   : > { %s3558_s8 = scalar_select %p91_p9, %s3432_s17, %s93_s26  }
  0x18   : > { %s208_s10 = scalar_lea.vmem [#allocation3], %s3119_s6  ;;  %s214_s12 = sadd.s32 %s3444_s20, %s3120_s9 }
  0x19   : > { %s217_s11 = sshll.u32 %s208_s10, 4  ;;  %s3103_s13 = sshll.u32 %s214_s12, 7  ;;  %s3562_s11 = int_to_ptr.vmem [resolvable:$true] %s217_s11 }
  0x1a   : > { %s7342_s2 = sld [smem:[#allocation261_spill]]  ;;  %s205_s27 = scalar_lea.sflag [#allocation4], %s3550_s5 }
  0x1b   : > { %p3324_p13 = pneg %p3553_p10 }
  0x20   : > { %s3567_s23 = scalar_lea.hbm %s7342_s2, %s3103_s13  ;;  %s3327_s6 = scalar_lea.hbm %s7342_s2, 122880 }
  0x21   : > { %s3322_s26 = scalar_lea.hbm %s3567_s23, 12288  ;;  %p3328_p2 = scmp.lt.u32.totalorder %s3567_s23, %s7342_s2 }
  0x22   : > { %p3323_p12 = scmp.ne.s32.totalorder %s3567_s23, %s3322_s26  ;;  %p3329_p3 = scmp.lt.u32.totalorder %s3327_s6, %s3322_s26 }
  0x23   : > { %p3331_p5 = scmp.lt.u32.totalorder %s3322_s26, %s3567_s23 }
  0x24   : > { %p3325_p0 = pnand %p3324_p13, %p3323_p12  ;;  %p3330_p4 = por %p3329_p3, %p3328_p2 }
  0x26   : > { %p3326_p1 = pneg %p3325_p0  ;;  %p3332_p6 = por %p3331_p5, %p3330_p4 }
  0x28   : > { %p3333_p8 = pnand %p3332_p6, %p3326_p1 }
  0x2a   : > { %3336 = shalt.err (!%p3333_p8)
}
  0x2b   : > { %s3337_s12 = scalar_lea.vmem %s3562_s11, 12288  ;;  %s3454_s13 = smov [#allocation3]  }
  0x2c   : > { %p3338_p9 = scmp.ne.s32.totalorder %s3562_s11, %s3337_s12  ;;  %s3342_s14 = sshll.u32 %s3454_s13, 4  ;;  %s3343_s14 = int_to_ptr.vmem [resolvable:$false] %s3342_s14 }
  0x2d   : > { %s3344_s15 = scalar_lea.vmem %s3343_s14, 24576  ;;  %p3345_p11 = scmp.lt.s32.totalorder %s3562_s11, %s3343_s14 }
  0x2e   : > { %p3340_p12 = pnand %p3338_p9, %p3324_p13  ;;  %p3346_p2 = scmp.lt.s32.totalorder %s3344_s15, %s3337_s12 }
  0x30   : > { %p3341_p0 = pneg %p3340_p12  ;;  %p3347_p3 = por %p3346_p2, %p3345_p11 }
  0x32   : > { %p3348_p4 = pnand %p3347_p3, %p3341_p0 }
  0x34   : > { %3351 = shalt.err (!%p3348_p4)
}
  0x35   : > { %s3455_s26 = smov 640   ;;  %s3456_s29 = smov 128  }
  0x36   : > { %s3457_s30 = smov 8   ;;  %p248_p11 = scmp.lt.s32.totalorder %s3452_s22, 11 }
  0x37   : > { %3131 = dma.hbm_to_vmem [thread:$0]  (!%p3553_p10), %s3567_s23, 12288, %s3562_s11, %s205_s27, %s3455_s26, %s3456_s29, %s3457_s30  }
  0x38   : > { %s3104_s6 = sshll.u32 %s3550_s5, 3  ;;  %s3121_s9 = smul.u32 40, %s3448_s21 }
  0x39   : > { %p7343_p1 = scmp.ge.s32.totalorder %s3452_s22, 1  ;;  %s231_s13 = scalar_lea.vmem [#allocation5], %s3104_s6 }
  0x3a   : > { %s237_s12 = sadd.s32 %s3444_s20, %s3121_s9  ;;  %s240_s14 = sshll.u32 %s231_s13, 4  ;;  %s3608_s14 = int_to_ptr.vmem [resolvable:$true] %s240_s14 }
  0x3b   : > { %p3603_p5 = pnand %p7343_p1, %p248_p11  ;;  %s3107_s15 = sshll.u32 %s237_s12, 4 }
  0x3c   : > { %s3613_s24 = scalar_lea.hbm %s7107_s3, %s3107_s15  ;;  %s228_s11 = scalar_lea.sflag [#allocation6], %s3550_s5 }
  0x3d   : > { %s3352_s23 = scalar_lea.hbm %s3613_s24, 128  ;;  %s3357_s29 = scalar_lea.hbm %s7107_s3, 1280 }
  0x3e   : > { %p3353_p6 = scmp.ne.s32.totalorder %s3613_s24, %s3352_s23  ;;  %p3358_p12 = scmp.lt.u32.totalorder %s3613_s24, %s7107_s3 }
  0x3f   : > { %p3359_p0 = scmp.lt.u32.totalorder %s3357_s29, %s3352_s23  ;;  %p3361_p3 = scmp.lt.u32.totalorder %s3352_s23, %s3613_s24 }
  0x40   : > { %p3355_p8 = pnand %p3353_p6, %p3324_p13 }
  0x41   : > { %p3360_p2 = por %p3359_p0, %p3358_p12 }
  0x42   : > { %p3356_p9 = pneg %p3355_p8 }
  0x43   : > { %p3362_p4 = por %p3361_p3, %p3360_p2 }
  0x45   : > { %p3363_p11 = pnand %p3362_p4, %p3356_p9 }
  0x47   : > { %3366 = shalt.err (!%p3363_p11)
}
  0x48   : > { %s3367_s2 = scalar_lea.vmem %s3608_s14, 128  ;;  %s3458_s25 = smov [#allocation5]  }
  0x49   : > { %p3368_p1 = scmp.ne.s32.totalorder %s3608_s14, %s3367_s2  ;;  %s3372_s9 = sshll.u32 %s3458_s25, 4  ;;  %s3373_s9 = int_to_ptr.vmem [resolvable:$false] %s3372_s9 }
  0x4a   : > { %s3374_s12 = scalar_lea.vmem %s3373_s9, 256  ;;  %p3375_p7 = scmp.lt.s32.totalorder %s3608_s14, %s3373_s9 }
  0x4b   : > { %p3370_p6 = pnand %p3368_p1, %p3324_p13  ;;  %p3376_p12 = scmp.lt.s32.totalorder %s3374_s12, %s3367_s2 }
  0x4d   : > { %p3371_p8 = pneg %p3370_p6  ;;  %p3377_p0 = por %p3376_p12, %p3375_p7 }
  0x4f   : > { %p3378_p2 = pnand %p3377_p0, %p3371_p8 }
  0x51   : > { %3381 = shalt.err (!%p3378_p2)
}
  0x52   : > { %s3459_s13 = smov 80   ;;  %s3460_s15 = smov 16  }
  0x53   : > { %s3461_s23 = smov 1   ;;  %252 = sbr.rel (%p3603_p5) target bundleno = 1010 (0x3f2), region = 36 }
  0x54   : > { %3134 = dma.hbm_to_vmem [thread:$0]  (!%p3553_p10), %s3613_s24, 128, %s3608_s14, %s228_s11, %s3459_s13, %s3460_s15, %s3461_s23  }
  0x5a   : > { %s254_s27 = sand.u32 1, %s3428_s16   ;;  %p7345_p7 = scmp.ne.s32.totalorder %s7340_s28, 0 }
  0x5b   : > { %s3122_s26 = smul.u32 768, %s254_s27  ;;  %s255_s29 = scalar_lea.sflag [#allocation4], %s254_s27 }
  0x5d   : > { %s3644_s30 = scalar_lea.vmem [#allocation3], %s3122_s26 }
  0x5e   : > { %3415 = dma.done.wait (%p7345_p7), %s255_s29, 12288  }
  0x5f   : > { %3417 = vsyncadd (%p7345_p7), %s255_s29, 4294955008  ;;  %s3109_s6 = sshll.u32 %s254_s27, 3  ;;  %s264_s7 = scalar_lea.sflag [#allocation6], %s254_s27 }
  0x60   : > { %s3650_s5 = scalar_lea.vmem [#allocation5], %s3109_s6 }
  0x61   : > { %3419 = dma.done.wait (%p7345_p7), %s264_s7, 128  }
  0x62   : > { %3421 = vsyncadd (%p7345_p7), %s264_s7, 4294967168  ;;  %s3110_s24 = sshll.u32 %s3440_s19, 3  ;;  %vm521_vm0 = vcmask 7168   ;;  %p3115_p13 = scmp.ne.s32.totalorder %s3436_s18, 0 }
  0x63   : > { %p309_p10 = scmp.lt.s32.totalorder %s3110_s24, 15 }
  0x65   : > { %s8090_s24 = smov (!%p309_p10, %s3110_s24), 15 }
  0x66   : > { %s3123_s10 = smul.u32 96, %s8090_s24  ;;  %s3660_s2 = scalar_lea.vmem %s7108_s4, %s8090_s24 }
  0x68   : > { %s3665_s12 = scalar_lea.vmem %s7104_s0, %s3123_s10  ;;  %s3670_s19 = scalar_lea.vmem %s7105_s1, %s3123_s10 }
  0x69   : > { %v3673_v0 = vld [vmem:[%s3665_s12] sm:$0xff]  ;;  %v3676_v1 = vld [vmem:[%s3665_s12 + $0x8] sm:$0xff]  ;;  %v3679_v2 = vld [vmem:[%s3665_s12 + $0x10] sm:$0xff] }
  0x6a   : > { %7346 = vst [vmem:[#allocation11_spill] sm:$0xff] %v3673_v0  ;;  %7347 = vst [vmem:[#allocation12_spill] sm:$0xff] %v3676_v1  ;;  %v3682_v3 = vld [vmem:[%s3665_s12 + $0x18] sm:$0xff]  ;;  %v425_v4 = vmul.f32 %v3673_v0, %v3673_v0  ;;  %v426_v5 = vmul.f32 %v3676_v1, %v3676_v1  ;;  %v3689_v6 = vld [vmem:[%s3665_s12 + $0x20] sm:$0xff]  ;;  %v427_v8 = vmul.f32 %v3679_v2, %v3679_v2 }
  0x6b   : > { %7348 = vst [vmem:[#allocation13_spill] sm:$0xff] %v3679_v2  ;;  %7349 = vst [vmem:[#allocation14_spill] sm:$0xff] %v3682_v3  ;;  %v3692_v7 = vld [vmem:[%s3665_s12 + $0x28] sm:$0xff]  ;;  %v3697_v9 = vld [vmem:[%s3665_s12 + $0x30] sm:$0xff]  ;;  %v428_v16 = vmul.f32 %v3682_v3, %v3682_v3  ;;  %v429_v21 = vmul.f32 %v3689_v6, %v3689_v6 }
  0x6c   : > { %7350 = vst [vmem:[#allocation15_spill] sm:$0xff] %v3689_v6  ;;  %7351 = vst [vmem:[#allocation16_spill] sm:$0xff] %v3692_v7  ;;  %v3700_v10 = vld [vmem:[%s3665_s12 + $0x38] sm:$0xff]  ;;  %v3703_v11 = vld [vmem:[%s3665_s12 + $0x40] sm:$0xff]  ;;  %v522_v12 = vsel %vm521_vm0, %v425_v4, 0.0  ;;  %v523_v17 = vsel %vm521_vm0, %v426_v5, 0.0  ;;  %v430_v26 = vmul.f32 %v3692_v7, %v3692_v7  ;;  %v431_v27 = vmul.f32 %v3697_v9, %v3697_v9 }
  0x6d   : > { %7352 = vst [vmem:[#allocation17_spill] sm:$0xff] %v3697_v9  ;;  %7353 = vst [vmem:[#allocation18_spill] sm:$0xff] %v3700_v10  ;;  %v3707_v13 = vld [vmem:[%s3665_s12 + $0x48] sm:$0xff]  ;;  %v3710_v14 = vld [vmem:[%s3665_s12 + $0x50] sm:$0xff]  ;;  %v524_v22 = vadd.f32 %v523_v17, %v522_v12  ;;  %v3744_v28 = vmul.f32 %v3700_v10, %v3700_v10  ;;  %v525_v29 = vsel %vm521_vm0, %v427_v8, 0.0  ;;  %v3758_v33 = vmul.f32 %v3703_v11, %v3703_v11 }
  0x6e   : > { %7354 = vst [vmem:[#allocation19_spill] sm:$0xff] %v3703_v11  ;;  %7355 = vst [vmem:[#allocation20_spill] sm:$0xff] %v3707_v13  ;;  %v3713_v15 = vld [vmem:[%s3665_s12 + $0x58] sm:$0xff]  ;;  %v3719_v18 = vld [vmem:[%s3665_s12 + $0x60] sm:$0xff]  ;;  %v3762_v34 = vmul.f32 %v3707_v13, %v3707_v13  ;;  %v3766_v35 = vmul.f32 %v3710_v14, %v3710_v14  ;;  %v527_v43 = vsel %vm521_vm0, %v428_v16, 0.0  ;;  %v529_v57 = vsel %vm521_vm0, %v429_v21, 0.0 }
  0x6f   : > { %7356 = vst [vmem:[#allocation21_spill] sm:$0xff] %v3710_v14  ;;  %7357 = vst [vmem:[#allocation22_spill] sm:$0xff] %v3713_v15  ;;  %v3722_v19 = vld [vmem:[%s3665_s12 + $0x68] sm:$0xff]  ;;  %v3725_v20 = vld [vmem:[%s3665_s12 + $0x70] sm:$0xff]  ;;  %v526_v36 = vadd.f32 %v525_v29, %v524_v22  ;;  %v3779_v40 = vmul.f32 %v3713_v15, %v3713_v15  ;;  %v3783_v41 = vmul.f32 %v3719_v18, %v3719_v18  ;;  %v531_v22 = vsel %vm521_vm0, %v430_v26, 0.0 }
  0x70   : > { %7358 = vst [vmem:[#allocation23_spill] sm:$0xff] %v3719_v18  ;;  %7359 = vst [vmem:[#allocation24_spill] sm:$0xff] %v3722_v19  ;;  %v3730_v23 = vld [vmem:[%s3665_s12 + $0x78] sm:$0xff]  ;;  %v3733_v24 = vld [vmem:[%s3665_s12 + $0x80] sm:$0xff]  ;;  %v3787_v42 = vmul.f32 %v3722_v19, %v3722_v19  ;;  %v3801_v47 = vmul.f32 %v3725_v20, %v3725_v20 }
  0x71   : > { %7360 = vst [vmem:[#allocation25_spill] sm:$0xff] %v3725_v20  ;;  %7361 = vst [vmem:[#allocation26_spill] sm:$0xff] %v3730_v23  ;;  %v3736_v25 = vld [vmem:[%s3665_s12 + $0x88] sm:$0xff]  ;;  %v3748_v30 = vld [vmem:[%s3665_s12 + $0x90] sm:$0xff]  ;;  %v3805_v48 = vmul.f32 %v3730_v23, %v3730_v23  ;;  %v3809_v49 = vmul.f32 %v3733_v24, %v3733_v24  ;;  %v528_v50 = vadd.f32 %v527_v43, %v526_v36 }
  0x72   : > { %7362 = vst [vmem:[#allocation27_spill] sm:$0xff] %v3733_v24  ;;  %7363 = vst [vmem:[#allocation28_spill] sm:$0xff] %v3736_v25  ;;  %v3751_v31 = vld [vmem:[%s3665_s12 + $0x98] sm:$0xff]  ;;  %v3754_v32 = vld [vmem:[%s3665_s12 + $0xa0] sm:$0xff]  ;;  %v3822_v54 = vmul.f32 %v3736_v25, %v3736_v25  ;;  %v3826_v55 = vmul.f32 %v3748_v30, %v3748_v30 }
  0x73   : > { %7364 = vst [vmem:[#allocation29_spill] sm:$0xff] %v3748_v30  ;;  %7365 = vst [vmem:[#allocation30_spill] sm:$0xff] %v3751_v31  ;;  %v3769_v37 = vld [vmem:[%s3665_s12 + $0xa8] sm:$0xff]  ;;  %v3772_v38 = vld [vmem:[%s3665_s12 + $0xb0] sm:$0xff]  ;;  %v3830_v56 = vmul.f32 %v3751_v31, %v3751_v31  ;;  %v3844_v61 = vmul.f32 %v3754_v32, %v3754_v32  ;;  %v530_v4 = vadd.f32 %v529_v57, %v528_v50 }
  0x74   : > { %7366 = vst [vmem:[#allocation31_spill] sm:$0xff] %v3754_v32  ;;  %7367 = vst [vmem:[#allocation32_spill] sm:$0xff] %v3769_v37  ;;  %v3775_v39 = vld [vmem:[%s3665_s12 + $0xb8] sm:$0xff]  ;;  %v3791_v44 = vld [vmem:[%s3665_s12 + $0xc0] sm:$0xff]  ;;  %v3848_v62 = vmul.f32 %v3769_v37, %v3769_v37  ;;  %v3852_v63 = vmul.f32 %v3772_v38, %v3772_v38 }
  0x75   : > { %7368 = vst [vmem:[#allocation33_spill] sm:$0xff] %v3772_v38  ;;  %7369 = vst [vmem:[#allocation34_spill] sm:$0xff] %v3775_v39  ;;  %v3794_v45 = vld [vmem:[%s3665_s12 + $0xc8] sm:$0xff]  ;;  %v3797_v46 = vld [vmem:[%s3665_s12 + $0xd0] sm:$0xff]  ;;  %v3865_v16 = vmul.f32 %v3775_v39, %v3775_v39  ;;  %v3869_v17 = vmul.f32 %v3791_v44, %v3791_v44  ;;  %v532_v26 = vadd.f32 %v531_v22, %v530_v4  ;;  %v533_v4 = vsel %vm521_vm0, %v431_v27, 0.0 }
  0x76   : > { %7370 = vst [vmem:[#allocation35_spill] sm:$0xff] %v3791_v44  ;;  %7371 = vst [vmem:[#allocation36_spill] sm:$0xff] %v3794_v45  ;;  %v3812_v51 = vld [vmem:[%s3665_s12 + $0xd8] sm:$0xff]  ;;  %v3815_v52 = vld [vmem:[%s3665_s12 + $0xe0] sm:$0xff]  ;;  %v3873_v21 = vmul.f32 %v3794_v45, %v3794_v45  ;;  %v3887_v50 = vmul.f32 %v3797_v46, %v3797_v46 }
  0x77   : > { %7372 = vst [vmem:[#allocation37_spill] sm:$0xff] %v3797_v46  ;;  %7373 = vst [vmem:[#allocation38_spill] sm:$0xff] %v3812_v51  ;;  %v3818_v53 = vld [vmem:[%s3665_s12 + $0xe8] sm:$0xff]  ;;  %v3834_v58 = vld [vmem:[%s3665_s12 + $0xf0] sm:$0xff]  ;;  %v3891_v57 = vmul.f32 %v3812_v51, %v3812_v51  ;;  %v3895_v44 = vmul.f32 %v3815_v52, %v3815_v52  ;;  %v534_v27 = vadd.f32 %v533_v4, %v532_v26  ;;  %v535_v26 = vsel %vm521_vm0, %v3744_v28, 0.0 }
  0x78   : > { %7374 = vst [vmem:[#allocation39_spill] sm:$0xff] %v3815_v52  ;;  %7375 = vst [vmem:[#allocation40_spill] sm:$0xff] %v3818_v53  ;;  %v3837_v59 = vld [vmem:[%s3665_s12 + $0xf8] sm:$0xff]  ;;  %v3840_v60 = vld [vmem:[%s3665_s12 + $0x100] sm:$0xff]  ;;  %v3908_v46 = vmul.f32 %v3818_v53, %v3818_v53  ;;  %v3912_v51 = vmul.f32 %v3834_v58, %v3834_v58 }
  0x79   : > { %7376 = vst [vmem:[#allocation41_spill] sm:$0xff] %v3834_v58  ;;  %7377 = vst [vmem:[#allocation42_spill] sm:$0xff] %v3837_v59  ;;  %v3855_v5 = vld [vmem:[%s3665_s12 + $0x108] sm:$0xff]  ;;  %v3858_v8 = vld [vmem:[%s3665_s12 + $0x110] sm:$0xff]  ;;  %v3916_v52 = vmul.f32 %v3837_v59, %v3837_v59  ;;  %v3930_v53 = vmul.f32 %v3840_v60, %v3840_v60  ;;  %v536_v28 = vadd.f32 %v535_v26, %v534_v27  ;;  %v537_v27 = vsel %vm521_vm0, %v3758_v33, 0.0 }
  0x7a   : > { %7378 = vst [vmem:[#allocation43_spill] sm:$0xff] %v3840_v60  ;;  %7379 = vst [vmem:[#allocation44_spill] sm:$0xff] %v3855_v5  ;;  %v3861_v12 = vld [vmem:[%s3665_s12 + $0x118] sm:$0xff]  ;;  %v3877_v29 = vld [vmem:[%s3665_s12 + $0x120] sm:$0xff]  ;;  %v3934_v58 = vmul.f32 %v3855_v5, %v3855_v5  ;;  %v3938_v59 = vmul.f32 %v3858_v8, %v3858_v8 }
  0x7b   : > { %7380 = vst [vmem:[#allocation45_spill] sm:$0xff] %v3858_v8  ;;  %7381 = vst [vmem:[#allocation46_spill] sm:$0xff] %v3861_v12  ;;  %v3880_v36 = vld [vmem:[%s3665_s12 + $0x128] sm:$0xff]  ;;  %v3883_v43 = vld [vmem:[%s3665_s12 + $0x130] sm:$0xff]  ;;  %v3951_v60 = vmul.f32 %v3861_v12, %v3861_v12  ;;  %v3955_v5 = vmul.f32 %v3877_v29, %v3877_v29  ;;  %v538_v33 = vadd.f32 %v537_v27, %v536_v28  ;;  %v539_v28 = vsel %vm521_vm0, %v3762_v34, 0.0 }
  0x7c   : > { %7382 = vst [vmem:[#allocation47_spill] sm:$0xff] %v3877_v29  ;;  %7383 = vst [vmem:[#allocation48_spill] sm:$0xff] %v3880_v36  ;;  %v3898_v45 = vld [vmem:[%s3665_s12 + $0x138] sm:$0xff]  ;;  %v3901_v38 = vld [vmem:[%s3665_s12 + $0x140] sm:$0xff]  ;;  %v3959_v8 = vmul.f32 %v3880_v36, %v3880_v36  ;;  %v3974_v29 = vmul.f32 %v3883_v43, %v3883_v43 }
  0x7d   : > { %7384 = vst [vmem:[#allocation49_spill] sm:$0xff] %v3883_v43  ;;  %7385 = vst [vmem:[#allocation50_spill] sm:$0xff] %v3898_v45  ;;  %v3904_v39 = vld [vmem:[%s3665_s12 + $0x148] sm:$0xff]  ;;  %v3920_v22 = vld [vmem:[%s3665_s12 + $0x150] sm:$0xff]  ;;  %v3978_v36 = vmul.f32 %v3898_v45, %v3898_v45  ;;  %v3982_v20 = vmul.f32 %v3901_v38, %v3901_v38  ;;  %v540_v34 = vadd.f32 %v539_v28, %v538_v33  ;;  %v541_v33 = vsel %vm521_vm0, %v3766_v35, 0.0 }
  0x7e   : > { %7386 = vst [vmem:[#allocation51_spill] sm:$0xff] %v3901_v38  ;;  %7387 = vst [vmem:[#allocation52_spill] sm:$0xff] %v3904_v39  ;;  %v3923_v32 = vld [vmem:[%s3665_s12 + $0x158] sm:$0xff]  ;;  %v3926_v37 = vld [vmem:[%s3665_s12 + $0x160] sm:$0xff]  ;;  %v3995_v43 = vmul.f32 %v3904_v39, %v3904_v39  ;;  %v3999_v45 = vmul.f32 %v3920_v22, %v3920_v22 }
  0x7f   : > { %7388 = vst [vmem:[#allocation53_spill] sm:$0xff] %v3920_v22  ;;  %7389 = vst [vmem:[#allocation54_spill] sm:$0xff] %v3923_v32  ;;  %v3941_v30 = vld [vmem:[%s3665_s12 + $0x168] sm:$0xff]  ;;  %v3944_v31 = vld [vmem:[%s3665_s12 + $0x170] sm:$0xff]  ;;  %v4003_v38 = vmul.f32 %v3923_v32, %v3923_v32  ;;  %v4018_v22 = vmul.f32 %v3926_v37, %v3926_v37  ;;  %v542_v35 = vadd.f32 %v541_v33, %v540_v34  ;;  %v543_v34 = vsel %vm521_vm0, %v3779_v40, 0.0 }
  0x80   : > { %7390 = vst [vmem:[#allocation55_spill] sm:$0xff] %v3926_v37  ;;  %7391 = vst [vmem:[#allocation56_spill] sm:$0xff] %v3941_v30  ;;  %v3947_v24 = vld [vmem:[%s3665_s12 + $0x178] sm:$0xff]  ;;  %v3964_v4 = vld [vmem:[%s3665_s12 + $0x180] sm:$0xff]  ;;  %v4022_v32 = vmul.f32 %v3941_v30, %v3941_v30  ;;  %v4026_v15 = vmul.f32 %v3944_v31, %v3944_v31 }
  0x81   : > { %7392 = vst [vmem:[#allocation57_spill] sm:$0xff] %v3944_v31  ;;  %7393 = vst [vmem:[#allocation58_spill] sm:$0xff] %v3947_v24  ;;  %v3967_v25 = vld [vmem:[%s3665_s12 + $0x188] sm:$0xff]  ;;  %v3970_v12 = vld [vmem:[%s3665_s12 + $0x190] sm:$0xff]  ;;  %v4039_v37 = vmul.f32 %v3947_v24, %v3947_v24  ;;  %v4043_v30 = vmul.f32 %v3964_v4, %v3964_v4  ;;  %v544_v40 = vadd.f32 %v543_v34, %v542_v35 }
  0x82   : > { %7394 = vst [vmem:[#allocation59_spill] sm:$0xff] %v3964_v4  ;;  %7395 = vst [vmem:[#allocation60_spill] sm:$0xff] %v3967_v25  ;;  %v3985_v23 = vld [vmem:[%s3665_s12 + $0x198] sm:$0xff]  ;;  %v3988_v18 = vld [vmem:[%s3665_s12 + $0x1a0] sm:$0xff]  ;;  %v4047_v31 = vmul.f32 %v3967_v25, %v3967_v25  ;;  %v4062_v4 = vmul.f32 %v3970_v12, %v3970_v12 }
  0x83   : > { %7396 = vst [vmem:[#allocation61_spill] sm:$0xff] %v3970_v12  ;;  %7397 = vst [vmem:[#allocation62_spill] sm:$0xff] %v3985_v23  ;;  %v3991_v19 = vld [vmem:[%s3665_s12 + $0x1a8] sm:$0xff]  ;;  %v4008_v26 = vld [vmem:[%s3665_s12 + $0x1b0] sm:$0xff]  ;;  %v4066_v25 = vmul.f32 %v3985_v23, %v3985_v23  ;;  %v4070_v6 = vmul.f32 %v3988_v18, %v3988_v18 }
  0x84   : > { %7398 = vst [vmem:[#allocation63_spill] sm:$0xff] %v3988_v18  ;;  %7399 = vst [vmem:[#allocation64_spill] sm:$0xff] %v3991_v19  ;;  %v4011_v14 = vld [vmem:[%s3665_s12 + $0x1b8] sm:$0xff]  ;;  %v4014_v39 = vld [vmem:[%s3665_s12 + $0x1c0] sm:$0xff]  ;;  %v4083_v12 = vmul.f32 %v3991_v19, %v3991_v19  ;;  %v4087_v23 = vmul.f32 %v4008_v26, %v4008_v26 }
  0x85   : > { %7400 = vst [vmem:[#allocation65_spill] sm:$0xff] %v4008_v26  ;;  %7401 = vst [vmem:[#allocation66_spill] sm:$0xff] %v4011_v14  ;;  %v4029_v11 = vld [vmem:[%s3665_s12 + $0x1c8] sm:$0xff]  ;;  %v4032_v13 = vld [vmem:[%s3665_s12 + $0x1d0] sm:$0xff]  ;;  %v4091_v18 = vmul.f32 %v4011_v14, %v4011_v14  ;;  %v4106_v26 = vmul.f32 %v4014_v39, %v4014_v39 }
  0x86   : > { %7402 = vst [vmem:[#allocation67_spill] sm:$0xff] %v4014_v39  ;;  %7403 = vst [vmem:[#allocation68_spill] sm:$0xff] %v4029_v11  ;;  %v4035_v9 = vld [vmem:[%s3665_s12 + $0x1d8] sm:$0xff]  ;;  %v4052_v27 = vld [vmem:[%s3665_s12 + $0x1e0] sm:$0xff]  ;;  %v4110_v2 = vmul.f32 %v4029_v11, %v4029_v11  ;;  %v4114_v14 = vmul.f32 %v4032_v13, %v4032_v13 }
  0x87   : > { %7404 = vst [vmem:[#allocation69_spill] sm:$0xff] %v4032_v13  ;;  %7405 = vst [vmem:[#allocation70_spill] sm:$0xff] %v4035_v9  ;;  %v4055_v10 = vld [vmem:[%s3665_s12 + $0x1e8] sm:$0xff]  ;;  %v4058_v24 = vld [vmem:[%s3665_s12 + $0x1f0] sm:$0xff]  ;;  %v4124_v39 = vmul.f32 %v4035_v9, %v4035_v9  ;;  %v4128_v11 = vmul.f32 %v4052_v27, %v4052_v27 }
  0x88   : > { %7406 = vst [vmem:[#allocation71_spill] sm:$0xff] %v4052_v27  ;;  %7407 = vst [vmem:[#allocation72_spill] sm:$0xff] %v4055_v10  ;;  %v4073_v7 = vld [vmem:[%s3665_s12 + $0x1f8] sm:$0xff]  ;;  %v4076_v1 = vld [vmem:[%s3665_s12 + $0x200] sm:$0xff]  ;;  %v4147_v27 = vmul.f32 %v4058_v24, %v4058_v24 }
  0x89   : > { %7408 = vst [vmem:[#allocation73_spill] sm:$0xff] %v4058_v24  ;;  %7409 = vst [vmem:[#allocation74_spill] sm:$0xff] %v4073_v7  ;;  %v4079_v3 = vld [vmem:[%s3665_s12 + $0x208] sm:$0xff]  ;;  %v4096_v28 = vld [vmem:[%s3665_s12 + $0x210] sm:$0xff] }
  0x8a   : > { %7410 = vst [vmem:[#allocation75_spill] sm:$0xff] %v4076_v1  ;;  %7411 = vst [vmem:[#allocation76_spill] sm:$0xff] %v4079_v3  ;;  %v4099_v0 = vld [vmem:[%s3665_s12 + $0x218] sm:$0xff]  ;;  %v4102_v19 = vld [vmem:[%s3665_s12 + $0x220] sm:$0xff]  ;;  %v4168_v24 = vmul.f32 %v4079_v3, %v4079_v3 }
  0x8b   : > { %7412 = vst [vmem:[#allocation77_spill] sm:$0xff] %v4087_v23  ;;  %7413 = vst [vmem:[#allocation78_spill] sm:$0xff] %v4091_v18  ;;  %v4117_v18 = vld [vmem:[%s3665_s12 + $0x228] sm:$0xff]  ;;  %v4120_v23 = vld [vmem:[%s3665_s12 + $0x230] sm:$0xff]  ;;  %v4180_v35 = vmul.f32 %v4102_v19, %v4102_v19 }
  0x8c   : > { %7414 = vst [vmem:[#allocation79_spill] sm:$0xff] %v4096_v28  ;;  %7415 = vst [vmem:[#allocation80_spill] sm:$0xff] %v4099_v0  ;;  %v4137_v33 = vld [vmem:[%s3665_s12 + $0x238] sm:$0xff]  ;;  %v4140_v13 = vld [vmem:[%s3665_s12 + $0x240] sm:$0xff] }
  0x8d   : > { %7416 = vst [vmem:[#allocation81_spill] sm:$0xff] %v4102_v19  ;;  %7417 = vst [vmem:[#allocation82_spill] sm:$0xff] %v4106_v26  ;;  %v4143_v9 = vld [vmem:[%s3665_s12 + $0x248] sm:$0xff]  ;;  %v4161_v26 = vld [vmem:[%s3665_s12 + $0x258] sm:$0xff]  ;;  %v551_v19 = vsel %vm521_vm0, %v3783_v41, 0.0  ;;  %v552_v41 = vsel %vm521_vm0, %v3787_v42, 0.0 }
  0x8e   : > { %7418 = vst [vmem:[#allocation83_spill] sm:$0xff] %v4110_v2  ;;  %7419 = vst [vmem:[#allocation84_spill] sm:$0xff] %v4114_v14  ;;  %v4132_v2 = vmul.f32 %v4055_v10, %v4055_v10  ;;  %v4151_v10 = vmul.f32 %v4073_v7, %v4073_v7  ;;  %v4158_v14 = vld [vmem:[%s3665_s12 + $0x250] sm:$0xff]  ;;  %v4172_v7 = vmul.f32 %v4096_v28, %v4096_v28  ;;  %v4183_v34 = vld [vmem:[%s3665_s12 + $0x268] sm:$0xff] }
  0x8f   : > { %7420 = vst [vmem:[#allocation85_spill] sm:$0xff] %v4117_v18  ;;  %7421 = vst [vmem:[#allocation86_spill] sm:$0xff] %v4120_v23  ;;  %v4189_v3 = vld [vmem:[%s3665_s12 + $0x278] sm:$0xff]  ;;  %v4193_v28 = vmul.f32 %v4117_v18, %v4117_v18  ;;  %v4212_v18 = vmul.f32 %v4137_v33, %v4137_v33 }
  0x90   : > { %7422 = vst [vmem:[#allocation87_spill] sm:$0xff] %v4124_v39  ;;  %7423 = vst [vmem:[#allocation88_spill] sm:$0xff] %v4132_v2  ;;  %v4155_v39 = vmul.f32 %v4076_v1, %v4076_v1  ;;  %v4164_v2 = vld [vmem:[%s3665_s12 + $0x260] sm:$0xff]  ;;  %v4176_v1 = vmul.f32 %v4099_v0, %v4099_v0  ;;  %v4197_v0 = vmul.f32 %v4120_v23, %v4120_v23 }
  0x91   : > { %7424 = vst [vmem:[#allocation89_spill] sm:$0xff] %v4137_v33  ;;  %7425 = vst [vmem:[#allocation90_spill] sm:$0xff] %v4140_v13  ;;  %v4216_v23 = vmul.f32 %v4140_v13, %v4140_v13  ;;  %v4235_v33 = vmul.f32 %v4158_v14, %v4158_v14  ;;  %v4239_v13 = vmul.f32 %v4161_v26, %v4161_v26 }
  0x92   : > { %7426 = vst [vmem:[#allocation91_spill] sm:$0xff] %v4143_v9  ;;  %7427 = vst [vmem:[#allocation92_spill] sm:$0xff] %v4147_v27  ;;  %v4231_v27 = vld [vmem:[%s3665_s12 + $0x2a8] sm:$0xff] }
  0x93   : > { %7428 = vst [vmem:[#allocation93_spill] sm:$0xff] %v4151_v10  ;;  %7429 = vst [vmem:[#allocation94_spill] sm:$0xff] %v4155_v39  ;;  %v4186_v39 = vld [vmem:[%s3665_s12 + $0x270] sm:$0xff]  ;;  %v4228_v10 = vld [vmem:[%s3665_s12 + $0x2a0] sm:$0xff] }
  0x94   : > { %7430 = vst [vmem:[#allocation95_spill] sm:$0xff] %v4158_v14  ;;  %7431 = vst [vmem:[#allocation96_spill] sm:$0xff] %v4161_v26  ;;  %v4253_v14 = vmul.f32 %v4183_v34, %v4183_v34  ;;  %v4261_v26 = vmul.f32 %v4189_v3, %v4189_v3 }
  0x95   : > { %7432 = vst [vmem:[#allocation97_spill] sm:$0xff] %v4164_v2  ;;  %7433 = vst [vmem:[#allocation98_spill] sm:$0xff] %v4168_v24  ;;  %v4208_v24 = vld [vmem:[%s3665_s12 + $0x290] sm:$0xff] }
  0x96   : > { %7434 = vst [vmem:[#allocation99_spill] sm:$0xff] %v4172_v7  ;;  %7435 = vst [vmem:[#allocation100_spill] sm:$0xff] %v4176_v1  ;;  %v545_v1 = vrot.slane %v544_v40, 4  ;;  %v4205_v7 = vld [vmem:[%s3665_s12 + $0x288] sm:$0xff] }
  0x97   : > { %7436 = vst [vmem:[#allocation101_spill] sm:$0xff] %v4180_v35  ;;  %7437 = vst [vmem:[#allocation102_spill] sm:$0xff] %v4183_v34  ;;  %v4202_v35 = vld [vmem:[%s3665_s12 + $0x280] sm:$0xff]  ;;  %v4275_v34 = vmul.f32 %v4205_v7, %v4205_v7 }
  0x98   : > { %7438 = vst [vmem:[#allocation103_spill] sm:$0xff] %v4186_v39  ;;  %7439 = vst [vmem:[#allocation104_spill] sm:$0xff] %v4189_v3  ;;  %v546_v42 = vadd.f32 %v545_v1, %v544_v40  ;;  %v4267_v1 = vld [vmem:[%s3665_s12 + $0x2c8] sm:$0xff]  ;;  %v4271_v40 = vmul.f32 %v4202_v35, %v4202_v35 }
  0x99   : > { %7440 = vst [vmem:[#allocation105_spill] sm:$0xff] %v4193_v28  ;;  %7441 = vst [vmem:[#allocation106_spill] sm:$0xff] %v4197_v0  ;;  %v4220_v0 = vmul.f32 %v4143_v9, %v4143_v9  ;;  %v4225_v28 = vld [vmem:[%s3665_s12 + $0x298] sm:$0xff]  ;;  %v4243_v9 = vmul.f32 %v4164_v2, %v4164_v2  ;;  %v553_v2 = vadd.f32 %v552_v41, %v551_v19  ;;  %v4288_v41 = vld [vmem:[%s3665_s12 + $0x2e0] sm:$0xff] }
  0x9a   : > { %7442 = vst [vmem:[#allocation107_spill] sm:$0xff] %v4202_v35  ;;  %7443 = vst [vmem:[#allocation108_spill] sm:$0xff] %v4205_v7  ;;  %v547_v3 = vrot.slane %v546_v42, 2  ;;  %v4285_v19 = vld [vmem:[%s3665_s12 + $0x2d8] sm:$0xff]  ;;  %v4296_v35 = vmul.f32 %v4228_v10, %v4228_v10  ;;  %v4300_v7 = vmul.f32 %v4231_v27, %v4231_v27 }
  0x9b   : > { %7444 = vst [vmem:[#allocation109_spill] sm:$0xff] %v4208_v24  ;;  %7445 = vst [vmem:[#allocation110_spill] sm:$0xff] %v4212_v18  ;;  %v4246_v18 = vld [vmem:[%s3665_s12 + $0x2b0] sm:$0xff] }
  0x9c   : > { %7446 = vst [vmem:[#allocation111_spill] sm:$0xff] %v4220_v0  ;;  %7447 = vst [vmem:[#allocation112_spill] sm:$0xff] %v4225_v28  ;;  %v4249_v0 = vld [vmem:[%s3665_s12 + $0x2b8] sm:$0xff] }
  0x9d   : > { %7448 = vst [vmem:[#allocation113_spill] sm:$0xff] %v4228_v10  ;;  %7449 = vst [vmem:[#allocation114_spill] sm:$0xff] %v4231_v27  ;;  %v556_v10 = vsel %vm521_vm0, %v3805_v48, 0.0  ;;  %v4339_v48 = vmul.f32 %v4288_v41, %v4288_v41 }
  0x9e   : > { %7450 = vst [vmem:[#allocation115_spill] sm:$0xff] %v4235_v33  ;;  %7451 = vst [vmem:[#allocation116_spill] sm:$0xff] %v4243_v9  ;;  %v4257_v33 = vmul.f32 %v4186_v39, %v4186_v39  ;;  %v4264_v9 = vld [vmem:[%s3665_s12 + $0x2c0] sm:$0xff]  ;;  %v4279_v39 = vmul.f32 %v4208_v24, %v4208_v24  ;;  %v554_v24 = vsel %vm521_vm0, %v3801_v47, 0.0  ;;  %v4323_v47 = vmul.f32 %v4267_v1, %v4267_v1 }
  0x9f   : > { %7452 = vst [vmem:[#allocation117_spill] sm:$0xff] %v4246_v18  ;;  %7453 = vst [vmem:[#allocation118_spill] sm:$0xff] %v4249_v0  ;;  %v4319_v27 = vmul.f32 %v4264_v9, %v4264_v9 }
  0xa0   : > { %7454 = vst [vmem:[#allocation119_spill] sm:$0xff] %v4257_v33  ;;  %7455 = vst [vmem:[#allocation120_spill] sm:$0xff] %v4261_v26  ;;  %v4282_v26 = vld [vmem:[%s3665_s12 + $0x2d0] sm:$0xff]  ;;  %v4292_v33 = vmul.f32 %v4225_v28, %v4225_v28  ;;  %v555_v28 = vadd.f32 %v554_v24, %v553_v2  ;;  %v4335_v24 = vmul.f32 %v4285_v19, %v4285_v19 }
  0xa1   : > { %7456 = vst [vmem:[#allocation121_spill] sm:$0xff] %v4264_v9  ;;  %7457 = vst [vmem:[#allocation122_spill] sm:$0xff] %v4267_v1  ;;  %v4331_v2 = vmul.f32 %v4282_v26, %v4282_v26 }
  0xa2   : > { %7458 = vst [vmem:[#allocation123_spill] sm:$0xff] %v4275_v34  ;;  %7459 = vst [vmem:[#allocation124_spill] sm:$0xff] %v4279_v39  ;;  %v4306_v39 = vmul.f32 %v4246_v18, %v4246_v18  ;;  %v4310_v34 = vmul.f32 %v4249_v0, %v4249_v0  ;;  %v4325_v18 = vadd.f32 %v547_v3, %v546_v42  ;;  %v558_v0 = vsel %vm521_vm0, %v3809_v49, 0.0 }
  0xa3   : > { %7460 = vst [vmem:[#allocation125_spill] sm:$0xff] %v4282_v26  ;;  %7461 = vst [vmem:[#allocation126_spill] sm:$0xff] %v4285_v19  ;;  %v557_v9 = vadd.f32 %v556_v10, %v555_v28  ;;  %v560_v3 = vsel %vm521_vm0, %v3822_v54, 0.0  ;;  %v580_v42 = vsel %vm521_vm0, %v3869_v17, 0.0  ;;  %v581_v49 = vsel %vm521_vm0, %v3873_v21, 0.0 }
  0xa4   : > { %7462 = vst [vmem:[#allocation127_spill] sm:$0xff] %v4288_v41  ;;  %7463 = vst [vmem:[#allocation128_spill] sm:$0xff] %v4292_v33  ;;  %v4315_v33 = vld [vmem:[%s3665_s12 + $0x2e8] sm:$0xff]  ;;  %v583_v26 = vsel %vm521_vm0, %v3887_v50, 0.0  ;;  %v562_v10 = vsel %vm521_vm0, %v3826_v55, 0.0  ;;  %v582_v28 = vadd.f32 %v581_v49, %v580_v42  ;;  %v549_v54 = vrot.slane %v4325_v18, 1 }
  0xa5   : > { %7464 = vst [vmem:[#allocation129_spill] sm:$0xff] %v4315_v33  ;;  %v4351_v19 = vmul.f32 %v4315_v33, %v4315_v33  ;;  %v559_v1 = vadd.f32 %v558_v0, %v557_v9  ;;  %v564_v17 = vsel %vm521_vm0, %v3830_v56, 0.0  ;;  %v566_v21 = vsel %vm521_vm0, %v3844_v61, 0.0 }
  0xa6   : > { %v585_v50 = vsel %vm521_vm0, %v3891_v57, 0.0  ;;  %v568_v33 = vsel %vm521_vm0, %v3848_v62, 0.0  ;;  %v570_v0 = vsel %vm521_vm0, %v3852_v63, 0.0  ;;  %v584_v9 = vadd.f32 %v583_v26, %v582_v28 }
  0xa7   : > { %v561_v41 = vadd.f32 %v560_v3, %v559_v1  ;;  %v572_v55 = vsel %vm521_vm0, %v3865_v16, 0.0  ;;  %v587_v56 = vsel %vm521_vm0, %v3895_v44, 0.0  ;;  %v609_v61 = vsel %vm521_vm0, %v3955_v5, 0.0 }
  0xa8   : > { %v610_v57 = vsel %vm521_vm0, %v3959_v8, 0.0  ;;  %v586_v3 = vadd.f32 %v585_v50, %v584_v9  ;;  %v612_v62 = vsel %vm521_vm0, %v3974_v29, 0.0  ;;  %v589_v63 = vsel %vm521_vm0, %v3908_v46, 0.0 }
  0xa9   : > { %v563_v1 = vadd.f32 %v562_v10, %v561_v41  ;;  %v611_v42 = vadd.f32 %v610_v57, %v609_v61  ;;  %v591_v16 = vsel %vm521_vm0, %v3912_v51, 0.0  ;;  %v593_v44 = vsel %vm521_vm0, %v3916_v52, 0.0 }
  0xaa   : > { %v614_v5 = vsel %vm521_vm0, %v3978_v36, 0.0  ;;  %v588_v8 = vadd.f32 %v587_v56, %v586_v3  ;;  %v595_v41 = vsel %vm521_vm0, %v3930_v53, 0.0  ;;  %v597_v29 = vsel %vm521_vm0, %v3934_v58, 0.0 }
  0xab   : > { %v565_v26 = vadd.f32 %v564_v17, %v563_v1  ;;  %v613_v49 = vadd.f32 %v612_v62, %v611_v42  ;;  %v599_v46 = vsel %vm521_vm0, %v3938_v59, 0.0  ;;  %v601_v51 = vsel %vm521_vm0, %v3951_v60, 0.0  ;;  %v7465_v62 = vld [vmem:[#allocation77_spill] sm:$0xff] }
  0xac   : > { %v616_v52 = vsel %vm521_vm0, %v3982_v20, 0.0  ;;  %v590_v36 = vadd.f32 %v589_v63, %v588_v8  ;;  %v638_v17 = vsel %vm521_vm0, %v4043_v30, 0.0  ;;  %v618_v53 = vsel %vm521_vm0, %v3995_v43, 0.0 }
  0xad   : > { %v567_v10 = vadd.f32 %v566_v21, %v565_v26  ;;  %v615_v28 = vadd.f32 %v614_v5, %v613_v49  ;;  %v620_v58 = vsel %vm521_vm0, %v3999_v45, 0.0  ;;  %v639_v59 = vsel %vm521_vm0, %v4047_v31, 0.0 }
  0xae   : > { %v641_v60 = vsel %vm521_vm0, %v4062_v4, 0.0  ;;  %v592_v20 = vadd.f32 %v591_v16, %v590_v36  ;;  %v640_v9 = vadd.f32 %v639_v59, %v638_v17  ;;  %v622_v56 = vsel %vm521_vm0, %v4003_v38, 0.0 }
  0xaf   : > { %v569_v50 = vadd.f32 %v568_v33, %v567_v10  ;;  %v617_v21 = vadd.f32 %v616_v52, %v615_v28  ;;  %v624_v30 = vsel %vm521_vm0, %v4018_v22, 0.0  ;;  %v626_v43 = vsel %vm521_vm0, %v4022_v32, 0.0  ;;  %v7470_v52 = vld [vmem:[#allocation93_spill] sm:$0xff] }
  0xb0   : > { %v643_v45 = vsel %vm521_vm0, %v4066_v25, 0.0  ;;  %v594_v61 = vadd.f32 %v593_v44, %v592_v20  ;;  %v642_v4 = vadd.f32 %v641_v60, %v640_v9  ;;  %v628_v33 = vsel %vm521_vm0, %v4026_v15, 0.0  ;;  %v7466_v15 = vld [vmem:[#allocation88_spill] sm:$0xff] }
  0xb1   : > { %v571_v31 = vadd.f32 %v570_v0, %v569_v50  ;;  %v619_v57 = vadd.f32 %v618_v53, %v617_v21  ;;  %v630_v1 = vsel %vm521_vm0, %v4039_v37, 0.0  ;;  %v645_v38 = vsel %vm521_vm0, %v4070_v6, 0.0  ;;  %v7467_v37 = vld [vmem:[#allocation92_spill] sm:$0xff]  ;;  %v7473_v50 = vld [vmem:[#allocation87_spill] sm:$0xff] }
  0xb2   : > { %v667_v22 = vsel %vm521_vm0, %v4128_v11, 0.0  ;;  %v596_v3 = vadd.f32 %v595_v41, %v594_v61  ;;  %v644_v25 = vadd.f32 %v643_v45, %v642_v4  ;;  %v647_v0 = vsel %vm521_vm0, %v4083_v12, 0.0  ;;  %v7469_v41 = vld [vmem:[#allocation82_spill] sm:$0xff]  ;;  %v7475_v4 = vld [vmem:[#allocation111_spill] sm:$0xff] }
  0xb3   : > { %v573_v32 = vadd.f32 %v572_v55, %v571_v31  ;;  %v621_v42 = vadd.f32 %v620_v58, %v619_v57  ;;  %v649_v63 = vsel %vm521_vm0, %v7465_v62, 0.0  ;;  %v668_v16 = vsel %vm521_vm0, %v7466_v15, 0.0  ;;  %v7468_v55 = vld [vmem:[#allocation78_spill] sm:$0xff]  ;;  %v7471_v58 = vld [vmem:[#allocation83_spill] sm:$0xff] }
  0xb4   : > { %v670_v44 = vsel %vm521_vm0, %v7467_v37, 0.0  ;;  %v598_v5 = vadd.f32 %v597_v29, %v596_v3  ;;  %v646_v11 = vadd.f32 %v645_v38, %v644_v25  ;;  %v651_v8 = vsel %vm521_vm0, %v7468_v55, 0.0  ;;  %v7472_v29 = vld [vmem:[#allocation84_spill] sm:$0xff]  ;;  %v7474_v31 = vld [vmem:[#allocation94_spill] sm:$0xff] }
  0xb5   : > { %v574_v6 = vrot.slane %v573_v32, 4  ;;  %v623_v26 = vadd.f32 %v622_v56, %v621_v42  ;;  %v653_v49 = vsel %vm521_vm0, %v7469_v41, 0.0  ;;  %v669_v12 = vadd.f32 %v668_v16, %v667_v22  ;;  %v7476_v42 = vld [vmem:[#allocation98_spill] sm:$0xff] }
  0xb6   : > { %v672_v10 = vsel %vm521_vm0, %v7470_v52, 0.0  ;;  %v600_v28 = vadd.f32 %v599_v46, %v598_v5  ;;  %v648_v53 = vadd.f32 %v647_v0, %v646_v11  ;;  %v655_v59 = vsel %vm521_vm0, %v7471_v58, 0.0  ;;  %v7479_v5 = vld [vmem:[#allocation100_spill] sm:$0xff]  ;;  %v7483_v58 = vld [vmem:[#allocation106_spill] sm:$0xff] }
  0xb7   : > { %v575_v36 = vadd.f32 %v574_v6, %v573_v32  ;;  %v625_v17 = vadd.f32 %v624_v30, %v623_v26  ;;  %v657_v60 = vsel %vm521_vm0, %v7472_v29, 0.0  ;;  %v659_v20 = vsel %vm521_vm0, %v7473_v50, 0.0 }
  0xb8   : > { %v671_v21 = vadd.f32 %v670_v44, %v669_v12  ;;  %v602_v9 = vadd.f32 %v601_v51, %v600_v28  ;;  %v650_v45 = vadd.f32 %v649_v63, %v648_v53  ;;  %v674_v61 = vsel %vm521_vm0, %v7474_v31, 0.0  ;;  %v7478_v63 = vld [vmem:[#allocation115_spill] sm:$0xff]  ;;  %v7480_v12 = vld [vmem:[#allocation116_spill] sm:$0xff]  ;;  %v7481_v28 = vld [vmem:[#allocation101_spill] sm:$0xff] }
  0xb9   : > { %v627_v56 = vadd.f32 %v626_v43, %v625_v17  ;;  %v576_v57 = vrot.slane %v575_v36, 2  ;;  %v696_v30 = vsel %vm521_vm0, %v4216_v23, 0.0  ;;  %v697_v38 = vsel %vm521_vm0, %v7475_v4, 0.0  ;;  %v7477_v43 = vld [vmem:[#allocation99_spill] sm:$0xff] }
  0xba   : > { %v673_v46 = vadd.f32 %v672_v10, %v671_v21  ;;  %v603_v22 = vrot.slane %v602_v9, 4  ;;  %v652_v3 = vadd.f32 %v651_v8, %v650_v45  ;;  %v676_v25 = vsel %vm521_vm0, %v7476_v42, 0.0 }
  0xbb   : > { %v629_v32 = vadd.f32 %v628_v33, %v627_v56  ;;  %v678_v0 = vsel %vm521_vm0, %v7477_v43, 0.0  ;;  %v698_v62 = vadd.f32 %v697_v38, %v696_v30  ;;  %v699_v15 = vsel %vm521_vm0, %v7478_v63, 0.0 }
  0xbc   : > { %v675_v51 = vadd.f32 %v674_v61, %v673_v46  ;;  %v604_v16 = vadd.f32 %v603_v22, %v602_v9  ;;  %v654_v23 = vadd.f32 %v653_v49, %v652_v3  ;;  %v701_v44 = vsel %vm521_vm0, %v4239_v13, 0.0  ;;  %v7482_v49 = vld [vmem:[#allocation105_spill] sm:$0xff]  ;;  %v7484_v9 = vld [vmem:[#allocation110_spill] sm:$0xff]  ;;  %v7485_v46 = vld [vmem:[#allocation119_spill] sm:$0xff] }
  0xbd   : > { %v631_v37 = vadd.f32 %v630_v1, %v629_v32  ;;  %v577_v6 = vadd.f32 %v576_v57, %v575_v36  ;;  %v680_v26 = vsel %vm521_vm0, %v7479_v5, 0.0  ;;  %v700_v11 = vadd.f32 %v699_v15, %v698_v62  ;;  %v7486_v3 = vld [vmem:[#allocation120_spill] sm:$0xff] }
  0xbe   : > { %v677_v33 = vadd.f32 %v676_v25, %v675_v51  ;;  %v605_v55 = vrot.slane %v604_v16, 2  ;;  %v656_v41 = vadd.f32 %v655_v59, %v654_v23  ;;  %v703_v52 = vsel %vm521_vm0, %v7480_v12, 0.0  ;;  %v4500_v12 = vld [vmem:[%s3665_s12 + $0x2f0] sm:$0xff] }
  0xbf   : > { %v632_v8 = vrot.slane %v631_v37, 4  ;;  %v682_v1 = vsel %vm521_vm0, %v7481_v28, 0.0  ;;  %v684_v17 = vsel %vm521_vm0, %v7482_v49, 0.0  ;;  %v702_v13 = vadd.f32 %v701_v44, %v700_v11  ;;  %7489 = vst [vmem:[#allocation77_spill] sm:$0xff] %v4500_v12 }
  0xc0   : > { %v679_v10 = vadd.f32 %v678_v0, %v677_v33  ;;  %v658_v53 = vadd.f32 %v657_v60, %v656_v41  ;;  %v686_v29 = vsel %vm521_vm0, %v7483_v58, 0.0  ;;  %v705_v50 = vsel %vm521_vm0, %v4253_v14, 0.0 }
  0xc1   : > { %v633_v36 = vadd.f32 %v632_v8, %v631_v37  ;;  %v578_v59 = vrot.slane %v577_v6, 1  ;;  %v688_v56 = vsel %vm521_vm0, %v7484_v9, 0.0  ;;  %v704_v45 = vadd.f32 %v703_v52, %v702_v13  ;;  %v7488_v8 = vld [vmem:[#allocation124_spill] sm:$0xff]  ;;  %v4510_v13 = vld [vmem:[%s3665_s12 + $0x2f8] sm:$0xff] }
  0xc2   : > { %v681_v21 = vadd.f32 %v680_v26, %v679_v10  ;;  %v606_v31 = vadd.f32 %v605_v55, %v604_v16  ;;  %v660_v57 = vadd.f32 %v659_v20, %v658_v53  ;;  %v707_v30 = vsel %vm521_vm0, %v7485_v46, 0.0  ;;  %7491 = vst [vmem:[#allocation88_spill] sm:$0xff] %v4510_v13 }
  0xc3   : > { %v634_v61 = vrot.slane %v633_v36, 2  ;;  %v706_v60 = vadd.f32 %v705_v50, %v704_v45  ;;  %v725_v38 = vsel %vm521_vm0, %v4296_v35, 0.0  ;;  %v726_v14 = vsel %vm521_vm0, %v4300_v7, 0.0 }
  0xc4   : > { %v683_v4 = vadd.f32 %v682_v1, %v681_v21  ;;  %v661_v32 = vrot.slane %v660_v57, 4  ;;  %v709_v42 = vsel %vm521_vm0, %v7486_v3, 0.0  ;;  %v727_v25 = vadd.f32 %v726_v14, %v725_v38 }
  0xc5   : > { %v635_v22 = vadd.f32 %v634_v61, %v633_v36  ;;  %v708_v43 = vadd.f32 %v707_v30, %v706_v60  ;;  %v728_v20 = vsel %vm521_vm0, %v4306_v39, 0.0  ;;  %v730_v0 = vsel %vm521_vm0, %v4310_v34, 0.0  ;;  %v7487_v34 = vld [vmem:[#allocation123_spill] sm:$0xff] }
  0xc6   : > { %v685_v51 = vadd.f32 %v684_v17, %v683_v4  ;;  %v607_v62 = vrot.slane %v606_v31, 1  ;;  %v662_v63 = vadd.f32 %v661_v32, %v660_v57  ;;  %v711_v35 = vsel %vm521_vm0, %v4271_v40, 0.0 }
  0xc7   : > { %v729_v7 = vadd.f32 %v728_v20, %v727_v25  ;;  %v4485_v15 = vadd.f32 %v549_v54, %v4325_v18  ;;  %v710_v37 = vadd.f32 %v709_v42, %v708_v43  ;;  %v732_v39 = vsel %vm521_vm0, %v4319_v27, 0.0 }
  0xc8   : > { %v687_v16 = vadd.f32 %v686_v29, %v685_v51  ;;  %v636_v23 = vrot.slane %v635_v22, 1  ;;  %v663_v44 = vrot.slane %v662_v63, 2  ;;  %v713_v33 = vsel %vm521_vm0, %v7487_v34, 0.0 }
  0xc9   : > { %v731_v5 = vadd.f32 %v730_v0, %v729_v7  ;;  %v4491_v26 = vadd.f32 %v578_v59, %v577_v6  ;;  %v712_v11 = vadd.f32 %v711_v35, %v710_v37  ;;  %v734_v18 = vsel %vm521_vm0, %v4323_v47, 0.0  ;;  %v7490_v47 = vld [vmem:[#allocation128_spill] sm:$0xff] }
  0xca   : > { %v689_v40 = vadd.f32 %v688_v56, %v687_v16  ;;  %v4495_v54 = vadd.f32 %v607_v62, %v606_v31  ;;  %v664_v55 = vadd.f32 %v663_v44, %v662_v63  ;;  %v715_v27 = vsel %vm521_vm0, %v7488_v8, 0.0 }
  0xcb   : > { %v733_v41 = vadd.f32 %v732_v39, %v731_v5  ;;  %v714_v10 = vadd.f32 %v713_v33, %v712_v11  ;;  %v736_v6 = vsel %vm521_vm0, %v4331_v2, 0.0  ;;  %3208 = vrsqrt.f32 %v4485_v15 }
  0xcc   : > { %v690_v52 = vrot.slane %v689_v40, 4  ;;  %v4505_v28 = vadd.f32 %v636_v23, %v635_v22  ;;  %v665_v1 = vrot.slane %v664_v55, 1  ;;  %v717_v49 = vsel %vm521_vm0, %v7490_v47, 0.0 }
  0xcd   : > { %v735_v17 = vadd.f32 %v734_v18, %v733_v41  ;;  %v716_v53 = vadd.f32 %v715_v27, %v714_v10  ;;  %v738_v58 = vsel %vm521_vm0, %v4335_v24, 0.0  ;;  %3210 = vrsqrt.f32 %v4491_v26 }
  0xce   : > { %v691_v36 = vadd.f32 %v690_v52, %v689_v40  ;;  %v519_v2 = vmul.f32 %v4500_v12, %v4500_v12  ;;  %v4517_v29 = vadd.f32 %v665_v1, %v664_v55  ;;  %v740_v9 = vsel %vm521_vm0, %v4339_v48, 0.0 }
  0xcf   : > { %v737_v50 = vadd.f32 %v736_v6, %v735_v17  ;;  %v718_v21 = vadd.f32 %v717_v49, %v716_v53  ;;  %3212 = vrsqrt.f32 %v4495_v54  ;;  %v520_v56 = vmul.f32 %v4510_v13, %v4510_v13 }
  0xd0   : > { %v692_v59 = vrot.slane %v691_v36, 2  ;;  %3214 = vrsqrt.f32 %v4505_v28  ;;  %v742_v61 = vsel %vm521_vm0, %v4351_v19, 0.0  ;;  %v744_v48 = vsel %vm521_vm0, %v519_v2, 0.0 }
  0xd1   : > { %v739_v45 = vadd.f32 %v738_v58, %v737_v50  ;;  %v719_v31 = vrot.slane %v718_v21, 4  ;;  %3216 = vrsqrt.f32 %v4517_v29  ;;  %v746_v60 = vsel %vm521_vm0, %v520_v56, 0.0 }
  0xd2   : > { %v693_v24 = vadd.f32 %v692_v59, %v691_v36  ;;  %vm756_vm1 = vcmp.eq.f32.partialorder %v4485_v15, inf  ;;  %vm758_vm2 = vcmp.eq.f32.partialorder %v4485_v15, 0.0  ;;  %v759_v32 = vand.u32 2147483648, %v4485_v15 }
  0xd3   : > { %v741_v57 = vadd.f32 %v740_v9, %v739_v45  ;;  %v720_v30 = vadd.f32 %v719_v31, %v718_v21  ;;  %vm763_vm3 = vcmp.eq.f32.partialorder %v4491_v26, inf  ;;  %vm765_vm4 = vcmp.eq.f32.partialorder %v4491_v26, 0.0 }
  0xd4   : > { %v694_v46 = vrot.slane %v693_v24, 1  ;;  %v766_v42 = vand.u32 2147483648, %v4491_v26  ;;  %vm770_vm5 = vcmp.eq.f32.partialorder %v4495_v54, inf  ;;  %vm772_vm6 = vcmp.eq.f32.partialorder %v4495_v54, 0.0 }
  0xd5   : > { %v743_v4 = vadd.f32 %v742_v61, %v741_v57  ;;  %v3209_v38 = vpop.eup %3208  ;;  %v721_v22 = vrot.slane %v720_v30, 2  ;;  %v773_v62 = vand.u32 2147483648, %v4495_v54  ;;  %vm777_vm7 = vcmp.eq.f32.partialorder %v4505_v28, inf }
  0xd6   : > { %v695_v14 = vadd.f32 %v694_v46, %v693_v24  ;;  %v755_v3 = vmul.f32 %v3209_v38, %v4485_v15  ;;  %vm779_vm8 = vcmp.eq.f32.partialorder %v4505_v28, 0.0  ;;  %v780_v44 = vand.u32 2147483648, %v4505_v28 }
  0xd7   : > { %v745_v19 = vadd.f32 %v744_v48, %v743_v4  ;;  %v3211_v25 = vpop.eup %3210  ;;  %v722_v51 = vadd.f32 %v721_v22, %v720_v30  ;;  %vm784_vm9 = vcmp.eq.f32.partialorder %v4517_v29, inf  ;;  %vm786_vm10 = vcmp.eq.f32.partialorder %v4517_v29, 0.0 }
  0xd8   : > { %3218 = vrsqrt.f32 %v695_v14  ;;  %v757_v20 = vsel %vm756_vm1, %v4485_v15, %v755_v3  ;;  %v762_v0 = vmul.f32 %v3211_v25, %v4491_v26  ;;  %v787_v18 = vand.u32 2147483648, %v4517_v29 }
  0xd9   : > { %v747_v43 = vadd.f32 %v746_v60, %v745_v19  ;;  %v3213_v63 = vpop.eup %3212  ;;  %v723_v35 = vrot.slane %v722_v51, 1  ;;  %v4546_v7 = vsel %vm758_vm2, %v759_v32, %v757_v20  ;;  %vm791_vm11 = vcmp.eq.f32.partialorder %v695_v14, inf }
  0xda   : > { %7492 = vst [vmem:[#allocation92_spill] sm:$0xff] %v4546_v7  ;;  %v3215_v16 = vpop.eup %3214  ;;  %v764_v39 = vsel %vm763_vm3, %v4491_v26, %v762_v0  ;;  %v769_v23 = vmul.f32 %v3213_v63, %v4495_v54  ;;  %v794_v1 = vand.u32 2147483648, %v695_v14  ;;  %vm793_vm12 = vcmp.eq.f32.partialorder %v695_v14, 0.0 }
  0xdb   : > { %v748_v37 = vrot.slane %v747_v43, 4  ;;  %v724_v34 = vadd.f32 %v723_v35, %v722_v51  ;;  %v4557_v15 = vsel %vm765_vm4, %v766_v42, %v764_v39  ;;  %v776_v33 = vmul.f32 %v3215_v16, %v4505_v28  ;;  %v3217_v5 = vpop.eup %3216 }
  0xdc   : > { %7493 = vst [vmem:[#allocation78_spill] sm:$0xff] %v4557_v15  ;;  %v771_v11 = vsel %vm770_vm5, %v4495_v54, %v769_v23  ;;  %v783_v8 = vmul.f32 %v3217_v5, %v4517_v29  ;;  %vm814_vm2 = vcmask (!%p3115_p13), 0   ;;  %v3462_v24 = vmov (!%p3115_p13), 0.0  }
  0xdd   : > { %v749_v40 = vadd.f32 %v748_v37, %v747_v43  ;;  %v4568_v55 = vsel %vm772_vm6, %v773_v62, %v771_v11  ;;  %v778_v26 = vsel %vm777_vm7, %v4505_v28, %v776_v33  ;;  %3220 = vrsqrt.f32 %v724_v34  ;;  %815 = vst.msk [vmem:[#allocation2] sm:$0x1] (!%p3115_p13), %vm814_vm2, %v3462_v24  ;;  %816 = vst.msk [vmem:[#allocation2 + $0x1] sm:$0x1] (!%p3115_p13), %vm814_vm2, %v3462_v24 }
  0xde   : > { %7494 = vst [vmem:[#allocation82_spill] sm:$0xff] %v4568_v55  ;;  %v4576_v41 = vsel %vm779_vm8, %v780_v44, %v778_v26  ;;  %v785_v52 = vsel %vm784_vm9, %v4517_v29, %v783_v8  ;;  %vm798_vm13 = vcmp.eq.f32.partialorder %v724_v34, inf  ;;  %v801_v28 = vand.u32 2147483648, %v724_v34  ;;  %817 = vst.msk [vmem:[#allocation2 + $0x2] sm:$0x1] (!%p3115_p13), %vm814_vm2, %v3462_v24 }
  0xdf   : > { %v750_v27 = vrot.slane %v749_v40, 2  ;;  %7495 = vst [vmem:[#allocation93_spill] sm:$0xff] %v4576_v41  ;;  %v4579_v6 = vsel %vm786_vm10, %v787_v18, %v785_v52  ;;  %vm800_vm14 = vcmp.eq.f32.partialorder %v724_v34, 0.0  ;;  %818 = vst.msk [vmem:[#allocation2 + $0x3] sm:$0x1] (!%p3115_p13), %vm814_vm2, %v3462_v24 }
  0xe0   : > { %7496 = vst [vmem:[#allocation83_spill] sm:$0xff] %v4579_v6  ;;  %819 = vst.msk [vmem:[#allocation2 + $0x4] sm:$0x1] (!%p3115_p13), %vm814_vm2, %v3462_v24 }
  0xe1   : > { %v751_v10 = vadd.f32 %v750_v27, %v749_v40  ;;  %820 = vst.msk [vmem:[#allocation2 + $0x5] sm:$0x1] (!%p3115_p13), %vm814_vm2, %v3462_v24  ;;  %821 = vst.msk [vmem:[#allocation2 + $0x6] sm:$0x1] (!%p3115_p13), %vm814_vm2, %v3462_v24 }
  0xe2   : > { %v3219_v54 = vpop.eup %3218  ;;  %822 = vst.msk [vmem:[#allocation2 + $0x7] sm:$0x1] (!%p3115_p13), %vm814_vm2, %v3462_v24 }
  0xe3   : > { %v752_v47 = vrot.slane %v751_v10, 1  ;;  %v790_v49 = vmul.f32 %v3219_v54, %v695_v14 }
  0xe5   : > { %v753_v17 = vadd.f32 %v752_v47, %v751_v10  ;;  %v792_v36 = vsel %vm791_vm11, %v695_v14, %v790_v49 }
  0xe6   : > { %v4581_v53 = vsel %vm793_vm12, %v794_v1, %v792_v36 }
  0xe7   : > { %7497 = vst [vmem:[#allocation84_spill] sm:$0xff] %v4581_v53  ;;  %3222 = vrsqrt.f32 %v753_v17  ;;  %v3221_v58 = vpop.eup %3220  ;;  %vm805_vm15 = vcmp.eq.f32.partialorder %v753_v17, inf  ;;  %v808_v21 = vand.u32 2147483648, %v753_v17  ;;  %vm807_vm1 = vcmp.eq.f32.partialorder %v753_v17, 0.0 }
  0xe8   : > { %v797_v2 = vmul.f32 %v3221_v58, %v724_v34 }
  0xea   : > { %v799_v29 = vsel %vm798_vm13, %v724_v34, %v797_v2 }
  0xeb   : > { %v4583_v50 = vsel %vm800_vm14, %v801_v28, %v799_v29 }
  0xec   : > { %7498 = vst [vmem:[#allocation87_spill] sm:$0xff] %v4583_v50 }
  0xf0   : > { %813 = sbr.rel (%p3115_p13) target bundleno = 247 (0xf7), region = 48 }
  0xf1   : > { %v3223_v59 = vpop.eup %3222 }
  0xf2   : > { %v804_v9 = vmul.f32 %v3223_v59, %v753_v17 }
  0xf4   : > { %v806_v56 = vsel %vm805_vm15, %v753_v17, %v804_v9 }
  0xf5   : > { %v4585_v45 = vsel %vm807_vm1, %v808_v21, %v806_v56 }
  0xf6   : > { %7499 = vst [vmem:[#allocation94_spill] sm:$0xff] %v4585_v45 }
  0xf7 PF: > { %v3463_v31 = vmov 0   ;;  %v7500_v61 = vld [vmem:[#allocation13_spill] sm:$0xff]  ;;  %v7501_v57 = vld [vmem:[#allocation11_spill] sm:$0xff]  ;;  %v7502_v46 = vld [vmem:[#allocation14_spill] sm:$0xff]  ;;  %p3116_p5 = scmp.ne.s32.totalorder %s3436_s18, 4 }
  0xf8   : > { %3225 = vset.pattern.permute.xlu1 %v3463_v31  ;;  %3224 = vset.pattern.permute.xlu0 %v3463_v31  ;;  %v7503_v30 = vld [vmem:[#allocation12_spill] sm:$0xff]  ;;  %v7505_v4 = vld [vmem:[#allocation15_spill] sm:$0xff]  ;;  %v7506_v60 = vld [vmem:[#allocation18_spill] sm:$0xff] }
  0xf9   : > { %931 = vperm.xlu1 %3225, %v7500_v61   ;;  %921 = vperm.xlu0 %3224, %v7501_v57   ;;  %v7504_v48 = vld [vmem:[#allocation16_spill] sm:$0xff]  ;;  %v7507_v38 = vld [vmem:[#allocation17_spill] sm:$0xff]  ;;  %v7509_v22 = vld [vmem:[#allocation19_spill] sm:$0xff] }
  0xfa   : > { %v7508_v14 = vld [vmem:[#allocation20_spill] sm:$0xff]  ;;  %v7510_v32 = vld [vmem:[#allocation22_spill] sm:$0xff]  ;;  %v7511_v19 = vld [vmem:[#allocation21_spill] sm:$0xff] }
  0xfb   : > { %v7512_v3 = vld [vmem:[#allocation24_spill] sm:$0xff]  ;;  %v7513_v42 = vld [vmem:[#allocation23_spill] sm:$0xff]  ;;  %v7514_v25 = vld [vmem:[#allocation26_spill] sm:$0xff] }
  0xfc   : > { %v7515_v51 = vld [vmem:[#allocation25_spill] sm:$0xff]  ;;  %v7516_v43 = vld [vmem:[#allocation28_spill] sm:$0xff]  ;;  %v7517_v20 = vld [vmem:[#allocation27_spill] sm:$0xff] }
  0xfd   : > { %936 = vperm.xlu1 %3225, %v7502_v46   ;;  %926 = vperm.xlu0 %3224, %v7503_v30   ;;  %v7518_v0 = vld [vmem:[#allocation30_spill] sm:$0xff]  ;;  %v7519_v62 = vld [vmem:[#allocation29_spill] sm:$0xff]  ;;  %v7520_v63 = vld [vmem:[#allocation32_spill] sm:$0xff] }
  0xfe   : > { %v7521_v35 = vld [vmem:[#allocation31_spill] sm:$0xff]  ;;  %v7522_v16 = vld [vmem:[#allocation34_spill] sm:$0xff]  ;;  %v7523_v37 = vld [vmem:[#allocation33_spill] sm:$0xff] }
  0xff   : > { %v7524_v39 = vld [vmem:[#allocation36_spill] sm:$0xff]  ;;  %v7525_v23 = vld [vmem:[#allocation35_spill] sm:$0xff]  ;;  %v7526_v44 = vld [vmem:[#allocation38_spill] sm:$0xff] }
 0x100   : > { %v7527_v34 = vld [vmem:[#allocation37_spill] sm:$0xff]  ;;  %v7528_v33 = vld [vmem:[#allocation40_spill] sm:$0xff]  ;;  %v7529_v5 = vld [vmem:[#allocation39_spill] sm:$0xff] }
 0x101   : > { %946 = vperm.xlu1 %3225, %v7504_v48   ;;  %941 = vperm.xlu0 %3224, %v7505_v4   ;;  %v7530_v40 = vld [vmem:[#allocation42_spill] sm:$0xff]  ;;  %v7531_v11 = vld [vmem:[#allocation41_spill] sm:$0xff]  ;;  %v7532_v18 = vld [vmem:[#allocation44_spill] sm:$0xff] }
 0x102   : > { %v7533_v26 = vld [vmem:[#allocation43_spill] sm:$0xff]  ;;  %v7534_v8 = vld [vmem:[#allocation46_spill] sm:$0xff]  ;;  %v7535_v27 = vld [vmem:[#allocation45_spill] sm:$0xff] }
 0x103   : > { %v7536_v52 = vld [vmem:[#allocation48_spill] sm:$0xff]  ;;  %v7537_v10 = vld [vmem:[#allocation47_spill] sm:$0xff]  ;;  %v7538_v54 = vld [vmem:[#allocation50_spill] sm:$0xff] }
 0x104   : > { %v7539_v1 = vld [vmem:[#allocation49_spill] sm:$0xff]  ;;  %v7540_v47 = vld [vmem:[#allocation52_spill] sm:$0xff]  ;;  %v7541_v49 = vld [vmem:[#allocation51_spill] sm:$0xff] }
 0x105   : > { %956 = vperm.xlu1 %3225, %v7506_v60   ;;  %951 = vperm.xlu0 %3224, %v7507_v38   ;;  %v7542_v17 = vld [vmem:[#allocation54_spill] sm:$0xff]  ;;  %v7543_v36 = vld [vmem:[#allocation53_spill] sm:$0xff]  ;;  %v7544_v58 = vld [vmem:[#allocation56_spill] sm:$0xff] }
 0x106   : > { %v7545_v28 = vld [vmem:[#allocation55_spill] sm:$0xff]  ;;  %v7546_v2 = vld [vmem:[#allocation58_spill] sm:$0xff]  ;;  %v7547_v29 = vld [vmem:[#allocation57_spill] sm:$0xff] }
 0x107   : > { %v7548_v59 = vld [vmem:[#allocation60_spill] sm:$0xff]  ;;  %v7549_v21 = vld [vmem:[#allocation59_spill] sm:$0xff]  ;;  %v7550_v9 = vld [vmem:[#allocation62_spill] sm:$0xff] }
 0x108   : > { %v7551_v56 = vld [vmem:[#allocation61_spill] sm:$0xff]  ;;  %v7552_v24 = vld [vmem:[#allocation64_spill] sm:$0xff]  ;;  %v7553_v31 = vld [vmem:[#allocation63_spill] sm:$0xff] }
 0x109   : > { %966 = vperm.xlu1 %3225, %v7508_v14   ;;  %961 = vperm.xlu0 %3224, %v7509_v22   ;;  %v7554_v61 = vld [vmem:[#allocation66_spill] sm:$0xff]  ;;  %v7555_v57 = vld [vmem:[#allocation65_spill] sm:$0xff]  ;;  %v7556_v46 = vld [vmem:[#allocation68_spill] sm:$0xff] }
 0x10a   : > { %v7557_v30 = vld [vmem:[#allocation67_spill] sm:$0xff]  ;;  %v7558_v48 = vld [vmem:[#allocation70_spill] sm:$0xff]  ;;  %v7559_v4 = vld [vmem:[#allocation69_spill] sm:$0xff] }
 0x10b   : > { %v7560_v60 = vld [vmem:[#allocation72_spill] sm:$0xff]  ;;  %v7561_v38 = vld [vmem:[#allocation71_spill] sm:$0xff]  ;;  %v7562_v14 = vld [vmem:[#allocation90_spill] sm:$0xff] }
 0x10c   : > { %v7563_v22 = vld [vmem:[#allocation73_spill] sm:$0xff] }
 0x10d   : > { %976 = vperm.xlu1 %3225, %v7510_v32   ;;  %971 = vperm.xlu0 %3224, %v7511_v19  }
 0x111   : > { %986 = vperm.xlu1 %3225, %v7512_v3   ;;  %981 = vperm.xlu0 %3224, %v7513_v42   ;;  %v7564_v3 = vld [vmem:[#allocation113_spill] sm:$0xff]  ;;  %v7565_v42 = vld [vmem:[#allocation91_spill] sm:$0xff] }
 0x115   : > { %996 = vperm.xlu1 %3225, %v7514_v25   ;;  %991 = vperm.xlu0 %3224, %v7515_v51  }
 0x119   : > { %1006 = vperm.xlu1 %3225, %v7516_v43   ;;  %1001 = vperm.xlu0 %3224, %v7517_v20   ;;  %v7566_v43 = vld [vmem:[#allocation95_spill] sm:$0xff]  ;;  %v7567_v20 = vld [vmem:[#allocation114_spill] sm:$0xff] }
 0x11d   : > { %1016 = vperm.xlu1 %3225, %v7518_v0   ;;  %1011 = vperm.xlu0 %3224, %v7519_v62  }
 0x121   : > { %1026 = vperm.xlu1 %3225, %v7520_v63   ;;  %1021 = vperm.xlu0 %3224, %v7521_v35   ;;  %v7568_v63 = vld [vmem:[#allocation74_spill] sm:$0xff]  ;;  %v7569_v35 = vld [vmem:[#allocation117_spill] sm:$0xff] }
 0x125   : > { %1036 = vperm.xlu1 %3225, %v7522_v16   ;;  %1031 = vperm.xlu0 %3224, %v7523_v37  }
 0x129   : > { %1046 = vperm.xlu1 %3225, %v7524_v39   ;;  %1041 = vperm.xlu0 %3224, %v7525_v23   ;;  %v7570_v39 = vld [vmem:[#allocation118_spill] sm:$0xff]  ;;  %v7571_v23 = vld [vmem:[#allocation96_spill] sm:$0xff] }
 0x12d   : > { %1056 = vperm.xlu1 %3225, %v7526_v44   ;;  %1051 = vperm.xlu0 %3224, %v7527_v34  }
 0x131   : > { %1066 = vperm.xlu1 %3225, %v7528_v33   ;;  %1061 = vperm.xlu0 %3224, %v7529_v5   ;;  %v7572_v33 = vld [vmem:[#allocation97_spill] sm:$0xff]  ;;  %v7573_v5 = vld [vmem:[#allocation75_spill] sm:$0xff] }
 0x135   : > { %1076 = vperm.xlu1 %3225, %v7530_v40   ;;  %1071 = vperm.xlu0 %3224, %v7531_v11  }
 0x139   : > { %1086 = vperm.xlu1 %3225, %v7532_v18   ;;  %1081 = vperm.xlu0 %3224, %v7533_v26   ;;  %v7576_v18 = vld [vmem:[#allocation76_spill] sm:$0xff]  ;;  %v7577_v26 = vld [vmem:[#allocation121_spill] sm:$0xff] }
 0x13d   : > { %1096 = vperm.xlu1 %3225, %v7534_v8   ;;  %1091 = vperm.xlu0 %3224, %v7535_v27   ;;  %v4689_v8 = vld [vmem:[%s3644_s30 + $0x68] sm:$0xff]  ;;  %v4692_v27 = vld [vmem:[%s3644_s30 + $0x60] sm:$0xff] }
 0x141   : > { %1106 = vperm.xlu1 %3225, %v7536_v52   ;;  %1101 = vperm.xlu0 %3224, %v7537_v10  }
 0x145   : > { %1116 = vperm.xlu1 %3225, %v7538_v54   ;;  %1111 = vperm.xlu0 %3224, %v7539_v1  }
 0x149   : > { %1126 = vperm.xlu1 %3225, %v7540_v47   ;;  %1121 = vperm.xlu0 %3224, %v7541_v49   ;;  %v7578_v47 = vld [vmem:[#allocation122_spill] sm:$0xff] }
 0x14a   : > { %v7579_v49 = vld [vmem:[#allocation102_spill] sm:$0xff] }
 0x14d   : > { %1136 = vperm.xlu1 %3225, %v7542_v17   ;;  %1131 = vperm.xlu0 %3224, %v7543_v36   ;;  %v4699_v17 = vld [vmem:[%s3644_s30 + $0x70] sm:$0xff] }
 0x151   : > { %1146 = vperm.xlu1 %3225, %v7544_v58   ;;  %1141 = vperm.xlu0 %3224, %v7545_v28   ;;  %v4702_v58 = vld [vmem:[%s3644_s30 + $0x78] sm:$0xff] }
 0x155   : > { %1156 = vperm.xlu1 %3225, %v7546_v2   ;;  %1151 = vperm.xlu0 %3224, %v7547_v29  }
 0x159   : > { %1166 = vperm.xlu1 %3225, %v7548_v59   ;;  %1161 = vperm.xlu0 %3224, %v7549_v21   ;;  %v7580_v59 = vld [vmem:[#allocation103_spill] sm:$0xff] }
 0x15a   : > { %v7581_v21 = vld [vmem:[#allocation79_spill] sm:$0xff] }
 0x15d   : > { %1176 = vperm.xlu1 %3225, %v7550_v9   ;;  %1171 = vperm.xlu0 %3224, %v7551_v56   ;;  %v4708_v9 = vld [vmem:[%s3644_s30 + $0x80] sm:$0xff] }
 0x161   : > { %1186 = vperm.xlu1 %3225, %v7552_v24   ;;  %1181 = vperm.xlu0 %3224, %v7553_v31  }
 0x165   : > { %1196 = vperm.xlu1 %3225, %v7554_v61   ;;  %1191 = vperm.xlu0 %3224, %v7555_v57   ;;  %v4712_v61 = vld [vmem:[%s3644_s30 + $0x88] sm:$0xff] }
 0x169   : > { %1206 = vperm.xlu1 %3225, %v7556_v46   ;;  %1201 = vperm.xlu0 %3224, %v7557_v30  }
 0x16d   : > { %1216 = vperm.xlu1 %3225, %v7558_v48   ;;  %1211 = vperm.xlu0 %3224, %v7559_v4   ;;  %v7582_v48 = vld [vmem:[#allocation80_spill] sm:$0xff]  ;;  %v7583_v4 = vld [vmem:[#allocation125_spill] sm:$0xff] }
 0x171   : > { %1226 = vperm.xlu1 %3225, %v7560_v60   ;;  %1221 = vperm.xlu0 %3224, %v7561_v38   ;;  %v4718_v60 = vld [vmem:[%s3644_s30 + $0x90] sm:$0xff] }
 0x175   : > { %1281 = vperm.xlu1 %3225, %v7562_v14   ;;  %1231 = vperm.xlu0 %3224, %v7563_v22  }
 0x178   : > { %v4652_v32 = vpop.permute.xlu1 %931  ;;  %v4654_v19 = vpop.permute.xlu0 %921 }
 0x179   : > { %1341 = vperm.xlu1 %3225, %v7564_v3   ;;  %1286 = vperm.xlu0 %3224, %v7565_v42   ;;  %v4722_v3 = vld [vmem:[%s3644_s30 + $0x98] sm:$0xff] }
 0x17c   : > { %v4658_v25 = vpop.permute.xlu1 %936  ;;  %v4660_v51 = vpop.permute.xlu0 %926 }
 0x17d   : > { %1291 = vperm.xlu1 %3225, %v7566_v43   ;;  %1346 = vperm.xlu0 %3224, %v7567_v20  }
 0x180   : > { %v4664_v0 = vpop.permute.xlu1 %946  ;;  %v4666_v62 = vpop.permute.xlu0 %941 }
 0x181   : > { %1236 = vperm.xlu1 %3225, %v7568_v63   ;;  %1351 = vperm.xlu0 %3224, %v7569_v35   ;;  %v7584_v63 = vld [vmem:[#allocation126_spill] sm:$0xff]  ;;  %v7585_v35 = vld [vmem:[#allocation104_spill] sm:$0xff] }
 0x184   : > { %v4670_v16 = vpop.permute.xlu1 %956  ;;  %v4672_v37 = vpop.permute.xlu0 %951 }
 0x185   : > { %1356 = vperm.xlu1 %3225, %v7570_v39   ;;  %1296 = vperm.xlu0 %3224, %v7571_v23   ;;  %v4728_v39 = vld [vmem:[%s3644_s30 + $0xa0] sm:$0xff] }
 0x188   : > { %v4676_v44 = vpop.permute.xlu1 %966  ;;  %v4678_v34 = vpop.permute.xlu0 %961 }
 0x189   : > { %1301 = vperm.xlu1 %3225, %v7572_v33   ;;  %1241 = vperm.xlu0 %3224, %v7573_v5  }
 0x18c   : > { %v4682_v40 = vpop.permute.xlu1 %976  ;;  %v4684_v11 = vpop.permute.xlu0 %971 }
 0x18d   : > { %7574 = vst [vmem:[#allocation111_spill] sm:$0xff] %v4682_v40  ;;  %7575 = vst [vmem:[#allocation98_spill] sm:$0xff] %v4684_v11  ;;  %1246 = vperm.xlu1 %3225, %v7576_v18   ;;  %1361 = vperm.xlu0 %3224, %v7577_v26   ;;  %v4732_v18 = vld [vmem:[%s3644_s30 + $0xa8] sm:$0xff] }
 0x190   : > { %v987_v52 = vpop.permute.xlu1 %986  ;;  %v982_v10 = vpop.permute.xlu0 %981 }
 0x191   : > { %v1412_v54 = vmul.f32 %v987_v52, %v4689_v8  ;;  %v1411_v1 = vmul.f32 %v982_v10, %v4692_v27  ;;  %1366 = vperm.xlu1 %3225, %v7578_v47   ;;  %1306 = vperm.xlu0 %3224, %v7579_v49   ;;  %v4738_v47 = vld [vmem:[%s3644_s30 + $0xb0] sm:$0xff] }
 0x193   : > { %v1512_v2 = vadd.f32 %v1412_v54, %v1411_v1  ;;  %v7586_v54 = vld [vmem:[#allocation107_spill] sm:$0xff]  ;;  %v7587_v1 = vld [vmem:[#allocation81_spill] sm:$0xff] }
 0x194   : > { %v997_v36 = vpop.permute.xlu1 %996  ;;  %v992_v28 = vpop.permute.xlu0 %991 }
 0x195   : > { %v1413_v29 = vmul.f32 %v992_v28, %v4699_v17  ;;  %1311 = vperm.xlu1 %3225, %v7580_v59   ;;  %1251 = vperm.xlu0 %3224, %v7581_v21   ;;  %v1414_v56 = vmul.f32 %v997_v36, %v4702_v58 }
 0x197   : > { %v1513_v24 = vadd.f32 %v1512_v2, %v1413_v29  ;;  %v4742_v2 = vld [vmem:[%s3644_s30 + $0xb8] sm:$0xff] }
 0x198   : > { %v1007_v31 = vpop.permute.xlu1 %1006  ;;  %v1002_v57 = vpop.permute.xlu0 %1001 }
 0x199   : > { %v1415_v46 = vmul.f32 %v1002_v57, %v4708_v9  ;;  %v1514_v30 = vadd.f32 %v1513_v24, %v1414_v56  ;;  %1256 = vperm.xlu1 %3225, %v7582_v48   ;;  %1371 = vperm.xlu0 %3224, %v7583_v4   ;;  %v1416_v38 = vmul.f32 %v1007_v31, %v4712_v61  ;;  %v7588_v56 = vld [vmem:[#allocation85_spill] sm:$0xff]  ;;  %v7589_v24 = vld [vmem:[#allocation127_spill] sm:$0xff]  ;;  %v4748_v31 = vld [vmem:[%s3644_s30 + $0xc8] sm:$0xff] }
 0x19a   : > { %v4751_v57 = vld [vmem:[%s3644_s30 + $0xc0] sm:$0xff] }
 0x19b   : > { %v1515_v14 = vadd.f32 %v1514_v30, %v1415_v46 }
 0x19c   : > { %v1017_v22 = vpop.permute.xlu1 %1016  ;;  %v1012_v42 = vpop.permute.xlu0 %1011 }
 0x19d   : > { %v1417_v43 = vmul.f32 %v1012_v42, %v4718_v60  ;;  %v1516_v20 = vadd.f32 %v1515_v14, %v1416_v38  ;;  %1376 = vperm.xlu1 %3225, %v7584_v63   ;;  %1316 = vperm.xlu0 %3224, %v7585_v35   ;;  %v1418_v23 = vmul.f32 %v1017_v22, %v4722_v3  ;;  %v7591_v42 = vld [vmem:[#allocation129_spill] sm:$0xff] }
 0x19e   : > { %v4764_v35 = vld [vmem:[%s3644_s30] sm:$0xff] }
 0x19f   : > { %v1517_v33 = vadd.f32 %v1516_v20, %v1417_v43  ;;  %v7592_v43 = vld [vmem:[#allocation108_spill] sm:$0xff]  ;;  %v4761_v20 = vld [vmem:[%s3644_s30 + $0xd0] sm:$0xff] }
 0x1a0   : > { %v1027_v5 = vpop.permute.xlu1 %1026  ;;  %v1022_v26 = vpop.permute.xlu0 %1021 }
 0x1a1   : > { %v1419_v52 = vmul.f32 %v1022_v26, %v4728_v39  ;;  %v1518_v10 = vadd.f32 %v1517_v33, %v1418_v23  ;;  %1321 = vperm.xlu1 %3225, %v7586_v54   ;;  %1261 = vperm.xlu0 %3224, %v7587_v1   ;;  %v1420_v49 = vmul.f32 %v1027_v5, %v4732_v18  ;;  %v4767_v23 = vld [vmem:[%s3644_s30 + $0x8] sm:$0xff]  ;;  %v4770_v5 = vld [vmem:[%s3644_s30 + $0xd8] sm:$0xff]  ;;  %v7593_v1 = vld [vmem:[#allocation109_spill] sm:$0xff] }
 0x1a3   : > { %v1519_v36 = vadd.f32 %v1518_v10, %v1419_v52  ;;  %v1631_v52 = vmul.f32 %v4764_v35, %v4764_v35  ;;  %v1632_v10 = vmul.f32 %v4767_v23, %v4767_v23 }
 0x1a4   : > { %v1037_v28 = vpop.permute.xlu1 %1036  ;;  %v1032_v29 = vpop.permute.xlu0 %1031 }
 0x1a5   : > { %v1421_v59 = vmul.f32 %v1032_v29, %v4738_v47  ;;  %v1520_v21 = vadd.f32 %v1519_v36, %v1420_v49  ;;  %1266 = vperm.xlu1 %3225, %v7588_v56   ;;  %1381 = vperm.xlu0 %3224, %v7589_v24   ;;  %v1422_v46 = vmul.f32 %v1037_v28, %v4742_v2  ;;  %v7594_v49 = vld [vmem:[#allocation86_spill] sm:$0xff]  ;;  %v4784_v29 = vld [vmem:[%s3644_s30 + $0xe0] sm:$0xff]  ;;  %v4788_v56 = vld [vmem:[%s3644_s30 + $0x10] sm:$0xff] }
 0x1a6   : > { %v1644_v36 = vmul.f32 %v4689_v8, %v4689_v8  ;;  %v1643_v28 = vmul.f32 %v4692_v27, %v4692_v27  ;;  %v1633_v8 = vmul.f32 %v4788_v56, %v4788_v56 }
 0x1a7   : > { %v1521_v30 = vadd.f32 %v1520_v21, %v1421_v59 }
 0x1a8   : > { %v1047_v48 = vpop.permute.xlu1 %1046  ;;  %v1042_v4 = vpop.permute.xlu0 %1041 }
 0x1a9   : > { %v4754_v38 = vadd.f32 %v1521_v30, %v1422_v46  ;;  %v1424_v14 = vmul.f32 %v1047_v48, %v4748_v31  ;;  %v1423_v22 = vmul.f32 %v1042_v4, %v4751_v57  ;;  %1386 = vperm.xlu1 %3225, %v7591_v42   ;;  %1326 = vperm.xlu0 %3224, %v7592_v43   ;;  %v4791_v46 = vld [vmem:[%s3644_s30 + $0xe8] sm:$0xff]  ;;  %v4801_v43 = vld [vmem:[%s3644_s30 + $0xf0] sm:$0xff] }
 0x1aa   : > { %v1727_v48 = vadd.f32 %v1632_v10, %v1631_v52  ;;  %v1645_v42 = vmul.f32 %v4699_v17, %v4699_v17  ;;  %v4808_v10 = vld [vmem:[%s3644_s30 + $0xf8] sm:$0xff] }
 0x1ab   : > { %7590 = vst [vmem:[#allocation99_spill] sm:$0xff] %v4754_v38  ;;  %v1529_v63 = vadd.f32 %v1424_v14, %v1423_v22  ;;  %v7595_v14 = vld [vmem:[#allocation89_spill] sm:$0xff]  ;;  %v1744_v22 = vadd.f32 %v1644_v36, %v1643_v28  ;;  %v1646_v28 = vmul.f32 %v4702_v58, %v4702_v58 }
 0x1ac   : > { %v1057_v33 = vpop.permute.xlu1 %1056  ;;  %v1052_v26 = vpop.permute.xlu0 %1051  ;;  %v1728_v17 = vadd.f32 %v1727_v48, %v1633_v8  ;;  %v4825_v48 = vld [vmem:[%s3644_s30 + $0x108] sm:$0xff] }
 0x1ad   : > { %v1425_v54 = vmul.f32 %v1052_v26, %v4761_v20  ;;  %1331 = vperm.xlu1 %3225, %v7593_v1   ;;  %1271 = vperm.xlu0 %3224, %v7594_v49   ;;  %v1426_v59 = vmul.f32 %v1057_v33, %v4770_v5  ;;  %v4805_v26 = vld [vmem:[%s3644_s30 + $0x18] sm:$0xff] }
 0x1ae   : > { %v1634_v1 = vmul.f32 %v4805_v26, %v4805_v26 }
 0x1af   : > { %v1530_v21 = vadd.f32 %v1529_v63, %v1425_v54 }
 0x1b0   : > { %v1067_v24 = vpop.permute.xlu1 %1066  ;;  %v1062_v30 = vpop.permute.xlu0 %1061 }
 0x1b1   : > { %v1427_v27 = vmul.f32 %v1062_v30, %v4784_v29  ;;  %v1531_v4 = vadd.f32 %v1530_v21, %v1426_v59  ;;  %1276 = vperm.xlu1 %3225, %v7595_v14   ;;  %1391 = vperm.xlu0 %3224, %v4500_v12   ;;  %v1428_v63 = vmul.f32 %v1067_v24, %v4791_v46  ;;  %v7596_v21 = vld [vmem:[#allocation112_spill] sm:$0xff]  ;;  %v4818_v24 = vld [vmem:[%s3644_s30 + $0x100] sm:$0xff] }
 0x1b2   : > { %v1745_v59 = vadd.f32 %v1744_v22, %v1645_v42  ;;  %v1729_v22 = vadd.f32 %v1728_v17, %v1634_v1  ;;  %v4839_v1 = vld [vmem:[%s3644_s30 + $0x28] sm:$0xff] }
 0x1b3   : > { %v1532_v33 = vadd.f32 %v1531_v4, %v1427_v27  ;;  %v4822_v4 = vld [vmem:[%s3644_s30 + $0x20] sm:$0xff] }
 0x1b4   : > { %v1077_v52 = vpop.permute.xlu1 %1076  ;;  %v1072_v54 = vpop.permute.xlu0 %1071  ;;  %v1635_v58 = vmul.f32 %v4822_v4, %v4822_v4 }
 0x1b5   : > { %v1429_v49 = vmul.f32 %v1072_v54, %v4801_v43  ;;  %v1533_v36 = vadd.f32 %v1532_v33, %v1428_v63  ;;  %1396 = vperm.xlu1 %3225, %v4510_v13   ;;  %1336 = vperm.xlu0 %3224, %v7596_v21   ;;  %v1430_v30 = vmul.f32 %v1077_v52, %v4808_v10  ;;  %v4835_v54 = vld [vmem:[%s3644_s30 + $0x110] sm:$0xff]  ;;  %v4842_v21 = vld [vmem:[%s3644_s30 + $0x118] sm:$0xff] }
 0x1b6   : > { %v1647_v33 = vmul.f32 %v4708_v9, %v4708_v9  ;;  %v1746_v52 = vadd.f32 %v1745_v59, %v1646_v28  ;;  %v1636_v9 = vmul.f32 %v4839_v1, %v4839_v1  ;;  %v1730_v28 = vadd.f32 %v1729_v22, %v1635_v58 }
 0x1b7   : > { %v1534_v27 = vadd.f32 %v1533_v36, %v1429_v49 }
 0x1b8   : > { %v1087_v8 = vpop.permute.xlu1 %1086  ;;  %v1082_v14 = vpop.permute.xlu0 %1081 }
 0x1b9   : > { %v1431_v42 = vmul.f32 %v1082_v14, %v4818_v24  ;;  %v1535_v63 = vadd.f32 %v1534_v27, %v1430_v30  ;;  %1926 = vperm.xlu1 %3225, %v4557_v15   ;;  %1921 = vperm.xlu0 %3224, %v4546_v7   ;;  %v1432_v49 = vmul.f32 %v1087_v8, %v4825_v48  ;;  %v4858_v15 = vld [vmem:[%s3644_s30 + $0x30] sm:$0xff]  ;;  %v4879_v7 = vld [vmem:[%s3644_s30 + $0x38] sm:$0xff] }
 0x1ba   : > { %v1648_v8 = vmul.f32 %v4712_v61, %v4712_v61  ;;  %v1747_v14 = vadd.f32 %v1746_v52, %v1647_v33  ;;  %v1656_v61 = vmul.f32 %v4748_v31, %v4748_v31  ;;  %v1655_v33 = vmul.f32 %v4751_v57, %v4751_v57  ;;  %v4876_v31 = vld [vmem:[%s3644_s30 + $0x130] sm:$0xff] }
 0x1bb   : > { %v1536_v36 = vadd.f32 %v1535_v63, %v1431_v42  ;;  %v4852_v42 = vld [vmem:[%s3644_s30 + $0x128] sm:$0xff]  ;;  %v4855_v63 = vld [vmem:[%s3644_s30 + $0x120] sm:$0xff]  ;;  %v1669_v12 = vmul.f32 %v4876_v31, %v4876_v31 }
 0x1bc   : > { %v1097_v17 = vpop.permute.xlu1 %1096  ;;  %v1092_v30 = vpop.permute.xlu0 %1091 }
 0x1bd   : > { %v1433_v59 = vmul.f32 %v1092_v30, %v4835_v54  ;;  %v1537_v27 = vadd.f32 %v1536_v36, %v1432_v49  ;;  %1936 = vperm.xlu1 %3225, %v4576_v41   ;;  %1931 = vperm.xlu0 %3224, %v4568_v55   ;;  %v1434_v58 = vmul.f32 %v1097_v17, %v4842_v21 }
 0x1be   : > { %v1637_v49 = vmul.f32 %v4858_v15, %v4858_v15  ;;  %v1731_v30 = vadd.f32 %v1730_v28, %v1636_v9  ;;  %v1761_v9 = vadd.f32 %v1656_v61, %v1655_v33  ;;  %v1657_v28 = vmul.f32 %v4761_v20, %v4761_v20  ;;  %v4894_v20 = vld [vmem:[%s3644_s30 + $0x140] sm:$0xff] }
 0x1bf   : > { %v1538_v22 = vadd.f32 %v1537_v27, %v1433_v59  ;;  %v1649_v59 = vmul.f32 %v4718_v60, %v4718_v60  ;;  %v1748_v27 = vadd.f32 %v1747_v14, %v1648_v8  ;;  %v1638_v60 = vmul.f32 %v4879_v7, %v4879_v7 }
 0x1c0   : > { %v1107_v52 = vpop.permute.xlu1 %1106  ;;  %v1102_v36 = vpop.permute.xlu0 %1101  ;;  %v1732_v8 = vadd.f32 %v1731_v30, %v1637_v49  ;;  %v1658_v49 = vmul.f32 %v4770_v5, %v4770_v5  ;;  %v1762_v30 = vadd.f32 %v1761_v9, %v1657_v28  ;;  %v4915_v28 = vld [vmem:[%s3644_s30 + $0x48] sm:$0xff] }
 0x1c1   : > { %v4867_v41 = vadd.f32 %v1538_v22, %v1434_v58  ;;  %v1436_v55 = vmul.f32 %v1107_v52, %v4852_v42  ;;  %v1435_v17 = vmul.f32 %v1102_v36, %v4855_v63  ;;  %1946 = vperm.xlu1 %3225, %v4581_v53   ;;  %1941 = vperm.xlu0 %3224, %v4579_v6   ;;  %v4884_v22 = vld [vmem:[%s3644_s30 + $0x138] sm:$0xff]  ;;  %v4911_v53 = vld [vmem:[%s3644_s30 + $0x150] sm:$0xff] }
 0x1c2   : > { %v1749_v61 = vadd.f32 %v1748_v27, %v1649_v59  ;;  %v1733_v27 = vadd.f32 %v1732_v8, %v1638_v60  ;;  %v1659_v6 = vmul.f32 %v4784_v29, %v4784_v29  ;;  %v1763_v60 = vadd.f32 %v1762_v30, %v1658_v49  ;;  %v4928_v29 = vld [vmem:[%s3644_s30 + $0x160] sm:$0xff] }
 0x1c3   : > { %7597 = vst [vmem:[#allocation115_spill] sm:$0xff] %v4867_v41  ;;  %v1546_v57 = vadd.f32 %v1436_v55, %v1435_v17  ;;  %v1650_v55 = vmul.f32 %v4722_v3, %v4722_v3  ;;  %v4898_v17 = vld [vmem:[%s3644_s30 + $0x40] sm:$0xff]  ;;  %v1668_v49 = vmul.f32 %v4852_v42, %v4852_v42  ;;  %v1667_v30 = vmul.f32 %v4855_v63, %v4855_v63  ;;  %v4944_v42 = vld [vmem:[%s3644_s30 + $0x58] sm:$0xff] }
 0x1c4   : > { %v1117_v58 = vpop.permute.xlu1 %1116  ;;  %v1112_v52 = vpop.permute.xlu0 %1111  ;;  %v1639_v59 = vmul.f32 %v4898_v17, %v4898_v17  ;;  %7598 = vst [vmem:[#allocation100_spill] sm:$0xff] %v4944_v42 }
 0x1c5   : > { %v1437_v14 = vmul.f32 %v1112_v52, %v4876_v31  ;;  %1956 = vperm.xlu1 %3225, %v4585_v45   ;;  %1951 = vperm.xlu0 %3224, %v4583_v50   ;;  %v1438_v33 = vmul.f32 %v1117_v58, %v4884_v22  ;;  %v4903_v45 = vld [vmem:[%s3644_s30 + $0x148] sm:$0xff]  ;;  %v1778_v13 = vadd.f32 %v1668_v49, %v1667_v30 }
 0x1c6   : > { %v4972_v31 = vmul.f32 %v4742_v2, %v4742_v2  ;;  %v1670_v2 = vmul.f32 %v4884_v22, %v4884_v22 }
 0x1c7   : > { %v1547_v36 = vadd.f32 %v1546_v57, %v1437_v14  ;;  %v1651_v57 = vmul.f32 %v4728_v39, %v4728_v39  ;;  %v1750_v14 = vadd.f32 %v1749_v61, %v1650_v55  ;;  %v1640_v39 = vmul.f32 %v4915_v28, %v4915_v28 }
 0x1c8   : > { %v1127_v52 = vpop.permute.xlu1 %1126  ;;  %v1122_v3 = vpop.permute.xlu0 %1121  ;;  %v1734_v55 = vadd.f32 %v1733_v27, %v1639_v59  ;;  %v4936_v27 = vld [vmem:[%s3644_s30 + $0x50] sm:$0xff] }
 0x1c9   : > { %v1439_v50 = vmul.f32 %v1122_v3, %v4894_v20  ;;  %v1548_v58 = vadd.f32 %v1547_v36, %v1438_v33  ;;  %v1440_v5 = vmul.f32 %v1127_v52, %v4903_v45  ;;  %v4920_v3 = vld [vmem:[%s3644_s30 + $0x158] sm:$0xff]  ;;  %v1652_v36 = vmul.f32 %v4732_v18, %v4732_v18 }
 0x1ca   : > { %v1751_v52 = vadd.f32 %v1750_v14, %v1651_v57  ;;  %v4941_v57 = vld [vmem:[%s3644_s30 + $0x168] sm:$0xff]  ;;  %v1641_v63 = vmul.f32 %v4936_v27, %v4936_v27 }
 0x1cb   : > { %v1549_v9 = vadd.f32 %v1548_v58, %v1439_v50 }
 0x1cc   : > { %v1137_v8 = vpop.permute.xlu1 %1136  ;;  %v1132_v33 = vpop.permute.xlu0 %1131 }
 0x1cd   : > { %v1441_v61 = vmul.f32 %v1132_v33, %v4911_v53  ;;  %v1550_v50 = vadd.f32 %v1549_v9, %v1440_v5  ;;  %v1442_v58 = vmul.f32 %v1137_v8, %v4920_v3  ;;  %v1660_v5 = vmul.f32 %v4791_v46, %v4791_v46 }
 0x1ce   : > { %v1764_v9 = vadd.f32 %v1763_v60, %v1659_v6  ;;  %v1735_v8 = vadd.f32 %v1734_v55, %v1640_v39  ;;  %v4951_v46 = vmul.f32 %v4944_v42, %v4944_v42  ;;  %v1653_v6 = vmul.f32 %v4738_v47, %v4738_v47  ;;  %v4966_v47 = vld [vmem:[%s3644_s30 + $0x178] sm:$0xff] }
 0x1cf   : > { %v1551_v59 = vadd.f32 %v1550_v50, %v1441_v61  ;;  %v1752_v60 = vadd.f32 %v1751_v52, %v1652_v36  ;;  %v4956_v50 = vld [vmem:[%s3644_s30 + $0x170] sm:$0xff] }
 0x1d0   : > { %v1147_v18 = vpop.permute.xlu1 %1146  ;;  %v1142_v14 = vpop.permute.xlu0 %1141  ;;  %v1765_v41 = vadd.f32 %v1764_v9, %v1660_v5  ;;  %v4968_v30 = vadd.f32 %v1735_v8, %v1641_v63  ;;  %v1662_v9 = vmul.f32 %v4808_v10, %v4808_v10  ;;  %v1400_v10 = vmul.f32 %v4660_v51, %v4767_v23  ;;  %v5006_v51 = vld [vmem:[%s3644_s30 + $0x248] sm:$0xff] }
 0x1d1   : > { %v1443_v33 = vmul.f32 %v1142_v14, %v4928_v29  ;;  %v1552_v61 = vadd.f32 %v1551_v59, %v1442_v58  ;;  %v1444_v39 = vmul.f32 %v1147_v18, %v4941_v57  ;;  %v872_v58 = vld [vmem:[%s3644_s30 + $0x188] sm:$0xff]  ;;  %v871_v59 = vld [vmem:[%s3644_s30 + $0x180] sm:$0xff]  ;;  %v1661_v14 = vmul.f32 %v4801_v43, %v4801_v43 }
 0x1d2   : > { %v1680_v52 = vmul.f32 %v872_v58, %v872_v58  ;;  %v1679_v49 = vmul.f32 %v871_v59, %v871_v59  ;;  %v4979_v43 = vld [vmem:[%s3644_s30 + $0x1e0] sm:$0xff]  ;;  %v4981_v5 = vadd.f32 %v1752_v60, %v1653_v6  ;;  %v873_v60 = vld [vmem:[%s3644_s30 + $0x190] sm:$0xff] }
 0x1d3   : > { %v1553_v55 = vadd.f32 %v1552_v61, %v1443_v33  ;;  %v4976_v61 = vld [vmem:[%s3644_s30 + $0x1e8] sm:$0xff]  ;;  %7600 = vst [vmem:[#allocation101_spill] sm:$0xff] %v4979_v43  ;;  %v1691_v8 = vmul.f32 %v4979_v43, %v4979_v43  ;;  %v1681_v11 = vmul.f32 %v873_v60, %v873_v60  ;;  %v1399_v43 = vmul.f32 %v4654_v19, %v4764_v35 }
 0x1d4   : > { %v1157_v38 = vpop.permute.xlu1 %1156  ;;  %v1152_v36 = vpop.permute.xlu0 %1151  ;;  %7599 = vst [vmem:[#allocation116_spill] sm:$0xff] %v4976_v61  ;;  %v1692_v63 = vmul.f32 %v4976_v61, %v4976_v61  ;;  %v1795_v42 = vadd.f32 %v1680_v52, %v1679_v49  ;;  %v1704_v19 = vmul.f32 %v5006_v51, %v5006_v51  ;;  %v1671_v35 = vmul.f32 %v4894_v20, %v4894_v20  ;;  %v5021_v52 = vld [vmem:[%s3644_s30 + $0x2a0] sm:$0xff]  ;;  %v5024_v49 = vld [vmem:[%s3644_s30 + $0x2a8] sm:$0xff] }
 0x1d5   : > { %v1445_v18 = vmul.f32 %v1152_v36, %v4956_v50  ;;  %v1554_v33 = vadd.f32 %v1553_v55, %v1444_v39  ;;  %v1779_v39 = vadd.f32 %v1778_v13, %v1669_v12  ;;  %v1446_v55 = vmul.f32 %v1157_v38, %v4966_v47  ;;  %v5000_v38 = vld [vmem:[%s3644_s30 + $0x240] sm:$0xff]  ;;  %7603 = vst [vmem:[#allocation110_spill] sm:$0xff] %v5021_v52 }
 0x1d6   : > { %v1766_v36 = vadd.f32 %v1765_v41, %v1661_v14  ;;  %7602 = vst [vmem:[#allocation106_spill] sm:$0xff] %v5000_v38  ;;  %v1812_v41 = vadd.f32 %v1692_v63, %v1691_v8  ;;  %v1703_v23 = vmul.f32 %v5000_v38, %v5000_v38  ;;  %v874_v8 = vld [vmem:[%s3644_s30 + $0x198] sm:$0xff]  ;;  %v1716_v20 = vmul.f32 %v5024_v49, %v5024_v49 }
 0x1d7   : > { %v1555_v6 = vadd.f32 %v1554_v33, %v1445_v18  ;;  %v5003_v18 = vld [vmem:[%s3644_s30 + $0x1f0] sm:$0xff]  ;;  %v1495_v33 = vadd.f32 %v1400_v10, %v1399_v43  ;;  %v875_v10 = vld [vmem:[%s3644_s30 + $0x1a0] sm:$0xff] }
 0x1d8   : > { %v1167_v40 = vpop.permute.xlu1 %1166  ;;  %v1162_v61 = vpop.permute.xlu0 %1161  ;;  %v1693_v14 = vmul.f32 %v5003_v18, %v5003_v18  ;;  %v5036_v43 = vld [vmem:[%s3644_s30 + $0x250] sm:$0xff] }
 0x1d9   : > { %v4997_v22 = vadd.f32 %v1555_v6, %v1446_v55  ;;  %v1448_v12 = vmul.f32 %v1167_v40, %v872_v58  ;;  %v1447_v13 = vmul.f32 %v1162_v61, %v871_v59  ;;  %v5016_v40 = vmul.f32 %v4818_v24, %v4818_v24  ;;  %7604 = vst [vmem:[#allocation119_spill] sm:$0xff] %v5036_v43 }
 0x1da   : > { %v1780_v58 = vadd.f32 %v1779_v39, %v1670_v2  ;;  %v5026_v61 = vadd.f32 %v1766_v36, %v1662_v9  ;;  %v1715_v24 = vmul.f32 %v5021_v52, %v5021_v52  ;;  %v1401_v2 = vmul.f32 %v4652_v32, %v4788_v56  ;;  %v5039_v9 = vld [vmem:[%s3644_s30 + $0x1f8] sm:$0xff] }
 0x1db   : > { %7601 = vst [vmem:[#allocation105_spill] sm:$0xff] %v4997_v22  ;;  %v1563_v59 = vadd.f32 %v1448_v12, %v1447_v13  ;;  %v1682_v39 = vmul.f32 %v874_v8, %v874_v8  ;;  %v1796_v12 = vadd.f32 %v1795_v42, %v1681_v11  ;;  %v1813_v36 = vadd.f32 %v1812_v41, %v1693_v14 }
 0x1dc   : > { %v1177_v63 = vpop.permute.xlu1 %1176  ;;  %v1172_v55 = vpop.permute.xlu0 %1171  ;;  %v1829_v13 = vadd.f32 %v1704_v19, %v1703_v23  ;;  %v1705_v22 = vmul.f32 %v5036_v43, %v5036_v43  ;;  %v1694_v38 = vmul.f32 %v5039_v9, %v5039_v9  ;;  %v1672_v32 = vmul.f32 %v4903_v45, %v4903_v45  ;;  %v876_v23 = vld [vmem:[%s3644_s30 + $0x1a8] sm:$0xff] }
 0x1dd   : > { %v1449_v6 = vmul.f32 %v1172_v55, %v873_v60  ;;  %v1781_v56 = vadd.f32 %v1780_v58, %v1671_v35  ;;  %v1450_v11 = vmul.f32 %v1177_v63, %v874_v8  ;;  %v5049_v60 = vld [vmem:[%s3644_s30 + $0x2b0] sm:$0xff]  ;;  %v1496_v55 = vadd.f32 %v1495_v33, %v1401_v2  ;;  %v5060_v8 = vld [vmem:[%s3644_s30 + $0x200] sm:$0xff] }
 0x1de   : > { %v1683_v19 = vmul.f32 %v875_v10, %v875_v10  ;;  %v1846_v43 = vadd.f32 %v1716_v20, %v1715_v24  ;;  %v1717_v52 = vmul.f32 %v5049_v60, %v5049_v60  ;;  %v1402_v45 = vmul.f32 %v4658_v25, %v4805_v26  ;;  %v877_v33 = vld [vmem:[%s3644_s30 + $0x1b0] sm:$0xff] }
 0x1df   : > { %v1564_v42 = vadd.f32 %v1563_v59, %v1449_v6  ;;  %v1797_v63 = vadd.f32 %v1796_v12, %v1682_v39  ;;  %v5057_v59 = vld [vmem:[%s3644_s30 + $0x258] sm:$0xff]  ;;  %v1830_v2 = vadd.f32 %v1829_v13, %v1705_v22  ;;  %v1814_v6 = vadd.f32 %v1813_v36, %v1694_v38 }
 0x1e0   : > { %v1187_v41 = vpop.permute.xlu1 %1186  ;;  %v1182_v14 = vpop.permute.xlu0 %1181  ;;  %v1706_v24 = vmul.f32 %v5057_v59, %v5057_v59  ;;  %v1695_v20 = vmul.f32 %v5060_v8, %v5060_v8  ;;  %v1673_v25 = vmul.f32 %v4911_v53, %v4911_v53  ;;  %v1782_v26 = vadd.f32 %v1781_v56, %v1672_v32  ;;  %v878_v36 = vld [vmem:[%s3644_s30 + $0x1b8] sm:$0xff] }
 0x1e1   : > { %v1451_v35 = vmul.f32 %v1182_v14, %v875_v10  ;;  %v1565_v58 = vadd.f32 %v1564_v42, %v1450_v11  ;;  %v1452_v39 = vmul.f32 %v1187_v41, %v876_v23  ;;  %v5070_v10 = vld [vmem:[%s3644_s30 + $0x2b8] sm:$0xff]  ;;  %v1497_v11 = vadd.f32 %v1496_v55, %v1402_v45  ;;  %v5084_v55 = vld [vmem:[%s3644_s30 + $0x1c0] sm:$0xff] }
 0x1e2   : > { %v1684_v22 = vmul.f32 %v876_v23, %v876_v23  ;;  %v1847_v42 = vadd.f32 %v1846_v43, %v1717_v52  ;;  %v1718_v14 = vmul.f32 %v5070_v10, %v5070_v10  ;;  %v1403_v53 = vmul.f32 %v4666_v62, %v4822_v4 }
 0x1e3   : > { %v1566_v12 = vadd.f32 %v1565_v58, %v1451_v35  ;;  %v1798_v32 = vadd.f32 %v1797_v63, %v1683_v19  ;;  %v5078_v35 = vld [vmem:[%s3644_s30 + $0x260] sm:$0xff]  ;;  %v5081_v58 = vld [vmem:[%s3644_s30 + $0x208] sm:$0xff]  ;;  %v1831_v23 = vadd.f32 %v1830_v2, %v1706_v24  ;;  %v1815_v43 = vadd.f32 %v1814_v6, %v1695_v20 }
 0x1e4   : > { %v1197_v38 = vpop.permute.xlu1 %1196  ;;  %v1192_v13 = vpop.permute.xlu0 %1191  ;;  %7605 = vst [vmem:[#allocation120_spill] sm:$0xff] %v5078_v35  ;;  %v1707_v52 = vmul.f32 %v5078_v35, %v5078_v35  ;;  %v1696_v45 = vmul.f32 %v5081_v58, %v5081_v58  ;;  %v1674_v62 = vmul.f32 %v4920_v3, %v4920_v3  ;;  %v1783_v4 = vadd.f32 %v1782_v26, %v1673_v25 }
 0x1e5   : > { %v1453_v56 = vmul.f32 %v1192_v13, %v877_v33  ;;  %v1567_v41 = vadd.f32 %v1566_v12, %v1452_v39  ;;  %v1454_v19 = vmul.f32 %v1197_v38, %v878_v36  ;;  %v5093_v39 = vld [vmem:[%s3644_s30 + $0x2c0] sm:$0xff]  ;;  %v1498_v12 = vadd.f32 %v1497_v11, %v1403_v53  ;;  %v5096_v13 = vld [vmem:[%s3644_s30 + $0x1c8] sm:$0xff]  ;;  %v5110_v11 = vld [vmem:[%s3644_s30 + $0x1d0] sm:$0xff] }
 0x1e6   : > { %v1685_v2 = vmul.f32 %v877_v33, %v877_v33  ;;  %v1848_v20 = vadd.f32 %v1847_v42, %v1718_v14  ;;  %v1719_v35 = vmul.f32 %v5093_v39, %v5093_v39  ;;  %v1404_v3 = vmul.f32 %v4664_v0, %v4839_v1  ;;  %v5107_v33 = vld [vmem:[%s3644_s30 + $0x210] sm:$0xff] }
 0x1e7   : > { %v1568_v63 = vadd.f32 %v1567_v41, %v1453_v56  ;;  %v1799_v25 = vadd.f32 %v1798_v32, %v1684_v22  ;;  %v5104_v56 = vld [vmem:[%s3644_s30 + $0x268] sm:$0xff]  ;;  %v1832_v42 = vadd.f32 %v1831_v23, %v1707_v52  ;;  %v1816_v14 = vadd.f32 %v1815_v43, %v1696_v45  ;;  %v5126_v45 = vld [vmem:[%s3644_s30 + $0x1d8] sm:$0xff] }
 0x1e8   : > { %v1207_v24 = vpop.permute.xlu1 %1206  ;;  %v1202_v6 = vpop.permute.xlu0 %1201  ;;  %7606 = vst [vmem:[#allocation123_spill] sm:$0xff] %v5104_v56  ;;  %v1708_v53 = vmul.f32 %v5104_v56, %v5104_v56  ;;  %v1697_v0 = vmul.f32 %v5107_v33, %v5107_v33  ;;  %v1675_v1 = vmul.f32 %v4928_v29, %v4928_v29  ;;  %v1784_v22 = vadd.f32 %v1783_v4, %v1674_v62 }
 0x1e9   : > { %v1455_v26 = vmul.f32 %v1202_v6, %v5084_v55  ;;  %v1569_v38 = vadd.f32 %v1568_v63, %v1454_v19  ;;  %v1456_v32 = vmul.f32 %v1207_v24, %v5096_v13  ;;  %v5120_v19 = vld [vmem:[%s3644_s30 + $0x2c8] sm:$0xff]  ;;  %v5123_v63 = vld [vmem:[%s3644_s30 + $0x218] sm:$0xff]  ;;  %v1499_v23 = vadd.f32 %v1498_v12, %v1404_v3  ;;  %v5134_v12 = vld [vmem:[%s3644_s30 + $0x270] sm:$0xff] }
 0x1ea   : > { %7607 = vst [vmem:[#allocation124_spill] sm:$0xff] %v5120_v19  ;;  %v1686_v52 = vmul.f32 %v878_v36, %v878_v36  ;;  %v1849_v56 = vadd.f32 %v1848_v20, %v1719_v35  ;;  %v1720_v29 = vmul.f32 %v5120_v19, %v5120_v19  ;;  %v1405_v62 = vmul.f32 %v4672_v37, %v4858_v15 }
 0x1eb   : > { %v1570_v41 = vadd.f32 %v1569_v38, %v1455_v26  ;;  %v1800_v4 = vadd.f32 %v1799_v25, %v1685_v2  ;;  %v1833_v36 = vadd.f32 %v1832_v42, %v1708_v53  ;;  %v1709_v3 = vmul.f32 %v5134_v12, %v5134_v12  ;;  %v5144_v2 = vld [vmem:[%s3644_s30 + $0x2d0] sm:$0xff]  ;;  %v5147_v25 = vld [vmem:[%s3644_s30 + $0x278] sm:$0xff]  ;;  %v5150_v42 = vld [vmem:[%s3644_s30 + $0x220] sm:$0xff] }
 0x1ec   : > { %v1217_v43 = vpop.permute.xlu1 %1216  ;;  %v1212_v6 = vpop.permute.xlu0 %1211  ;;  %v1817_v38 = vadd.f32 %v1816_v14, %v1697_v0  ;;  %v1698_v35 = vmul.f32 %v5123_v63, %v5123_v63  ;;  %v1676_v20 = vmul.f32 %v4941_v57, %v4941_v57  ;;  %v1785_v19 = vadd.f32 %v1784_v22, %v1675_v1  ;;  %7608 = vst [vmem:[#allocation128_spill] sm:$0xff] %v5147_v25 }
 0x1ed   : > { %v1457_v24 = vmul.f32 %v1212_v6, %v5110_v11  ;;  %v1571_v26 = vadd.f32 %v1570_v41, %v1456_v32  ;;  %v1458_v15 = vmul.f32 %v1217_v43, %v5126_v45  ;;  %v1500_v53 = vadd.f32 %v1499_v23, %v1405_v62 }
 0x1ee   : > { %v1754_v14 = vadd.f32 %v4981_v5, %v4972_v31  ;;  %v1850_v57 = vadd.f32 %v1849_v56, %v1720_v29  ;;  %v1721_v1 = vmul.f32 %v5144_v2, %v5144_v2  ;;  %v1406_v22 = vmul.f32 %v4670_v16, %v4879_v7  ;;  %v5167_v31 = vld [vmem:[%s3644_s30 + $0x2d8] sm:$0xff] }
 0x1ef   : > { %v1572_v37 = vadd.f32 %v1571_v26, %v1457_v24  ;;  %v1687_v41 = vmul.f32 %v5084_v55, %v5084_v55  ;;  %v1801_v23 = vadd.f32 %v1800_v4, %v1686_v52  ;;  %v1834_v5 = vadd.f32 %v1833_v36, %v1709_v3  ;;  %v5180_v52 = vld [vmem:[%s3644_s30 + $0x280] sm:$0xff]  ;;  %v5183_v4 = vld [vmem:[%s3644_s30 + $0x228] sm:$0xff] }
 0x1f0   : > { %v5154_v0 = vpop.permute.xlu1 %1226  ;;  %v5156_v32 = vpop.permute.xlu0 %1221  ;;  %v1818_v6 = vadd.f32 %v1817_v38, %v1698_v35  ;;  %v1710_v56 = vmul.f32 %v5147_v25, %v5147_v25  ;;  %v1699_v29 = vmul.f32 %v5150_v42, %v5150_v42  ;;  %v1664_v62 = vmul.f32 %v4825_v48, %v4825_v48  ;;  %7610 = vst [vmem:[#allocation131_spill] sm:$0xff] %v5180_v52  ;;  %v5198_v35 = vld [vmem:[%s3644_s30 + $0x2e0] sm:$0xff] }
 0x1f1   : > { %v5164_v43 = vadd.f32 %v1572_v37, %v1458_v15  ;;  %v1768_v7 = vadd.f32 %v5026_v61, %v5016_v40  ;;  %v1677_v16 = vmul.f32 %v4956_v50, %v4956_v50  ;;  %v1786_v55 = vadd.f32 %v1785_v19, %v1676_v20  ;;  %7611 = vst [vmem:[#allocation132_spill] sm:$0xff] %v5183_v4 }
 0x1f2   : > { %v1501_v24 = vadd.f32 %v1500_v53, %v1406_v22  ;;  %v1755_v26 = vrot.slane %v1754_v14, 4  ;;  %v1851_v48 = vadd.f32 %v1850_v57, %v1721_v1  ;;  %v1722_v40 = vmul.f32 %v5167_v31, %v5167_v31  ;;  %7612 = vst [vmem:[#allocation133_spill] sm:$0xff] %v5198_v35  ;;  %v5212_v57 = vld [vmem:[%s3644_s30 + $0x230] sm:$0xff] }
 0x1f3   : > { %7609 = vst [vmem:[#allocation130_spill] sm:$0xff] %v5164_v43  ;;  %v1407_v50 = vmul.f32 %v4678_v34, %v4898_v17  ;;  %v1737_v61 = vadd.f32 %v4968_v30, %v4951_v46  ;;  %v1688_v19 = vmul.f32 %v5096_v13, %v5096_v13  ;;  %v1802_v38 = vadd.f32 %v1801_v23, %v1687_v41  ;;  %v5209_v13 = vld [vmem:[%s3644_s30 + $0x288] sm:$0xff]  ;;  %v5257_v43 = vld [vmem:[%s3644_s30 + $0x298] sm:$0xff] }
 0x1f4   : > { %v5185_v36 = vpop.permute.xlu1 %1281  ;;  %v5187_v3 = vpop.permute.xlu0 %1231  ;;  %v1835_v20 = vadd.f32 %v1834_v5, %v1710_v56  ;;  %v1711_v15 = vmul.f32 %v5180_v52, %v5180_v52  ;;  %v1819_v37 = vadd.f32 %v1818_v6, %v1699_v29  ;;  %v1700_v53 = vmul.f32 %v5183_v4, %v5183_v4  ;;  %7613 = vst [vmem:[#allocation134_spill] sm:$0xff] %v5209_v13 }
 0x1f5   : > { %v1665_v34 = vmul.f32 %v4835_v54, %v4835_v54  ;;  %v1769_v17 = vadd.f32 %v1768_v7, %v1664_v62  ;;  %v1678_v46 = vmul.f32 %v4966_v47, %v4966_v47  ;;  %v1787_v30 = vadd.f32 %v1786_v55, %v1677_v16  ;;  %7614 = vst [vmem:[#allocation135_spill] sm:$0xff] %v5212_v57  ;;  %v5225_v62 = vld [vmem:[%s3644_s30 + $0x2e8] sm:$0xff] }
 0x1f6   : > { %v1502_v1 = vadd.f32 %v1501_v24, %v1407_v50  ;;  %v1756_v22 = vadd.f32 %v1755_v26, %v1754_v14  ;;  %v1852_v5 = vadd.f32 %v1851_v48, %v1722_v40  ;;  %v1723_v54 = vmul.f32 %v5198_v35, %v5198_v35  ;;  %7615 = vst [vmem:[#allocation136_spill] sm:$0xff] %v5225_v62  ;;  %v5234_v26 = vld [vmem:[%s3644_s30 + $0x290] sm:$0xff] }
 0x1f7   : > { %v1408_v47 = vmul.f32 %v4676_v44, %v4915_v28  ;;  %v1738_v6 = vrot.slane %v1737_v61, 4  ;;  %v1689_v56 = vmul.f32 %v5110_v11, %v5110_v11  ;;  %v1803_v29 = vadd.f32 %v1802_v38, %v1688_v19  ;;  %7616 = vst [vmem:[#allocation137_spill] sm:$0xff] %v5234_v26  ;;  %v5237_v11 = vld [vmem:[%s3644_s30 + $0x238] sm:$0xff]  ;;  %7620 = vst [vmem:[#allocation139_spill] sm:$0xff] %v5257_v43 }
 0x1f8   : > { %v5214_v41 = vpop.permute.xlu1 %1341  ;;  %v5216_v23 = vpop.permute.xlu0 %1286  ;;  %v1836_v14 = vadd.f32 %v1835_v20, %v1711_v15  ;;  %v1820_v7 = vadd.f32 %v1819_v37, %v1700_v53  ;;  %v1712_v16 = vmul.f32 %v5209_v13, %v5209_v13  ;;  %v1701_v55 = vmul.f32 %v5212_v57, %v5212_v57  ;;  %7617 = vst [vmem:[#allocation138_spill] sm:$0xff] %v5237_v11  ;;  %v7618_v15 = vld [vmem:[#allocation98_spill] sm:$0xff] }
 0x1f9   : > { %v1666_v24 = vmul.f32 %v4842_v21, %v4842_v21  ;;  %v1770_v44 = vadd.f32 %v1769_v17, %v1665_v34  ;;  %v1788_v28 = vadd.f32 %v1787_v30, %v1678_v46  ;;  %v1503_v48 = vadd.f32 %v1502_v1, %v1408_v47  ;;  %v5250_v17 = vld [vmem:[%s3644_s30 + $0x2f0] sm:$0xff] }
 0x1fa   : > { %v1757_v40 = vrot.slane %v1756_v22, 2  ;;  %v1853_v38 = vadd.f32 %v1852_v5, %v1723_v54  ;;  %v1724_v20 = vmul.f32 %v5225_v62, %v5225_v62  ;;  %v1409_v21 = vmul.f32 %v7618_v15, %v4936_v27  ;;  %7619 = vst [vmem:[#allocation98_spill] sm:$0xff] %v5250_v17  ;;  %v7623_v15 = vld [vmem:[#allocation111_spill] sm:$0xff] }
 0x1fb   : > { %v1739_v37 = vadd.f32 %v1738_v6, %v1737_v61  ;;  %v1690_v53 = vmul.f32 %v5126_v45, %v5126_v45  ;;  %v1804_v34 = vadd.f32 %v1803_v29, %v1689_v56  ;;  %v1837_v46 = vadd.f32 %v1836_v14, %v1712_v16 }
 0x1fc   : > { %v5239_v50 = vpop.permute.xlu1 %1291  ;;  %v5241_v19 = vpop.permute.xlu0 %1346  ;;  %v1713_v30 = vmul.f32 %v5234_v26, %v5234_v26  ;;  %v1821_v1 = vadd.f32 %v1820_v7, %v1701_v55  ;;  %v1702_v5 = vmul.f32 %v5237_v11, %v5237_v11  ;;  %v1771_v54 = vadd.f32 %v1770_v44, %v1666_v24  ;;  %v5266_v7 = vld [vmem:[%s3644_s30 + $0x2f8] sm:$0xff] }
 0x1fd   : > { %v1789_v47 = vrot.slane %v1788_v28, 4  ;;  %v1504_v27 = vadd.f32 %v1503_v48, %v1409_v21  ;;  %v1758_v61 = vadd.f32 %v1757_v40, %v1756_v22  ;;  %v1854_v56 = vadd.f32 %v1853_v38, %v1724_v20  ;;  %7621 = vst [vmem:[#allocation140_spill] sm:$0xff] %v5266_v7  ;;  %v7622_v55 = vld [vmem:[#allocation100_spill] sm:$0xff] }
 0x1fe   : > { %v1725_v29 = vmul.f32 %v5250_v17, %v5250_v17  ;;  %v1740_v14 = vrot.slane %v1739_v37, 2  ;;  %v1805_v16 = vadd.f32 %v1804_v34, %v1690_v53  ;;  %v1410_v24 = vmul.f32 %v7623_v15, %v7622_v55 }
 0x1ff   : > { %v1838_v44 = vadd.f32 %v1837_v46, %v1713_v30  ;;  %v1822_v26 = vadd.f32 %v1821_v1, %v1702_v5  ;;  %v1714_v22 = vmul.f32 %v5257_v43, %v5257_v43  ;;  %v1772_v48 = vrot.slane %v1771_v54, 4 }
 0x200   : > { %v5259_v6 = vpop.permute.xlu1 %1236  ;;  %v5261_v45 = vpop.permute.xlu0 %1351  ;;  %v1790_v40 = vadd.f32 %v1789_v47, %v1788_v28  ;;  %v1505_v21 = vadd.f32 %v1504_v27, %v1410_v24  ;;  %v1759_v11 = vrot.slane %v1758_v61, 1  ;;  %v1855_v17 = vadd.f32 %v1854_v56, %v1725_v29  ;;  %v7624_v56 = vld [vmem:[#allocation99_spill] sm:$0xff] }
 0x201   : > { %v1726_v53 = vmul.f32 %v5266_v7, %v5266_v7  ;;  %v1741_v34 = vadd.f32 %v1740_v14, %v1739_v37  ;;  %v1806_v13 = vrot.slane %v1805_v16, 4  ;;  %v1823_v55 = vrot.slane %v1822_v26, 4 }
 0x202   : > { %v1839_v46 = vadd.f32 %v1838_v44, %v1714_v22  ;;  %v1773_v30 = vadd.f32 %v1772_v48, %v1771_v54  ;;  %v1791_v1 = vrot.slane %v1790_v40, 2  ;;  %v1506_v5 = vrot.slane %v1505_v21, 4 }
 0x203   : > { %v5278_v15 = vadd.f32 %v1759_v11, %v1758_v61  ;;  %v1856_v27 = vadd.f32 %v1855_v17, %v1726_v53  ;;  %v1742_v24 = vrot.slane %v1741_v34, 1  ;;  %v1807_v43 = vadd.f32 %v1806_v13, %v1805_v16 }
 0x204   : > { %v5272_v38 = vpop.permute.xlu1 %1356  ;;  %v5274_v20 = vpop.permute.xlu0 %1296  ;;  %v1523_v29 = vrot.slane %v7624_v56, 4  ;;  %v1824_v62 = vadd.f32 %v1823_v55, %v1822_v26  ;;  %v1840_v7 = vrot.slane %v1839_v46, 4  ;;  %v1774_v37 = vrot.slane %v1773_v30, 2 }
 0x205   : > { %v1792_v14 = vadd.f32 %v1791_v1, %v1790_v40  ;;  %v1507_v52 = vadd.f32 %v1506_v5, %v1505_v21  ;;  %v1857_v11 = vrot.slane %v1856_v27, 4  ;;  %3226 = vrsqrt.f32 %v5278_v15 }
 0x206   : > { %v5290_v61 = vadd.f32 %v1742_v24, %v1741_v34  ;;  %v1808_v22 = vrot.slane %v1807_v43, 2  ;;  %v1524_v17 = vadd.f32 %v1523_v29, %v7624_v56  ;;  %v1825_v13 = vrot.slane %v1824_v62, 2 }
 0x207   : > { %v1841_v16 = vadd.f32 %v1840_v7, %v1839_v46  ;;  %v1775_v48 = vadd.f32 %v1774_v37, %v1773_v30  ;;  %v1793_v26 = vrot.slane %v1792_v14, 1  ;;  %v1508_v53 = vrot.slane %v1507_v52, 2 }
 0x208   : > { %v5280_v28 = vpop.permute.xlu1 %1301  ;;  %v5282_v47 = vpop.permute.xlu0 %1241  ;;  %v1858_v21 = vadd.f32 %v1857_v11, %v1856_v27  ;;  %v1809_v1 = vadd.f32 %v1808_v22, %v1807_v43  ;;  %3228 = vrsqrt.f32 %v5290_v61  ;;  %v1525_v5 = vrot.slane %v1524_v17, 2 }
 0x209   : > { %v1826_v57 = vadd.f32 %v1825_v13, %v1824_v62  ;;  %v1842_v34 = vrot.slane %v1841_v16, 2  ;;  %v1776_v24 = vrot.slane %v1775_v48, 1  ;;  %v5298_v35 = vadd.f32 %v1793_v26, %v1792_v14 }
 0x20a   : > { %v1509_v56 = vadd.f32 %v1508_v53, %v1507_v52  ;;  %v1859_v46 = vrot.slane %v1858_v21, 2  ;;  %v1810_v30 = vrot.slane %v1809_v1, 1  ;;  %v1526_v25 = vadd.f32 %v1525_v5, %v1524_v17 }
 0x20b   : > { %v1827_v4 = vrot.slane %v1826_v57, 1  ;;  %v1843_v27 = vadd.f32 %v1842_v34, %v1841_v16  ;;  %v5304_v43 = vadd.f32 %v1776_v24, %v1775_v48  ;;  %3230 = vrsqrt.f32 %v5298_v35  ;;  %v7625_v48 = vld [vmem:[#allocation116_spill] sm:$0xff]  ;;  %v7626_v34 = vld [vmem:[#allocation101_spill] sm:$0xff] }
 0x20c   : > { %v5285_v44 = vpop.permute.xlu1 %1246  ;;  %v5287_v54 = vpop.permute.xlu0 %1361  ;;  %v1510_v62 = vrot.slane %v1509_v56, 1  ;;  %v1860_v52 = vadd.f32 %v1859_v46, %v1858_v21  ;;  %v5311_v22 = vadd.f32 %v1810_v30, %v1809_v1  ;;  %v1527_v26 = vrot.slane %v1526_v25, 1 }
 0x20d   : > { %v5314_v53 = vadd.f32 %v1827_v4, %v1826_v57  ;;  %v1844_v17 = vrot.slane %v1843_v27, 1  ;;  %vm1872_vm3 = vcmp.eq.f32.partialorder %v5278_v15, inf  ;;  %v1460_v5 = vmul.f32 %v5154_v0, %v7625_v48 }
 0x20e   : > { %v1459_v24 = vmul.f32 %v5156_v32, %v7626_v34  ;;  %3232 = vrsqrt.f32 %v5304_v43  ;;  %v5322_v21 = vadd.f32 %v1510_v62, %v1509_v56  ;;  %v1861_v4 = vrot.slane %v1860_v52, 1 }
 0x20f   : > { %v3227_v37 = vpop.eup %3226  ;;  %v1875_v57 = vand.u32 2147483648, %v5278_v15  ;;  %v1461_v30 = vmul.f32 %v5187_v3, %v5003_v18  ;;  %vm1874_vm4 = vcmp.eq.f32.partialorder %v5278_v15, 0.0  ;;  %3234 = vrsqrt.f32 %v5311_v22 }
 0x210   : > { %v5293_v55 = vpop.permute.xlu1 %1366  ;;  %v5295_v40 = vpop.permute.xlu0 %1306  ;;  %v1871_v13 = vmul.f32 %v3227_v37, %v5278_v15  ;;  %v5334_v0 = vadd.f32 %v1527_v26, %v1526_v25  ;;  %v5336_v32 = vadd.f32 %v1844_v17, %v1843_v27  ;;  %3236 = vrsqrt.f32 %v5314_v53 }
 0x211   : > { %v1580_v62 = vadd.f32 %v1460_v5, %v1459_v24  ;;  %v1484_v48 = vmul.f32 %v5241_v19, %v5024_v49  ;;  %v1462_v18 = vmul.f32 %v5259_v6, %v5039_v9  ;;  %vm1865_vm5 = vcmp.eq.f32.partialorder %v5290_v61, inf  ;;  %v7627_v49 = vld [vmem:[#allocation110_spill] sm:$0xff] }
 0x212   : > { %v3229_v16 = vpop.eup %3228  ;;  %v1873_v37 = vsel %vm1872_vm3, %v5278_v15, %v1871_v13  ;;  %v1472_v3 = vmul.f32 %v5216_v23, %v5006_v51  ;;  %v5349_v27 = vadd.f32 %v1861_v4, %v1860_v52  ;;  %vm1867_vm6 = vcmp.eq.f32.partialorder %v5290_v61, 0.0  ;;  %v7628_v23 = vld [vmem:[#allocation106_spill] sm:$0xff]  ;;  %v7629_v52 = vld [vmem:[#allocation119_spill] sm:$0xff] }
 0x213   : > { %v1864_v56 = vmul.f32 %v3229_v16, %v5290_v61  ;;  %v5351_v13 = vsel %vm1874_vm4, %v1875_v57, %v1873_v37  ;;  %v1581_v17 = vadd.f32 %v1580_v62, %v1461_v30  ;;  %v1483_v19 = vmul.f32 %v5214_v41, %v7627_v49 }
 0x214   : > { %v5300_v29 = vpop.permute.xlu1 %1311  ;;  %v5302_v7 = vpop.permute.xlu0 %1251  ;;  %v1485_v9 = vmul.f32 %v5261_v45, %v5049_v60  ;;  %v1463_v51 = vmul.f32 %v5282_v47, %v5060_v8  ;;  %v1471_v6 = vmul.f32 %v5185_v36, %v7628_v23  ;;  %v1473_v16 = vmul.f32 %v5239_v50, %v7629_v52 }
 0x215   : > { %v3231_v26 = vpop.eup %3230  ;;  %v1866_v5 = vsel %vm1865_vm5, %v5290_v61, %v1864_v56  ;;  %v1868_v34 = vand.u32 2147483648, %v5290_v61  ;;  %v1614_v24 = vadd.f32 %v1484_v48, %v1483_v19  ;;  %v1582_v4 = vadd.f32 %v1581_v17, %v1462_v18 }
 0x216   : > { %v1486_v41 = vmul.f32 %v5272_v38, %v5070_v10  ;;  %v1464_v60 = vmul.f32 %v5285_v44, %v5081_v58  ;;  %v1597_v45 = vadd.f32 %v1472_v3, %v1471_v6  ;;  %v1474_v8 = vmul.f32 %v5274_v20, %v5057_v59  ;;  %v7630_v38 = vld [vmem:[#allocation120_spill] sm:$0xff] }
 0x217   : > { %v1885_v50 = vmul.f32 %v3231_v26, %v5298_v35  ;;  %vm1886_vm7 = vcmp.eq.f32.partialorder %v5298_v35, inf  ;;  %v1615_v30 = vadd.f32 %v1614_v24, %v1485_v9  ;;  %v1583_v37 = vadd.f32 %v1582_v4, %v1463_v51  ;;  %v7631_v3 = vld [vmem:[#allocation124_spill] sm:$0xff] }
 0x218   : > { %v5307_v11 = vpop.permute.xlu1 %1256  ;;  %v5309_v14 = vpop.permute.xlu0 %1371  ;;  %v1487_v56 = vmul.f32 %v5287_v54, %v5093_v39  ;;  %v1465_v10 = vmul.f32 %v5302_v7, %v5107_v33  ;;  %v1598_v58 = vadd.f32 %v1597_v45, %v1473_v16  ;;  %v1475_v44 = vmul.f32 %v5280_v28, %v7630_v38  ;;  %v7632_v7 = vld [vmem:[#allocation123_spill] sm:$0xff]  ;;  %v7634_v4 = vld [vmem:[#allocation128_spill] sm:$0xff] }
 0x219   : > { %v3233_v57 = vpop.eup %3232  ;;  %v5382_v59 = vsel %vm1867_vm6, %v1868_v34, %v1866_v5  ;;  %v1889_v20 = vand.u32 2147483648, %v5298_v35  ;;  %v1616_v48 = vadd.f32 %v1615_v30, %v1486_v41  ;;  %v1584_v18 = vadd.f32 %v1583_v37, %v1464_v60  ;;  %v7633_v5 = vld [vmem:[#allocation132_spill] sm:$0xff]  ;;  %v7635_v41 = vld [vmem:[#allocation133_spill] sm:$0xff] }
 0x21a   : > { %v3235_v62 = vpop.eup %3234  ;;  %v1488_v26 = vmul.f32 %v5293_v55, %v7631_v3  ;;  %v1466_v39 = vmul.f32 %v5307_v11, %v5123_v63  ;;  %v1599_v54 = vadd.f32 %v1598_v58, %v1474_v8  ;;  %v1476_v28 = vmul.f32 %v5295_v40, %v7632_v7  ;;  %v7637_v8 = vld [vmem:[#allocation131_spill] sm:$0xff]  ;;  %v7638_v30 = vld [vmem:[#allocation136_spill] sm:$0xff]  ;;  %v7640_v58 = vld [vmem:[#allocation134_spill] sm:$0xff] }
 0x21b   : > { %v3237_v33 = vpop.eup %3236  ;;  %v5394_v49 = vsel %vm1886_vm7, %v5298_v35, %v1885_v50  ;;  %v1878_v19 = vmul.f32 %v3233_v57, %v5304_v43  ;;  %v1617_v9 = vadd.f32 %v1616_v48, %v1487_v56  ;;  %v1585_v51 = vadd.f32 %v1584_v18, %v1465_v10  ;;  %v7639_v56 = vld [vmem:[#allocation115_spill] sm:$0xff] }
 0x21c   : > { %v5324_v1 = vpop.permute.xlu1 %1376  ;;  %v5326_v46 = vpop.permute.xlu0 %1316  ;;  %v1489_v55 = vmul.f32 %v5309_v14, %v5144_v2  ;;  %v1600_v11 = vadd.f32 %v1599_v54, %v1475_v44  ;;  %v1477_v40 = vmul.f32 %v5300_v29, %v5134_v12  ;;  %vm1879_vm8 = vcmp.eq.f32.partialorder %v5304_v43, inf }
 0x21d   : > { %v1882_v23 = vand.u32 2147483648, %v5304_v43  ;;  %v1618_v6 = vadd.f32 %v1617_v9, %v1488_v26  ;;  %v1586_v52 = vadd.f32 %v1585_v51, %v1466_v39  ;;  %v1490_v16 = vmul.f32 %v5324_v1, %v5167_v31  ;;  %v7636_v1 = vld [vmem:[#allocation135_spill] sm:$0xff]  ;;  %v7642_v26 = vld [vmem:[#allocation138_spill] sm:$0xff] }
 0x21e   : > { %v1601_v24 = vadd.f32 %v1600_v11, %v1476_v28  ;;  %v1478_v2 = vmul.f32 %v5326_v46, %v7634_v4  ;;  %vm1888_vm9 = vcmp.eq.f32.partialorder %v5298_v35, 0.0  ;;  %vm1881_vm10 = vcmp.eq.f32.partialorder %v5304_v43, 0.0  ;;  %v7643_v28 = vld [vmem:[#allocation137_spill] sm:$0xff] }
 0x21f   : > { %v1892_v12 = vmul.f32 %v3235_v62, %v5311_v22  ;;  %3238 = vrsqrt.f32 %v5349_v27  ;;  %v1619_v29 = vadd.f32 %v1618_v6, %v1489_v55  ;;  %vm1900_vm11 = vcmp.eq.f32.partialorder %v5314_v53, inf  ;;  %v7641_v62 = vld [vmem:[#allocation105_spill] sm:$0xff] }
 0x220   : > { %v5347_v25 = vpop.permute.xlu1 %1321  ;;  %v1262_v15 = vpop.permute.xlu0 %1261  ;;  %v1602_v45 = vadd.f32 %v1601_v24, %v1477_v40  ;;  %3240 = vrsqrt.f32 %v5336_v32  ;;  %v1557_v48 = vrot.slane %v7641_v62, 4  ;;  %v1903_v51 = vand.u32 2147483648, %v5314_v53 }
 0x221   : > { %v1467_v63 = vmul.f32 %v1262_v15, %v5150_v42  ;;  %v1479_v46 = vmul.f32 %v5347_v25, %v7637_v8  ;;  %v1620_v50 = vadd.f32 %v1619_v29, %v1490_v16  ;;  %v1899_v25 = vmul.f32 %v3237_v33, %v5314_v53  ;;  %v7645_v16 = vld [vmem:[#allocation140_spill] sm:$0xff] }
 0x222   : > { %v1603_v10 = vadd.f32 %v1602_v45, %v1478_v2  ;;  %vm1902_vm12 = vcmp.eq.f32.partialorder %v5314_v53, 0.0  ;;  %vm1893_vm13 = vcmp.eq.f32.partialorder %v5311_v22, inf  ;;  %vm1895_vm14 = vcmp.eq.f32.partialorder %v5311_v22, 0.0 }
 0x223   : > { %v1587_v15 = vadd.f32 %v1586_v52, %v1467_v63  ;;  %v1896_v40 = vand.u32 2147483648, %v5311_v22  ;;  %v1558_v6 = vadd.f32 %v1557_v48, %v7641_v62  ;;  %v1901_v24 = vsel %vm1900_vm11, %v5314_v53, %v1899_v25 }
 0x224   : > { %v1267_v36 = vpop.permute.xlu1 %1266  ;;  %v1382_v47 = vpop.permute.xlu0 %1381  ;;  %v1604_v7 = vadd.f32 %v1603_v10, %v1479_v46  ;;  %vm1914_vm15 = vcmp.eq.f32.partialorder %v5349_v27, inf  ;;  %vm1916_vm1 = vcmp.eq.f32.partialorder %v5349_v27, 0.0  ;;  %v1917_v10 = vand.u32 2147483648, %v5349_v27 }
 0x225   : > { %v1468_v34 = vmul.f32 %v1267_v36, %v7633_v5  ;;  %v1491_v31 = vmul.f32 %v1382_v47, %v7635_v41  ;;  %v1880_v36 = vsel %vm1879_vm8, %v5304_v43, %v1878_v19  ;;  %v1540_v47 = vrot.slane %v7639_v56, 4  ;;  %v7644_v19 = vld [vmem:[#allocation98_spill] sm:$0xff] }
 0x226   : > { %v7647_v41 = vld [vmem:[#allocation130_spill] sm:$0xff]  ;;  %v1883_v45 = vsel %vm1881_vm10, %v1882_v23, %v1880_v36  ;;  %vm1907_vm2 = vcmp.eq.f32.partialorder %v5336_v32, inf  ;;  %vm1909_vm3 = vcmp.eq.f32.partialorder %v5336_v32, 0.0  ;;  %vm2039_vm4 = vcmask 1040384  }
 0x227   : > { %v1588_v57 = vadd.f32 %v1587_v15, %v1468_v34  ;;  %v1621_v18 = vadd.f32 %v1620_v50, %v1491_v31  ;;  %v1541_v33 = vadd.f32 %v1540_v47, %v7639_v56  ;;  %v1894_v15 = vsel %vm1893_vm13, %v5311_v22, %v1892_v12 }
 0x228   : > { %v1387_v17 = vpop.permute.xlu1 %1386  ;;  %v1327_v61 = vpop.permute.xlu0 %1326  ;;  %v1574_v31 = vrot.slane %v7647_v41, 4  ;;  %v1897_v35 = vsel %vm1895_vm14, %v1896_v40, %v1894_v15  ;;  %vm2072_vm5 = vcmask 0  }
 0x229   : > { %v1492_v37 = vmul.f32 %v1387_v17, %v7638_v30  ;;  %v1480_v38 = vmul.f32 %v1327_v61, %v7640_v58  ;;  %v3239_v4 = vpop.eup %3238  ;;  %v1542_v8 = vrot.slane %v1541_v33, 2  ;;  %v1559_v30 = vrot.slane %v1558_v6, 2 }
 0x22a   : > { %v3241_v12 = vpop.eup %3240  ;;  %v1575_v53 = vadd.f32 %v1574_v31, %v7647_v41 }
 0x22b   : > { %v1622_v55 = vadd.f32 %v1621_v18, %v1492_v37  ;;  %v1605_v61 = vadd.f32 %v1604_v7, %v1480_v38  ;;  %v1543_v58 = vadd.f32 %v1542_v8, %v1541_v33  ;;  %v1906_v22 = vmul.f32 %v3241_v12, %v5336_v32 }
 0x22c   : > { %v1332_v42 = vpop.permute.xlu1 %1331  ;;  %v1272_v14 = vpop.permute.xlu0 %1271  ;;  %v1910_v7 = vand.u32 2147483648, %v5336_v32 }
 0x22d   : > { %v1469_v60 = vmul.f32 %v1272_v14, %v7636_v1  ;;  %v1481_v17 = vmul.f32 %v1332_v42, %v7643_v28  ;;  %v7646_v14 = vld [vmem:[#allocation139_spill] sm:$0xff]  ;;  %v1544_v28 = vrot.slane %v1543_v58, 1 }
 0x22f   : > { %v1589_v3 = vadd.f32 %v1588_v57, %v1469_v60  ;;  %v1606_v2 = vadd.f32 %v1605_v61, %v1481_v17  ;;  %v1890_v60 = vsel %vm1888_vm9, %v1889_v20, %v5394_v49  ;;  %v1904_v57 = vsel %vm1902_vm12, %v1903_v51, %v1901_v24 }
 0x230   : > { %v1277_v44 = vpop.permute.xlu1 %1276  ;;  %v1392_v54 = vpop.permute.xlu0 %1391  ;;  %v1913_v20 = vmul.f32 %v3239_v4, %v5349_v27  ;;  %v1545_v31 = vadd.f32 %v1544_v28, %v1543_v58 }
 0x231   : > { %v1470_v39 = vmul.f32 %v1277_v44, %v7642_v26  ;;  %v1493_v9 = vmul.f32 %v1392_v54, %v7644_v19  ;;  %v1560_v44 = vadd.f32 %v1559_v30, %v1558_v6  ;;  %v1576_v26 = vrot.slane %v1575_v53, 2 }
 0x233   : > { %v1590_v63 = vadd.f32 %v1589_v3, %v1470_v39  ;;  %v1623_v52 = vadd.f32 %v1622_v55, %v1493_v9  ;;  %v1908_v9 = vsel %vm1907_vm2, %v5336_v32, %v1906_v22  ;;  %v1561_v51 = vrot.slane %v1560_v44, 1 }
 0x234   : > { %v1397_v11 = vpop.permute.xlu1 %1396  ;;  %v1337_v34 = vpop.permute.xlu0 %1336  ;;  %v1577_v6 = vadd.f32 %v1576_v26, %v1575_v53  ;;  %v1976_v32 = vmul.f32 2.0, %v5334_v0 }
 0x235   : > { %v1494_v5 = vmul.f32 %v1397_v11, %v7645_v16  ;;  %v1591_v42 = vrot.slane %v1590_v63, 4  ;;  %v1482_v29 = vmul.f32 %v1337_v34, %v7646_v14  ;;  %v1975_v34 = vmul.f32 2.0, %v5322_v21 }
 0x237   : > { %v1624_v1 = vadd.f32 %v1623_v52, %v1494_v5  ;;  %v1607_v46 = vadd.f32 %v1606_v2, %v1482_v29  ;;  %v1592_v43 = vadd.f32 %v1591_v42, %v1590_v63  ;;  %v1911_v5 = vsel %vm1909_vm3, %v1910_v7, %v1908_v9  ;;  %v2016_v7 = vld [vmem:[%s3650_s5 + $0x1] sm:$0x1] }
 0x238   : > { %v1927_v50 = vpop.permute.xlu1 %1926  ;;  %v1922_v56 = vpop.permute.xlu0 %1921  ;;  %v1562_v2 = vadd.f32 %v1561_v51, %v1560_v44 }
 0x239   : > { %v1960_v37 = vmul.f32 %v1927_v50, %v5351_v13  ;;  %v1625_v49 = vrot.slane %v1624_v1, 4  ;;  %v1959_v23 = vmul.f32 %v1922_v56, %v5382_v59  ;;  %v1608_v36 = vrot.slane %v1607_v46, 4 }
 0x23a   : > { %v1915_v59 = vsel %vm1914_vm15, %v5349_v27, %v1913_v20  ;;  %v1593_v48 = vrot.slane %v1592_v43, 2  ;;  %v1978_v50 = vmul.f32 2.0, %v1562_v2  ;;  %v1977_v56 = vmul.f32 2.0, %v1545_v31 }
 0x23b   : > { %v1968_v47 = vmax.f32 %v1960_v37, 1e-08  ;;  %v1967_v13 = vmax.f32 %v1959_v23, 1e-08  ;;  %v1626_v18 = vadd.f32 %v1625_v49, %v1624_v1  ;;  %v1609_v39 = vadd.f32 %v1608_v36, %v1607_v46 }
 0x23c   : > { %v1937_v38 = vpop.permute.xlu1 %1936  ;;  %v1932_v62 = vpop.permute.xlu0 %1931  ;;  %v1918_v33 = vsel %vm1916_vm1, %v1917_v10, %v1915_v59  ;;  %v1594_v61 = vadd.f32 %v1593_v48, %v1592_v43  ;;  %v1578_v1 = vrot.slane %v1577_v6, 1 }
 0x23d   : > { %3242 = vrcp.f32 %v1968_v47  ;;  %v1962_v25 = vmul.f32 %v1937_v38, %v1890_v60  ;;  %v1961_v3 = vmul.f32 %v1932_v62, %v1883_v45  ;;  %v1627_v11 = vrot.slane %v1626_v18, 2 }
 0x23e   : > { %3244 = vrcp.f32 %v1967_v13  ;;  %v1610_v52 = vrot.slane %v1609_v39, 2  ;;  %v1595_v27 = vrot.slane %v1594_v61, 1 }
 0x23f   : > { %v1970_v54 = vmax.f32 %v1962_v25, 1e-08  ;;  %v1969_v17 = vmax.f32 %v1961_v3, 1e-08  ;;  %v1628_v29 = vadd.f32 %v1627_v11, %v1626_v18  ;;  %v2017_v11 = vld [vmem:[%s3650_s5 + $0x2] sm:$0x1] }
 0x240   : > { %v1947_v19 = vpop.permute.xlu1 %1946  ;;  %v1942_v63 = vpop.permute.xlu0 %1941  ;;  %v1611_v60 = vadd.f32 %v1610_v52, %v1609_v39  ;;  %v1596_v0 = vadd.f32 %v1595_v27, %v1594_v61  ;;  %v2021_v27 = vld [vmem:[%s3650_s5 + $0x6] sm:$0x1] }
 0x241   : > { %3246 = vrcp.f32 %v1970_v54  ;;  %v1964_v55 = vmul.f32 %v1947_v19, %v1904_v57  ;;  %v1963_v40 = vmul.f32 %v1942_v63, %v1897_v35  ;;  %v1629_v12 = vrot.slane %v1628_v29, 1 }
 0x242   : > { %3248 = vrcp.f32 %v1969_v17  ;;  %v1579_v35 = vadd.f32 %v1578_v1, %v1577_v6  ;;  %v1612_v20 = vrot.slane %v1611_v60, 1  ;;  %v1980_v36 = vmul.f32 2.0, %v1596_v0  ;;  %v2015_v17 = vld [vmem:[%s3650_s5] sm:$0x1]  ;;  %v2031_v0 = vld [vmem:[#allocation2] sm:$0x1] }
 0x243   : > { %v1972_v16 = vmax.f32 %v1964_v55, 1e-08  ;;  %v1971_v24 = vmax.f32 %v1963_v40, 1e-08  ;;  %v1630_v47 = vadd.f32 %v1629_v12, %v1628_v29 }
 0x244   : > { %v1957_v4 = vpop.permute.xlu1 %1956  ;;  %v1952_v14 = vpop.permute.xlu0 %1951  ;;  %v1979_v13 = vmul.f32 2.0, %v1579_v35  ;;  %v1613_v38 = vadd.f32 %v1612_v20, %v1611_v60  ;;  %v2022_v60 = vld [vmem:[%s3650_s5 + $0x7] sm:$0x1]  ;;  %v2033_v35 = vld [vmem:[#allocation2 + $0x2] sm:$0x1] }
 0x245   : > { %3250 = vrcp.f32 %v1972_v16  ;;  %v1966_v42 = vmul.f32 %v1957_v4, %v1918_v33  ;;  %v1965_v15 = vmul.f32 %v1952_v14, %v1911_v5  ;;  %v1982_v59 = vmul.f32 2.0, %v1630_v47  ;;  %v2018_v16 = vld [vmem:[%s3650_s5 + $0x3] sm:$0x1] }
 0x246   : > { %3252 = vrcp.f32 %v1971_v24  ;;  %v1981_v3 = vmul.f32 2.0, %v1613_v38 }
 0x247   : > { %v3243_v41 = vpop.eup %3242  ;;  %v1974_v45 = vmax.f32 %v1966_v42, 1e-08  ;;  %v1973_v21 = vmax.f32 %v1965_v15, 1e-08  ;;  %v2020_v42 = vld [vmem:[%s3650_s5 + $0x5] sm:$0x1] }
 0x248   : > { %v3245_v8 = vpop.eup %3244  ;;  %v1986_v46 = vmul.f32 %v3243_v41, %v1976_v32 }
 0x249   : > { %v1984_v57 = vmul.f32 %v3245_v8, %v1975_v34  ;;  %3254 = vrcp.f32 %v1974_v45  ;;  %v2019_v34 = vld [vmem:[%s3650_s5 + $0x4] sm:$0x1] }
 0x24a   : > { %v2001_v30 = vmul.f32 1.442695, %v1986_v46  ;;  %3256 = vrcp.f32 %v1973_v21 }
 0x24b   : > { %v3247_v37 = vpop.eup %3246  ;;  %v1999_v43 = vmul.f32 1.442695, %v1984_v57  ;;  %v2032_v57 = vld [vmem:[#allocation2 + $0x1] sm:$0x1] }
 0x24c   : > { %v3249_v49 = vpop.eup %3248  ;;  %3258 = vpow2.f32 %v2001_v30  ;;  %v1990_v23 = vmul.f32 %v3247_v37, %v1978_v50 }
 0x24d   : > { %3260 = vpow2.f32 %v1999_v43  ;;  %v1988_v53 = vmul.f32 %v3249_v49, %v1977_v56  ;;  %v2035_v49 = vld [vmem:[#allocation2 + $0x4] sm:$0x1] }
 0x24e   : > { %v2005_v10 = vmul.f32 1.442695, %v1990_v23  ;;  %v2034_v23 = vld [vmem:[#allocation2 + $0x3] sm:$0x1] }
 0x24f   : > { %v3251_v58 = vpop.eup %3250  ;;  %v2003_v22 = vmul.f32 1.442695, %v1988_v53 }
 0x250   : > { %v3253_v44 = vpop.eup %3252  ;;  %3262 = vpow2.f32 %v2005_v10  ;;  %v1994_v25 = vmul.f32 %v3251_v58, %v1980_v36  ;;  %v2037_v58 = vld [vmem:[#allocation2 + $0x6] sm:$0x1] }
 0x251   : > { %3264 = vpow2.f32 %v2003_v22  ;;  %v1992_v62 = vmul.f32 %v3253_v44, %v1979_v13  ;;  %v2036_v13 = vld [vmem:[#allocation2 + $0x5] sm:$0x1] }
 0x252   : > { %v2009_v48 = vmul.f32 1.442695, %v1994_v25 }
 0x253   : > { %v3255_v18 = vpop.eup %3254  ;;  %v2007_v26 = vmul.f32 1.442695, %v1992_v62  ;;  %v2038_v62 = vld [vmem:[#allocation2 + $0x7] sm:$0x1] }
 0x254   : > { %v3257_v39 = vpop.eup %3256  ;;  %3266 = vpow2.f32 %v2009_v48  ;;  %v1998_v54 = vmul.f32 %v3255_v18, %v1982_v59 }
 0x255   : > { %3268 = vpow2.f32 %v2007_v26  ;;  %v1996_v28 = vmul.f32 %v3257_v39, %v1981_v3 }
 0x256   : > { %v3259_v19 = vpop.eup %3258  ;;  %v2013_v9 = vmul.f32 1.442695, %v1998_v54 }
 0x257   : > { %v3261_v51 = vpop.eup %3260  ;;  %v2011_v55 = vmul.f32 1.442695, %v1996_v28  ;;  %v2024_v63 = vmul.f32 %v3259_v19, %v2016_v7 }
 0x258   : > { %3270 = vpow2.f32 %v2013_v9  ;;  %v2023_v33 = vmul.f32 %v3261_v51, %v2015_v17 }
 0x259   : > { %3272 = vpow2.f32 %v2011_v55  ;;  %v2043_v61 = vsel %vm2039_vm4, %v2024_v63, 0.0 }
 0x25a   : > { %v3263_v40 = vpop.eup %3262  ;;  %2044 = vadd.xlane.f32.xlu1 %v2043_v61  ;;  %v2040_v6 = vsel %vm2039_vm4, %v2023_v33, 0.0 }
 0x25b   : > { %v3265_v52 = vpop.eup %3264  ;;  %2041 = vadd.xlane.f32.xlu0 %v2040_v6  ;;  %v2026_v32 = vmul.f32 %v3263_v40, %v2018_v16 }
 0x25c   : > { %v2025_v5 = vmul.f32 %v3265_v52, %v2017_v11 }
 0x25d   : > { %v2049_v41 = vsel %vm2039_vm4, %v2026_v32, 0.0 }
 0x25e   : > { %v3267_v24 = vpop.eup %3266  ;;  %v2046_v4 = vsel %vm2039_vm4, %v2025_v5, 0.0 }
 0x25f   : > { %v3269_v2 = vpop.eup %3268  ;;  %2047 = vadd.xlane.f32.xlu0 %v2046_v4  ;;  %v2028_v31 = vmul.f32 %v3267_v24, %v2020_v42 }
 0x260   : > { %v2027_v14 = vmul.f32 %v3269_v2, %v2019_v34 }
 0x261   : > { %v2055_v46 = vsel %vm2039_vm4, %v2028_v31, 0.0 }
 0x262   : > { %v3271_v29 = vpop.eup %3270  ;;  %v2052_v15 = vsel %vm2039_vm4, %v2027_v14, 0.0 }
 0x263   : > { %v3273_v1 = vpop.eup %3272  ;;  %2053 = vadd.xlane.f32.xlu1 %v2052_v15  ;;  %2050 = vadd.xlane.f32.xlu0 %v2049_v41  ;;  %v2030_v21 = vmul.f32 %v3271_v29, %v2022_v60 }
 0x264   : > { %v2029_v45 = vmul.f32 %v3273_v1, %v2021_v27 }
 0x265   : > { %v2061_v50 = vsel %vm2039_vm4, %v2030_v21, 0.0 }
 0x266   : > { %v2058_v8 = vsel %vm2039_vm4, %v2029_v45, 0.0 }
 0x267   : > { %2059 = vadd.xlane.f32.xlu1 %v2058_v8  ;;  %2056 = vadd.xlane.f32.xlu0 %v2055_v46 }
 0x26b   : > { %2062 = vadd.xlane.f32.xlu0 %v2061_v50 }
 0x2e7   : > { %v2045_v12 = vpop.xlane.xlu1 %2044 }
 0x2e8   : > { %v2065_v30 = vadd.f32 %v2045_v12, %v2032_v57  ;;  %v2042_v37 = vpop.xlane.xlu0 %2041 }
 0x2e9   : > { %v2064_v56 = vadd.f32 %v2042_v37, %v2031_v0 }
 0x2ea   : > { %2074 = vst.msk [vmem:[#allocation2 + $0x1] sm:$0x1] %vm2072_vm5, %v2065_v30 }
 0x2eb   : > { %2073 = vst.msk [vmem:[#allocation2] sm:$0x1] %vm2072_vm5, %v2064_v56 }
 0x2ec   : > { %v2048_v20 = vpop.xlane.xlu0 %2047 }
 0x2ed   : > { %v2066_v43 = vadd.f32 %v2048_v20, %v2033_v35 }
 0x2ef   : > { %2075 = vst.msk [vmem:[#allocation2 + $0x2] sm:$0x1] %vm2072_vm5, %v2066_v43 }
 0x2f0   : > { %v2054_v53 = vpop.xlane.xlu1 %2053  ;;  %v2051_v36 = vpop.xlane.xlu0 %2050 }
 0x2f1   : > { %v2068_v47 = vadd.f32 %v2054_v53, %v2035_v49  ;;  %v2067_v10 = vadd.f32 %v2051_v36, %v2034_v23 }
 0x2f3   : > { %2077 = vst.msk [vmem:[#allocation2 + $0x4] sm:$0x1] %vm2072_vm5, %v2068_v47  ;;  %2076 = vst.msk [vmem:[#allocation2 + $0x3] sm:$0x1] %vm2072_vm5, %v2067_v10 }
 0x2f4   : > { %v2060_v38 = vpop.xlane.xlu1 %2059  ;;  %v2057_v22 = vpop.xlane.xlu0 %2056 }
 0x2f5   : > { %v2070_v44 = vadd.f32 %v2060_v38, %v2037_v58  ;;  %v2069_v25 = vadd.f32 %v2057_v22, %v2036_v13  ;;  %2084 = sbr.rel (%p3116_p5) target bundleno = 1010 (0x3f2), region = 52 }
 0x2f7   : > { %2079 = vst.msk [vmem:[#allocation2 + $0x6] sm:$0x1] %vm2072_vm5, %v2070_v44  ;;  %2078 = vst.msk [vmem:[#allocation2 + $0x5] sm:$0x1] %vm2072_vm5, %v2069_v25 }
 0x2f8   : > { %v2063_v59 = vpop.xlane.xlu0 %2062 }
 0x2f9   : > { %v2071_v48 = vadd.f32 %v2063_v59, %v2038_v62 }
 0x2fb   : > { %2080 = vst.msk [vmem:[#allocation2 + $0x7] sm:$0x1] %vm2072_vm5, %v2071_v48 }
 0x2fc   : > { %v5502_v18 = vld [vmem:[%s3670_s19] sm:$0xff]  ;;  %v5505_v3 = vld [vmem:[%s3670_s19 + $0x8] sm:$0xff]  ;;  %v5508_v26 = vld [vmem:[%s3670_s19 + $0x10] sm:$0xff] }
 0x2fd   : > { %7648 = vst [vmem:[#allocation141_spill] sm:$0xff] %v5502_v18  ;;  %7649 = vst [vmem:[#allocation142_spill] sm:$0xff] %v5505_v3  ;;  %v5511_v39 = vld [vmem:[%s3670_s19 + $0x18] sm:$0xff]  ;;  %v2181_v54 = vmul.f32 %v5502_v18, %v5502_v18  ;;  %v2182_v7 = vmul.f32 %v5505_v3, %v5505_v3  ;;  %v5518_v28 = vld [vmem:[%s3670_s19 + $0x20] sm:$0xff]  ;;  %v2183_v17 = vmul.f32 %v5508_v26, %v5508_v26 }
 0x2fe   : > { %7650 = vst [vmem:[#allocation143_spill] sm:$0xff] %v5508_v26  ;;  %7651 = vst [vmem:[#allocation144_spill] sm:$0xff] %v5511_v39  ;;  %v5523_v19 = vld [vmem:[%s3670_s19 + $0x28] sm:$0xff]  ;;  %v5526_v9 = vld [vmem:[%s3670_s19 + $0x30] sm:$0xff]  ;;  %v2184_v11 = vmul.f32 %v5511_v39, %v5511_v39  ;;  %v2185_v32 = vmul.f32 %v5518_v28, %v5518_v28 }
 0x2ff   : > { %7652 = vst [vmem:[#allocation145_spill] sm:$0xff] %v5518_v28  ;;  %7653 = vst [vmem:[#allocation146_spill] sm:$0xff] %v5523_v19  ;;  %v5529_v51 = vld [vmem:[%s3670_s19 + $0x38] sm:$0xff]  ;;  %v2277_v55 = vsel %vm521_vm0, %v2181_v54, 0.0  ;;  %v5533_v63 = vld [vmem:[%s3670_s19 + $0x40] sm:$0xff]  ;;  %v2278_v40 = vsel %vm521_vm0, %v2182_v7, 0.0  ;;  %v2186_v2 = vmul.f32 %v5523_v19, %v5523_v19  ;;  %v2187_v42 = vmul.f32 %v5526_v9, %v5526_v9 }
 0x300   : > { %7654 = vst [vmem:[#allocation147_spill] sm:$0xff] %v5526_v9  ;;  %7655 = vst [vmem:[#allocation148_spill] sm:$0xff] %v5529_v51  ;;  %v5536_v33 = vld [vmem:[%s3670_s19 + $0x48] sm:$0xff]  ;;  %v5539_v61 = vld [vmem:[%s3670_s19 + $0x50] sm:$0xff]  ;;  %v2279_v5 = vadd.f32 %v2278_v40, %v2277_v55  ;;  %v2280_v14 = vsel %vm521_vm0, %v2183_v17, 0.0  ;;  %v5580_v41 = vmul.f32 %v5529_v51, %v5529_v51  ;;  %v5584_v31 = vmul.f32 %v5533_v63, %v5533_v63 }
 0x301   : > { %7656 = vst [vmem:[#allocation149_spill] sm:$0xff] %v5533_v63  ;;  %7657 = vst [vmem:[#allocation150_spill] sm:$0xff] %v5536_v33  ;;  %v5545_v6 = vld [vmem:[%s3670_s19 + $0x58] sm:$0xff]  ;;  %v5548_v52 = vld [vmem:[%s3670_s19 + $0x60] sm:$0xff]  ;;  %v5588_v1 = vmul.f32 %v5536_v33, %v5536_v33  ;;  %v5601_v21 = vmul.f32 %v5539_v61, %v5539_v61  ;;  %v2282_v0 = vsel %vm521_vm0, %v2184_v11, 0.0  ;;  %v2284_v58 = vsel %vm521_vm0, %v2185_v32, 0.0 }
 0x302   : > { %7658 = vst [vmem:[#allocation151_spill] sm:$0xff] %v5539_v61  ;;  %7659 = vst [vmem:[#allocation152_spill] sm:$0xff] %v5545_v6  ;;  %v5551_v16 = vld [vmem:[%s3670_s19 + $0x68] sm:$0xff]  ;;  %v5554_v34 = vld [vmem:[%s3670_s19 + $0x70] sm:$0xff]  ;;  %v2281_v60 = vadd.f32 %v2280_v14, %v2279_v5  ;;  %v5605_v50 = vmul.f32 %v5545_v6, %v5545_v6  ;;  %v5609_v57 = vmul.f32 %v5548_v52, %v5548_v52  ;;  %v2286_v40 = vsel %vm521_vm0, %v2186_v2, 0.0 }
 0x303   : > { %7660 = vst [vmem:[#allocation153_spill] sm:$0xff] %v5548_v52  ;;  %7661 = vst [vmem:[#allocation154_spill] sm:$0xff] %v5551_v16  ;;  %v5557_v24 = vld [vmem:[%s3670_s19 + $0x78] sm:$0xff]  ;;  %v5560_v4 = vld [vmem:[%s3670_s19 + $0x80] sm:$0xff]  ;;  %v5623_v56 = vmul.f32 %v5551_v16, %v5551_v16  ;;  %v5627_v35 = vmul.f32 %v5554_v34, %v5554_v34 }
 0x304   : > { %7662 = vst [vmem:[#allocation155_spill] sm:$0xff] %v5554_v34  ;;  %7663 = vst [vmem:[#allocation156_spill] sm:$0xff] %v5557_v24  ;;  %v5570_v27 = vld [vmem:[%s3670_s19 + $0x88] sm:$0xff]  ;;  %v5573_v29 = vld [vmem:[%s3670_s19 + $0x90] sm:$0xff]  ;;  %v5631_v20 = vmul.f32 %v5557_v24, %v5557_v24  ;;  %v2283_v43 = vadd.f32 %v2282_v0, %v2281_v60  ;;  %v5644_v36 = vmul.f32 %v5560_v4, %v5560_v4 }
 0x305   : > { %7664 = vst [vmem:[#allocation157_spill] sm:$0xff] %v5560_v4  ;;  %7665 = vst [vmem:[#allocation158_spill] sm:$0xff] %v5570_v27  ;;  %v5576_v15 = vld [vmem:[%s3670_s19 + $0x98] sm:$0xff]  ;;  %v5591_v45 = vld [vmem:[%s3670_s19 + $0xa0] sm:$0xff]  ;;  %v5648_v47 = vmul.f32 %v5570_v27, %v5570_v27  ;;  %v5652_v10 = vmul.f32 %v5573_v29, %v5573_v29 }
 0x306   : > { %7666 = vst [vmem:[#allocation159_spill] sm:$0xff] %v5573_v29  ;;  %7667 = vst [vmem:[#allocation160_spill] sm:$0xff] %v5576_v15  ;;  %v5594_v8 = vld [vmem:[%s3670_s19 + $0xa8] sm:$0xff]  ;;  %v5597_v46 = vld [vmem:[%s3670_s19 + $0xb0] sm:$0xff]  ;;  %v5666_v44 = vmul.f32 %v5576_v15, %v5576_v15  ;;  %v5670_v25 = vmul.f32 %v5591_v45, %v5591_v45  ;;  %v2285_v59 = vadd.f32 %v2284_v58, %v2283_v43 }
 0x307   : > { %7668 = vst [vmem:[#allocation161_spill] sm:$0xff] %v5591_v45  ;;  %7669 = vst [vmem:[#allocation162_spill] sm:$0xff] %v5594_v8  ;;  %v5613_v12 = vld [vmem:[%s3670_s19 + $0xb8] sm:$0xff]  ;;  %v5616_v30 = vld [vmem:[%s3670_s19 + $0xc0] sm:$0xff]  ;;  %v5674_v62 = vmul.f32 %v5594_v8, %v5594_v8  ;;  %v5687_v17 = vmul.f32 %v5597_v46, %v5597_v46 }
 0x308   : > { %7670 = vst [vmem:[#allocation163_spill] sm:$0xff] %v5597_v46  ;;  %7671 = vst [vmem:[#allocation164_spill] sm:$0xff] %v5613_v12  ;;  %v5619_v37 = vld [vmem:[%s3670_s19 + $0xc8] sm:$0xff]  ;;  %v5634_v49 = vld [vmem:[%s3670_s19 + $0xd0] sm:$0xff]  ;;  %v5691_v55 = vmul.f32 %v5613_v12, %v5613_v12  ;;  %v5695_v11 = vmul.f32 %v5616_v30, %v5616_v30  ;;  %v2287_v2 = vadd.f32 %v2286_v40, %v2285_v59  ;;  %v2288_v59 = vsel %vm521_vm0, %v2187_v42, 0.0 }
 0x309   : > { %7672 = vst [vmem:[#allocation165_spill] sm:$0xff] %v5616_v30  ;;  %7673 = vst [vmem:[#allocation166_spill] sm:$0xff] %v5619_v37  ;;  %v5637_v23 = vld [vmem:[%s3670_s19 + $0xd8] sm:$0xff]  ;;  %v5640_v53 = vld [vmem:[%s3670_s19 + $0xe0] sm:$0xff]  ;;  %v5709_v60 = vmul.f32 %v5619_v37, %v5619_v37  ;;  %v5713_v0 = vmul.f32 %v5634_v49, %v5634_v49 }
 0x30a   : > { %7674 = vst [vmem:[#allocation167_spill] sm:$0xff] %v5634_v49  ;;  %7675 = vst [vmem:[#allocation168_spill] sm:$0xff] %v5637_v23  ;;  %v5656_v13 = vld [vmem:[%s3670_s19 + $0xe8] sm:$0xff]  ;;  %v5659_v38 = vld [vmem:[%s3670_s19 + $0xf0] sm:$0xff]  ;;  %v5717_v43 = vmul.f32 %v5637_v23, %v5637_v23  ;;  %v5730_v37 = vmul.f32 %v5640_v53, %v5640_v53  ;;  %v2289_v42 = vadd.f32 %v2288_v59, %v2287_v2  ;;  %v2290_v2 = vsel %vm521_vm0, %v5580_v41, 0.0 }
 0x30b   : > { %7676 = vst [vmem:[#allocation169_spill] sm:$0xff] %v5640_v53  ;;  %7677 = vst [vmem:[#allocation170_spill] sm:$0xff] %v5656_v13  ;;  %v5662_v22 = vld [vmem:[%s3670_s19 + $0xf8] sm:$0xff]  ;;  %v5677_v48 = vld [vmem:[%s3670_s19 + $0x100] sm:$0xff]  ;;  %v5734_v49 = vmul.f32 %v5656_v13, %v5656_v13  ;;  %v5738_v23 = vmul.f32 %v5659_v38, %v5659_v38 }
 0x30c   : > { %7678 = vst [vmem:[#allocation171_spill] sm:$0xff] %v5659_v38  ;;  %7679 = vst [vmem:[#allocation172_spill] sm:$0xff] %v5662_v22  ;;  %v5680_v54 = vld [vmem:[%s3670_s19 + $0x108] sm:$0xff]  ;;  %v5683_v7 = vld [vmem:[%s3670_s19 + $0x110] sm:$0xff]  ;;  %v5752_v53 = vmul.f32 %v5662_v22, %v5662_v22  ;;  %v5756_v13 = vmul.f32 %v5677_v48, %v5677_v48  ;;  %v2291_v41 = vadd.f32 %v2290_v2, %v2289_v42  ;;  %v2292_v42 = vsel %vm521_vm0, %v5584_v31, 0.0 }
 0x30d   : > { %7680 = vst [vmem:[#allocation173_spill] sm:$0xff] %v5677_v48  ;;  %7681 = vst [vmem:[#allocation174_spill] sm:$0xff] %v5680_v54  ;;  %v5699_v5 = vld [vmem:[%s3670_s19 + $0x118] sm:$0xff]  ;;  %v5702_v32 = vld [vmem:[%s3670_s19 + $0x120] sm:$0xff]  ;;  %v5760_v38 = vmul.f32 %v5680_v54, %v5680_v54  ;;  %v5773_v22 = vmul.f32 %v5683_v7, %v5683_v7 }
 0x30e   : > { %7682 = vst [vmem:[#allocation175_spill] sm:$0xff] %v5683_v7  ;;  %7683 = vst [vmem:[#allocation176_spill] sm:$0xff] %v5699_v5  ;;  %v5705_v14 = vld [vmem:[%s3670_s19 + $0x128] sm:$0xff]  ;;  %v5720_v58 = vld [vmem:[%s3670_s19 + $0x130] sm:$0xff]  ;;  %v5777_v48 = vmul.f32 %v5699_v5, %v5699_v5  ;;  %v5781_v54 = vmul.f32 %v5702_v32, %v5702_v32  ;;  %v2293_v31 = vadd.f32 %v2292_v42, %v2291_v41  ;;  %v2294_v41 = vsel %vm521_vm0, %v5588_v1, 0.0 }
 0x30f   : > { %7684 = vst [vmem:[#allocation177_spill] sm:$0xff] %v5702_v32  ;;  %7685 = vst [vmem:[#allocation178_spill] sm:$0xff] %v5705_v14  ;;  %v5723_v30 = vld [vmem:[%s3670_s19 + $0x138] sm:$0xff]  ;;  %v5726_v12 = vld [vmem:[%s3670_s19 + $0x140] sm:$0xff]  ;;  %v5796_v5 = vmul.f32 %v5705_v14, %v5705_v14  ;;  %v5800_v32 = vmul.f32 %v5720_v58, %v5720_v58 }
 0x310   : > { %7686 = vst [vmem:[#allocation179_spill] sm:$0xff] %v5720_v58  ;;  %7687 = vst [vmem:[#allocation180_spill] sm:$0xff] %v5723_v30  ;;  %v5742_v40 = vld [vmem:[%s3670_s19 + $0x148] sm:$0xff]  ;;  %v5745_v46 = vld [vmem:[%s3670_s19 + $0x150] sm:$0xff]  ;;  %v5804_v4 = vmul.f32 %v5723_v30, %v5723_v30  ;;  %v5817_v14 = vmul.f32 %v5726_v12, %v5726_v12  ;;  %v2295_v1 = vadd.f32 %v2294_v41, %v2293_v31  ;;  %v2296_v31 = vsel %vm521_vm0, %v5601_v21, 0.0 }
 0x311   : > { %7688 = vst [vmem:[#allocation181_spill] sm:$0xff] %v5726_v12  ;;  %7689 = vst [vmem:[#allocation182_spill] sm:$0xff] %v5742_v40  ;;  %v5748_v8 = vld [vmem:[%s3670_s19 + $0x158] sm:$0xff]  ;;  %v5763_v45 = vld [vmem:[%s3670_s19 + $0x160] sm:$0xff]  ;;  %v5821_v58 = vmul.f32 %v5742_v40, %v5742_v40  ;;  %v5825_v30 = vmul.f32 %v5745_v46, %v5745_v46 }
 0x312   : > { %7690 = vst [vmem:[#allocation183_spill] sm:$0xff] %v5745_v46  ;;  %7691 = vst [vmem:[#allocation184_spill] sm:$0xff] %v5748_v8  ;;  %v5766_v15 = vld [vmem:[%s3670_s19 + $0x168] sm:$0xff]  ;;  %v5769_v29 = vld [vmem:[%s3670_s19 + $0x170] sm:$0xff]  ;;  %v5840_v40 = vmul.f32 %v5748_v8, %v5748_v8  ;;  %v5844_v46 = vmul.f32 %v5763_v45, %v5763_v45  ;;  %v2297_v21 = vadd.f32 %v2296_v31, %v2295_v1  ;;  %v2298_v1 = vsel %vm521_vm0, %v5605_v50, 0.0 }
 0x313   : > { %7692 = vst [vmem:[#allocation185_spill] sm:$0xff] %v5763_v45  ;;  %7693 = vst [vmem:[#allocation186_spill] sm:$0xff] %v5766_v15  ;;  %v5786_v59 = vld [vmem:[%s3670_s19 + $0x178] sm:$0xff]  ;;  %v5789_v27 = vld [vmem:[%s3670_s19 + $0x180] sm:$0xff]  ;;  %v5848_v6 = vmul.f32 %v5766_v15, %v5766_v15  ;;  %v5861_v8 = vmul.f32 %v5769_v29, %v5769_v29 }
 0x314   : > { %7694 = vst [vmem:[#allocation187_spill] sm:$0xff] %v5769_v29  ;;  %7695 = vst [vmem:[#allocation188_spill] sm:$0xff] %v5786_v59  ;;  %v5792_v7 = vld [vmem:[%s3670_s19 + $0x188] sm:$0xff]  ;;  %v5807_v24 = vld [vmem:[%s3670_s19 + $0x190] sm:$0xff]  ;;  %v5865_v45 = vmul.f32 %v5786_v59, %v5786_v59  ;;  %v5869_v15 = vmul.f32 %v5789_v27, %v5789_v27  ;;  %v2299_v50 = vadd.f32 %v2298_v1, %v2297_v21 }
 0x315   : > { %7696 = vst [vmem:[#allocation189_spill] sm:$0xff] %v5789_v27  ;;  %7697 = vst [vmem:[#allocation190_spill] sm:$0xff] %v5792_v7  ;;  %v5810_v34 = vld [vmem:[%s3670_s19 + $0x198] sm:$0xff]  ;;  %v5813_v16 = vld [vmem:[%s3670_s19 + $0x1a0] sm:$0xff]  ;;  %v5884_v59 = vmul.f32 %v5792_v7, %v5792_v7  ;;  %v5888_v27 = vmul.f32 %v5807_v24, %v5807_v24 }
 0x316   : > { %7698 = vst [vmem:[#allocation191_spill] sm:$0xff] %v5807_v24  ;;  %7699 = vst [vmem:[#allocation192_spill] sm:$0xff] %v5810_v34  ;;  %v5830_v2 = vld [vmem:[%s3670_s19 + $0x1a8] sm:$0xff]  ;;  %v5833_v52 = vld [vmem:[%s3670_s19 + $0x1b0] sm:$0xff]  ;;  %v5892_v9 = vmul.f32 %v5810_v34, %v5810_v34  ;;  %v5905_v7 = vmul.f32 %v5813_v16, %v5813_v16 }
 0x317   : > { %7700 = vst [vmem:[#allocation193_spill] sm:$0xff] %v5813_v16  ;;  %7701 = vst [vmem:[#allocation194_spill] sm:$0xff] %v5830_v2  ;;  %v5836_v12 = vld [vmem:[%s3670_s19 + $0x1b8] sm:$0xff]  ;;  %v5851_v61 = vld [vmem:[%s3670_s19 + $0x1c0] sm:$0xff]  ;;  %v5909_v24 = vmul.f32 %v5830_v2, %v5830_v2  ;;  %v5913_v34 = vmul.f32 %v5833_v52, %v5833_v52 }
 0x318   : > { %7702 = vst [vmem:[#allocation195_spill] sm:$0xff] %v5833_v52  ;;  %7703 = vst [vmem:[#allocation196_spill] sm:$0xff] %v5836_v12  ;;  %v5854_v33 = vld [vmem:[%s3670_s19 + $0x1c8] sm:$0xff]  ;;  %v5857_v63 = vld [vmem:[%s3670_s19 + $0x1d0] sm:$0xff]  ;;  %v5928_v2 = vmul.f32 %v5836_v12, %v5836_v12  ;;  %v5932_v3 = vmul.f32 %v5851_v61, %v5851_v61 }
 0x319   : > { %7704 = vst [vmem:[#allocation197_spill] sm:$0xff] %v5851_v61  ;;  %7705 = vst [vmem:[#allocation198_spill] sm:$0xff] %v5854_v33  ;;  %v5874_v42 = vld [vmem:[%s3670_s19 + $0x1d8] sm:$0xff]  ;;  %v5877_v51 = vld [vmem:[%s3670_s19 + $0x1e0] sm:$0xff]  ;;  %v5936_v52 = vmul.f32 %v5854_v33, %v5854_v33  ;;  %v5946_v12 = vmul.f32 %v5857_v63, %v5857_v63 }
 0x31a   : > { %7706 = vst [vmem:[#allocation199_spill] sm:$0xff] %v5857_v63  ;;  %7707 = vst [vmem:[#allocation200_spill] sm:$0xff] %v5874_v42  ;;  %v5880_v29 = vld [vmem:[%s3670_s19 + $0x1e8] sm:$0xff]  ;;  %v5895_v19 = vld [vmem:[%s3670_s19 + $0x1f0] sm:$0xff]  ;;  %v5950_v61 = vmul.f32 %v5874_v42, %v5874_v42 }
 0x31b   : > { %7708 = vst [vmem:[#allocation201_spill] sm:$0xff] %v5877_v51  ;;  %7709 = vst [vmem:[#allocation202_spill] sm:$0xff] %v5880_v29  ;;  %v5898_v28 = vld [vmem:[%s3670_s19 + $0x1f8] sm:$0xff]  ;;  %v5901_v39 = vld [vmem:[%s3670_s19 + $0x200] sm:$0xff]  ;;  %v5969_v42 = vmul.f32 %v5880_v29, %v5880_v29 }
 0x31c   : > { %7710 = vst [vmem:[#allocation203_spill] sm:$0xff] %v5895_v19  ;;  %7711 = vst [vmem:[#allocation204_spill] sm:$0xff] %v5898_v28  ;;  %v5918_v41 = vld [vmem:[%s3670_s19 + $0x208] sm:$0xff]  ;;  %v5921_v26 = vld [vmem:[%s3670_s19 + $0x210] sm:$0xff]  ;;  %v5990_v29 = vmul.f32 %v5901_v39, %v5901_v39 }
 0x31d   : > { %7712 = vst [vmem:[#allocation205_spill] sm:$0xff] %v5901_v39  ;;  %7713 = vst [vmem:[#allocation206_spill] sm:$0xff] %v5913_v34  ;;  %v5924_v16 = vld [vmem:[%s3670_s19 + $0x218] sm:$0xff]  ;;  %v5939_v18 = vld [vmem:[%s3670_s19 + $0x220] sm:$0xff] }
 0x31e   : > { %7714 = vst [vmem:[#allocation207_spill] sm:$0xff] %v5918_v41  ;;  %7715 = vst [vmem:[#allocation208_spill] sm:$0xff] %v5921_v26  ;;  %v5942_v34 = vld [vmem:[%s3670_s19 + $0x228] sm:$0xff]  ;;  %v5959_v31 = vld [vmem:[%s3670_s19 + $0x230] sm:$0xff]  ;;  %v6002_v21 = vmul.f32 %v5924_v16, %v5924_v16 }
 0x31f   : > { %7716 = vst [vmem:[#allocation209_spill] sm:$0xff] %v5924_v16  ;;  %7717 = vst [vmem:[#allocation210_spill] sm:$0xff] %v5928_v2  ;;  %v5962_v33 = vld [vmem:[%s3670_s19 + $0x238] sm:$0xff]  ;;  %v5965_v63 = vld [vmem:[%s3670_s19 + $0x240] sm:$0xff]  ;;  %v2306_v16 = vsel %vm521_vm0, %v5609_v57, 0.0  ;;  %v2307_v57 = vsel %vm521_vm0, %v5623_v56, 0.0 }
 0x320   : > { %7718 = vst [vmem:[#allocation211_spill] sm:$0xff] %v5932_v3  ;;  %7719 = vst [vmem:[#allocation212_spill] sm:$0xff] %v5936_v52  ;;  %v5954_v3 = vmul.f32 %v5877_v51, %v5877_v51  ;;  %v5973_v51 = vmul.f32 %v5895_v19, %v5895_v19  ;;  %v5983_v52 = vld [vmem:[%s3670_s19 + $0x250] sm:$0xff]  ;;  %v5986_v2 = vld [vmem:[%s3670_s19 + $0x258] sm:$0xff]  ;;  %v5994_v19 = vmul.f32 %v5918_v41, %v5918_v41 }
 0x321   : > { %7720 = vst [vmem:[#allocation213_spill] sm:$0xff] %v5939_v18  ;;  %7721 = vst [vmem:[#allocation214_spill] sm:$0xff] %v5942_v34  ;;  %v6005_v1 = vld [vmem:[%s3670_s19 + $0x260] sm:$0xff]  ;;  %v6011_v39 = vld [vmem:[%s3670_s19 + $0x270] sm:$0xff]  ;;  %v6015_v41 = vmul.f32 %v5939_v18, %v5939_v18  ;;  %v6034_v18 = vmul.f32 %v5959_v31, %v5959_v31 }
 0x322   : > { %7722 = vst [vmem:[#allocation215_spill] sm:$0xff] %v5946_v12  ;;  %7723 = vst [vmem:[#allocation216_spill] sm:$0xff] %v5950_v61  ;;  %v5977_v61 = vmul.f32 %v5898_v28, %v5898_v28  ;;  %v5980_v12 = vld [vmem:[%s3670_s19 + $0x248] sm:$0xff]  ;;  %v5998_v28 = vmul.f32 %v5921_v26, %v5921_v26  ;;  %v6019_v26 = vmul.f32 %v5942_v34, %v5942_v34 }
 0x323   : > { %7724 = vst [vmem:[#allocation217_spill] sm:$0xff] %v5959_v31  ;;  %7725 = vst [vmem:[#allocation218_spill] sm:$0xff] %v5962_v33  ;;  %v6038_v34 = vmul.f32 %v5962_v33, %v5962_v33  ;;  %v6053_v31 = vld [vmem:[%s3670_s19 + $0x2a0] sm:$0xff]  ;;  %v6057_v33 = vmul.f32 %v5980_v12, %v5980_v12 }
 0x324   : > { %7726 = vst [vmem:[#allocation219_spill] sm:$0xff] %v5965_v63  ;;  %7727 = vst [vmem:[#allocation220_spill] sm:$0xff] %v5969_v42  ;;  %v6075_v42 = vmul.f32 %v6005_v1, %v6005_v1 }
 0x325   : > { %7728 = vst [vmem:[#allocation221_spill] sm:$0xff] %v5973_v51  ;;  %7729 = vst [vmem:[#allocation222_spill] sm:$0xff] %v5977_v61  ;;  %v6008_v61 = vld [vmem:[%s3670_s19 + $0x268] sm:$0xff]  ;;  %v6050_v51 = vld [vmem:[%s3670_s19 + $0x298] sm:$0xff] }
 0x326   : > { %7730 = vst [vmem:[#allocation223_spill] sm:$0xff] %v5980_v12  ;;  %7731 = vst [vmem:[#allocation224_spill] sm:$0xff] %v5983_v52  ;;  %v6079_v12 = vmul.f32 %v6008_v61, %v6008_v61 }
 0x327   : > { %7732 = vst [vmem:[#allocation225_spill] sm:$0xff] %v5986_v2  ;;  %7733 = vst [vmem:[#allocation226_spill] sm:$0xff] %v5990_v29  ;;  %v6030_v29 = vld [vmem:[%s3670_s19 + $0x288] sm:$0xff] }
 0x328   : > { %7734 = vst [vmem:[#allocation227_spill] sm:$0xff] %v5994_v19  ;;  %7735 = vst [vmem:[#allocation228_spill] sm:$0xff] %v5998_v28  ;;  %v2300_v28 = vrot.slane %v2299_v50, 4  ;;  %v6027_v19 = vld [vmem:[%s3670_s19 + $0x280] sm:$0xff] }
 0x329   : > { %7736 = vst [vmem:[#allocation229_spill] sm:$0xff] %v6002_v21  ;;  %7737 = vst [vmem:[#allocation230_spill] sm:$0xff] %v6005_v1  ;;  %v6024_v21 = vld [vmem:[%s3670_s19 + $0x278] sm:$0xff] }
 0x32a   : > { %7738 = vst [vmem:[#allocation231_spill] sm:$0xff] %v6008_v61  ;;  %7739 = vst [vmem:[#allocation232_spill] sm:$0xff] %v6011_v39  ;;  %v2301_v56 = vadd.f32 %v2300_v28, %v2299_v50  ;;  %v6089_v28 = vld [vmem:[%s3670_s19 + $0x2c0] sm:$0xff]  ;;  %v6092_v50 = vld [vmem:[%s3670_s19 + $0x2c8] sm:$0xff]  ;;  %v6096_v1 = vmul.f32 %v6024_v21, %v6024_v21  ;;  %v6100_v61 = vmul.f32 %v6027_v19, %v6027_v19 }
 0x32b   : > { %7740 = vst [vmem:[#allocation233_spill] sm:$0xff] %v6015_v41  ;;  %7741 = vst [vmem:[#allocation234_spill] sm:$0xff] %v6019_v26  ;;  %v6042_v26 = vmul.f32 %v5965_v63, %v5965_v63  ;;  %v6047_v41 = vld [vmem:[%s3670_s19 + $0x290] sm:$0xff]  ;;  %v6065_v63 = vmul.f32 %v5986_v2, %v5986_v2  ;;  %v2308_v2 = vadd.f32 %v2307_v57, %v2306_v16 }
 0x32c   : > { %7742 = vst [vmem:[#allocation235_spill] sm:$0xff] %v6024_v21  ;;  %7743 = vst [vmem:[#allocation236_spill] sm:$0xff] %v6027_v19  ;;  %v2302_v16 = vrot.slane %v2301_v56, 2  ;;  %v6107_v57 = vld [vmem:[%s3670_s19 + $0x2d0] sm:$0xff]  ;;  %v6118_v21 = vmul.f32 %v6050_v51, %v6050_v51  ;;  %v6122_v19 = vmul.f32 %v6053_v31, %v6053_v31 }
 0x32d   : > { %7744 = vst [vmem:[#allocation237_spill] sm:$0xff] %v6030_v29  ;;  %7745 = vst [vmem:[#allocation238_spill] sm:$0xff] %v6034_v18  ;;  %v6068_v18 = vld [vmem:[%s3670_s19 + $0x2a8] sm:$0xff] }
 0x32e   : > { %7746 = vst [vmem:[#allocation239_spill] sm:$0xff] %v6038_v34  ;;  %7747 = vst [vmem:[#allocation240_spill] sm:$0xff] %v6042_v26  ;;  %v6061_v34 = vmul.f32 %v5983_v52, %v5983_v52  ;;  %v6071_v26 = vld [vmem:[%s3670_s19 + $0x2b0] sm:$0xff]  ;;  %v6083_v52 = vmul.f32 %v6011_v39, %v6011_v39  ;;  %v6104_v39 = vmul.f32 %v6030_v29, %v6030_v29  ;;  %v2309_v29 = vsel %vm521_vm0, %v5627_v35, 0.0 }
 0x32f   : > { %7748 = vst [vmem:[#allocation241_spill] sm:$0xff] %v6047_v41  ;;  %7749 = vst [vmem:[#allocation242_spill] sm:$0xff] %v6050_v51  ;;  %v2311_v51 = vsel %vm521_vm0, %v5631_v20, 0.0  ;;  %v6148_v35 = vmul.f32 %v6089_v28, %v6089_v28  ;;  %v6158_v20 = vmul.f32 %v6107_v57, %v6107_v57 }
 0x330   : > { %7750 = vst [vmem:[#allocation243_spill] sm:$0xff] %v6053_v31  ;;  %7751 = vst [vmem:[#allocation244_spill] sm:$0xff] %v6065_v63  ;;  %v6086_v63 = vld [vmem:[%s3670_s19 + $0x2b8] sm:$0xff] }
 0x331   : > { %7752 = vst [vmem:[#allocation245_spill] sm:$0xff] %v6068_v18  ;;  %7753 = vst [vmem:[#allocation246_spill] sm:$0xff] %v6071_v26  ;;  %v6144_v31 = vmul.f32 %v6086_v63, %v6086_v63 }
 0x332   : > { %7754 = vst [vmem:[#allocation247_spill] sm:$0xff] %v6079_v12  ;;  %7755 = vst [vmem:[#allocation248_spill] sm:$0xff] %v6083_v52  ;;  %v6110_v52 = vld [vmem:[%s3670_s19 + $0x2d8] sm:$0xff]  ;;  %v6114_v12 = vmul.f32 %v6047_v41, %v6047_v41  ;;  %v2310_v41 = vadd.f32 %v2309_v29, %v2308_v2  ;;  %v2313_v29 = vsel %vm521_vm0, %v5644_v36, 0.0  ;;  %v2336_v36 = vsel %vm521_vm0, %v5709_v60, 0.0 }
 0x333   : > { %7756 = vst [vmem:[#allocation249_spill] sm:$0xff] %v6086_v63  ;;  %7757 = vst [vmem:[#allocation250_spill] sm:$0xff] %v6089_v28  ;;  %v6162_v2 = vmul.f32 %v6110_v52, %v6110_v52  ;;  %v6164_v63 = vadd.f32 %v2302_v16, %v2301_v56  ;;  %v2315_v28 = vsel %vm521_vm0, %v5648_v47, 0.0  ;;  %v2317_v47 = vsel %vm521_vm0, %v5652_v10, 0.0 }
 0x334   : > { %7758 = vst [vmem:[#allocation251_spill] sm:$0xff] %v6092_v50  ;;  %7759 = vst [vmem:[#allocation252_spill] sm:$0xff] %v6100_v61  ;;  %v6132_v61 = vmul.f32 %v6071_v26, %v6071_v26  ;;  %v6152_v26 = vmul.f32 %v6092_v50, %v6092_v50  ;;  %v2335_v50 = vsel %vm521_vm0, %v5695_v11, 0.0  ;;  %v2319_v11 = vsel %vm521_vm0, %v5666_v44, 0.0 }
 0x335   : > { %7760 = vst [vmem:[#allocation253_spill] sm:$0xff] %v6104_v39  ;;  %7761 = vst [vmem:[#allocation254_spill] sm:$0xff] %v6107_v57  ;;  %v6128_v39 = vmul.f32 %v6068_v18, %v6068_v18  ;;  %v2312_v18 = vadd.f32 %v2311_v51, %v2310_v41  ;;  %v2338_v57 = vsel %vm521_vm0, %v5713_v0, 0.0  ;;  %v2337_v41 = vadd.f32 %v2336_v36, %v2335_v50 }
 0x336   : > { %7762 = vst [vmem:[#allocation255_spill] sm:$0xff] %v6110_v52  ;;  %7763 = vst [vmem:[#allocation256_spill] sm:$0xff] %v6114_v12  ;;  %v6140_v12 = vld [vmem:[%s3670_s19 + $0x2e8] sm:$0xff]  ;;  %v2321_v60 = vsel %vm521_vm0, %v5670_v25, 0.0  ;;  %v2340_v0 = vsel %vm521_vm0, %v5717_v43, 0.0  ;;  %v2304_v16 = vrot.slane %v6164_v63, 1 }
 0x337   : > { %7764 = vst [vmem:[#allocation257_spill] sm:$0xff] %v6118_v21  ;;  %v6137_v21 = vld [vmem:[%s3670_s19 + $0x2e0] sm:$0xff]  ;;  %7766 = vst [vmem:[#allocation259_spill] sm:$0xff] %v6140_v12  ;;  %v6180_v56 = vmul.f32 %v6140_v12, %v6140_v12  ;;  %v2314_v51 = vadd.f32 %v2313_v29, %v2312_v18  ;;  %v2323_v12 = vsel %vm521_vm0, %v5674_v62, 0.0  ;;  %v2339_v18 = vadd.f32 %v2338_v57, %v2337_v41  ;;  %v7907_v52 = vld [vmem:[#allocation59_spill] sm:$0xff] }
 0x338   : > { %7765 = vst [vmem:[#allocation258_spill] sm:$0xff] %v6137_v21  ;;  %7767 = vst [vmem:[#allocation260_spill] sm:$0xff] %v6158_v20  ;;  %v6176_v20 = vmul.f32 %v6137_v21, %v6137_v21  ;;  %v2325_v50 = vsel %vm521_vm0, %v5687_v17, 0.0  ;;  %v2342_v10 = vsel %vm521_vm0, %v5730_v37, 0.0  ;;  %v2364_v44 = vsel %vm521_vm0, %v5781_v54, 0.0 }
 0x339   : > { %v2316_v21 = vadd.f32 %v2315_v28, %v2314_v51  ;;  %v2365_v25 = vsel %vm521_vm0, %v5796_v5, 0.0  ;;  %v2341_v29 = vadd.f32 %v2340_v0, %v2339_v18  ;;  %v2367_v28 = vsel %vm521_vm0, %v5800_v32, 0.0 }
 0x33a   : > { %v2366_v36 = vadd.f32 %v2365_v25, %v2364_v44  ;;  %v2327_v62 = vsel %vm521_vm0, %v5691_v55, 0.0  ;;  %v2344_v17 = vsel %vm521_vm0, %v5734_v49, 0.0  ;;  %v2346_v37 = vsel %vm521_vm0, %v5738_v23, 0.0 }
 0x33b   : > { %v2318_v43 = vadd.f32 %v2317_v47, %v2316_v21  ;;  %v2369_v54 = vsel %vm521_vm0, %v5804_v4, 0.0  ;;  %v2343_v5 = vadd.f32 %v2342_v10, %v2341_v29  ;;  %v2348_v21 = vsel %vm521_vm0, %v5752_v53, 0.0 }
 0x33c   : > { %v2368_v51 = vadd.f32 %v2367_v28, %v2366_v36  ;;  %v2350_v32 = vsel %vm521_vm0, %v5756_v13, 0.0  ;;  %v2352_v55 = vsel %vm521_vm0, %v5760_v38, 0.0  ;;  %v2354_v49 = vsel %vm521_vm0, %v5773_v22, 0.0 }
 0x33d   : > { %v2320_v57 = vadd.f32 %v2319_v11, %v2318_v43  ;;  %v2371_v23 = vsel %vm521_vm0, %v5817_v14, 0.0  ;;  %v2345_v4 = vadd.f32 %v2344_v17, %v2343_v5  ;;  %v2393_v11 = vsel %vm521_vm0, %v5869_v15, 0.0 }
 0x33e   : > { %v2370_v47 = vadd.f32 %v2369_v54, %v2368_v51  ;;  %v2356_v53 = vsel %vm521_vm0, %v5777_v48, 0.0  ;;  %v2373_v13 = vsel %vm521_vm0, %v5821_v58, 0.0  ;;  %v2394_v38 = vsel %vm521_vm0, %v5884_v59, 0.0 }
 0x33f   : > { %v2322_v41 = vadd.f32 %v2321_v60, %v2320_v57  ;;  %v2396_v22 = vsel %vm521_vm0, %v5888_v27, 0.0  ;;  %v2347_v14 = vadd.f32 %v2346_v37, %v2345_v4  ;;  %v2395_v18 = vadd.f32 %v2394_v38, %v2393_v11  ;;  %v7775_v38 = vld [vmem:[#allocation215_spill] sm:$0xff] }
 0x340   : > { %v2372_v60 = vadd.f32 %v2371_v23, %v2370_v47  ;;  %v2375_v10 = vsel %vm521_vm0, %v5825_v30, 0.0  ;;  %v2377_v15 = vsel %vm521_vm0, %v5840_v40, 0.0  ;;  %v2379_v48 = vsel %vm521_vm0, %v5844_v46, 0.0  ;;  %v7773_v47 = vld [vmem:[#allocation222_spill] sm:$0xff] }
 0x341   : > { %v2324_v0 = vadd.f32 %v2323_v12, %v2322_v41  ;;  %v2398_v58 = vsel %vm521_vm0, %v5892_v9, 0.0  ;;  %v2349_v44 = vadd.f32 %v2348_v21, %v2347_v14  ;;  %v2397_v27 = vadd.f32 %v2396_v22, %v2395_v18  ;;  %v7771_v21 = vld [vmem:[#allocation210_spill] sm:$0xff] }
 0x342   : > { %v2374_v25 = vadd.f32 %v2373_v13, %v2372_v60  ;;  %v2381_v12 = vsel %vm521_vm0, %v5848_v6, 0.0  ;;  %v2383_v43 = vsel %vm521_vm0, %v5861_v8, 0.0  ;;  %v2400_v30 = vsel %vm521_vm0, %v5905_v7, 0.0  ;;  %v7768_v6 = vld [vmem:[#allocation206_spill] sm:$0xff]  ;;  %v7769_v8 = vld [vmem:[#allocation220_spill] sm:$0xff] }
 0x343   : > { %v2326_v59 = vadd.f32 %v2325_v50, %v2324_v0  ;;  %v2422_v40 = vsel %vm521_vm0, %v5954_v3, 0.0  ;;  %v2351_v29 = vadd.f32 %v2350_v32, %v2349_v44  ;;  %v2399_v9 = vadd.f32 %v2398_v58, %v2397_v27  ;;  %v7770_v3 = vld [vmem:[#allocation221_spill] sm:$0xff]  ;;  %v7776_v0 = vld [vmem:[#allocation216_spill] sm:$0xff]  ;;  %v7777_v58 = vld [vmem:[#allocation226_spill] sm:$0xff] }
 0x344   : > { %v2376_v36 = vadd.f32 %v2375_v10, %v2374_v25  ;;  %v2385_v50 = vsel %vm521_vm0, %v5865_v45, 0.0  ;;  %v2402_v28 = vsel %vm521_vm0, %v5909_v24, 0.0  ;;  %v2404_v17 = vsel %vm521_vm0, %v7768_v6, 0.0  ;;  %v7772_v45 = vld [vmem:[#allocation211_spill] sm:$0xff]  ;;  %v7778_v44 = vld [vmem:[#allocation240_spill] sm:$0xff] }
 0x345   : > { %v2328_v46 = vadd.f32 %v2327_v62, %v2326_v59  ;;  %v2423_v37 = vsel %vm521_vm0, %v7769_v8, 0.0  ;;  %v2353_v7 = vadd.f32 %v2352_v55, %v2351_v29  ;;  %v2401_v57 = vadd.f32 %v2400_v30, %v2399_v9  ;;  %v7774_v55 = vld [vmem:[#allocation212_spill] sm:$0xff] }
 0x346   : > { %v2378_v54 = vadd.f32 %v2377_v15, %v2376_v36  ;;  %v2425_v62 = vsel %vm521_vm0, %v7770_v3, 0.0  ;;  %v2406_v51 = vsel %vm521_vm0, %v7771_v21, 0.0  ;;  %v2408_v32 = vsel %vm521_vm0, %v7772_v45, 0.0  ;;  %v7779_v36 = vld [vmem:[#allocation227_spill] sm:$0xff] }
 0x347   : > { %v2329_v5 = vrot.slane %v2328_v46, 4  ;;  %v2424_v24 = vadd.f32 %v2423_v37, %v2422_v40  ;;  %v2355_v23 = vadd.f32 %v2354_v49, %v2353_v7  ;;  %v2403_v4 = vadd.f32 %v2402_v28, %v2401_v57  ;;  %v7781_v7 = vld [vmem:[#allocation244_spill] sm:$0xff]  ;;  %v7782_v57 = vld [vmem:[#allocation229_spill] sm:$0xff] }
 0x348   : > { %v2380_v41 = vadd.f32 %v2379_v48, %v2378_v54  ;;  %v2427_v11 = vsel %vm521_vm0, %v7773_v47, 0.0  ;;  %v2410_v13 = vsel %vm521_vm0, %v7774_v55, 0.0  ;;  %v2412_v22 = vsel %vm521_vm0, %v7775_v38, 0.0  ;;  %v7786_v38 = vld [vmem:[#allocation247_spill] sm:$0xff] }
 0x349   : > { %v2414_v14 = vsel %vm521_vm0, %v7776_v0, 0.0  ;;  %v2426_v60 = vadd.f32 %v2425_v62, %v2424_v24  ;;  %v2357_v18 = vadd.f32 %v2356_v53, %v2355_v23  ;;  %v2405_v15 = vadd.f32 %v2404_v17, %v2403_v4  ;;  %v7785_v23 = vld [vmem:[#allocation238_spill] sm:$0xff] }
 0x34a   : > { %v2382_v10 = vadd.f32 %v2381_v12, %v2380_v41  ;;  %v2429_v49 = vsel %vm521_vm0, %v7777_v58, 0.0  ;;  %v2330_v48 = vadd.f32 %v2329_v5, %v2328_v46  ;;  %v2451_v25 = vsel %vm521_vm0, %v7778_v44, 0.0  ;;  %v7780_v12 = vld [vmem:[#allocation228_spill] sm:$0xff] }
 0x34b   : > { %v2428_v59 = vadd.f32 %v2427_v11, %v2426_v60  ;;  %v2452_v27 = vsel %vm521_vm0, %v6057_v33, 0.0  ;;  %v2358_v30 = vrot.slane %v2357_v18, 4  ;;  %v2407_v29 = vadd.f32 %v2406_v51, %v2405_v15  ;;  %v7783_v51 = vld [vmem:[#allocation233_spill] sm:$0xff] }
 0x34c   : > { %v2384_v40 = vadd.f32 %v2383_v43, %v2382_v10  ;;  %v2431_v9 = vsel %vm521_vm0, %v7779_v36, 0.0  ;;  %v2433_v28 = vsel %vm521_vm0, %v7780_v12, 0.0  ;;  %v2453_v6 = vadd.f32 %v2452_v27, %v2451_v25 }
 0x34d   : > { %v2430_v53 = vadd.f32 %v2429_v49, %v2428_v59  ;;  %v2454_v46 = vsel %vm521_vm0, %v6061_v34, 0.0  ;;  %v2359_v17 = vadd.f32 %v2358_v30, %v2357_v18  ;;  %v2409_v37 = vadd.f32 %v2408_v32, %v2407_v29  ;;  %v7787_v18 = vld [vmem:[#allocation239_spill] sm:$0xff]  ;;  %v7788_v49 = vld [vmem:[#allocation248_spill] sm:$0xff] }
 0x34e   : > { %v2386_v8 = vadd.f32 %v2385_v50, %v2384_v40  ;;  %v2456_v33 = vsel %vm521_vm0, %v7781_v7, 0.0  ;;  %v2331_v54 = vrot.slane %v2330_v48, 2  ;;  %v2435_v3 = vsel %vm521_vm0, %v7782_v57, 0.0  ;;  %v7784_v50 = vld [vmem:[#allocation234_spill] sm:$0xff] }
 0x34f   : > { %v2432_v43 = vadd.f32 %v2431_v9, %v2430_v53  ;;  %v2455_v62 = vadd.f32 %v2454_v46, %v2453_v6  ;;  %v2411_v21 = vadd.f32 %v2410_v13, %v2409_v37  ;;  %v2437_v45 = vsel %vm521_vm0, %v7783_v51, 0.0  ;;  %v7789_v6 = vld [vmem:[#allocation252_spill] sm:$0xff] }
 0x350   : > { %v2387_v5 = vrot.slane %v2386_v8, 4  ;;  %v2458_v34 = vsel %vm521_vm0, %v6075_v42, 0.0  ;;  %v2439_v32 = vsel %vm521_vm0, %v7784_v50, 0.0  ;;  %v2441_v41 = vsel %vm521_vm0, %v7785_v23, 0.0  ;;  %v7791_v51 = vld [vmem:[#allocation256_spill] sm:$0xff] }
 0x351   : > { %v2434_v24 = vadd.f32 %v2433_v28, %v2432_v43  ;;  %v2457_v4 = vadd.f32 %v2456_v33, %v2455_v62  ;;  %v2360_v47 = vrot.slane %v2359_v17, 2  ;;  %v2413_v55 = vadd.f32 %v2412_v22, %v2411_v21 }
 0x352   : > { %v2388_v11 = vadd.f32 %v2387_v5, %v2386_v8  ;;  %v2460_v13 = vsel %vm521_vm0, %v7786_v38, 0.0  ;;  %v2332_v0 = vadd.f32 %v2331_v54, %v2330_v48  ;;  %v2443_v10 = vsel %vm521_vm0, %v7787_v18, 0.0 }
 0x353   : > { %v2436_v60 = vadd.f32 %v2435_v3, %v2434_v24  ;;  %v2459_v42 = vadd.f32 %v2458_v34, %v2457_v4  ;;  %v2415_v58 = vadd.f32 %v2414_v14, %v2413_v55  ;;  %v2462_v59 = vsel %vm521_vm0, %v7788_v49, 0.0  ;;  %v6327_v34 = vld [vmem:[%s3670_s19 + $0x2f0] sm:$0xff] }
 0x354   : > { %v2389_v15 = vrot.slane %v2388_v11, 2  ;;  %v2464_v44 = vsel %vm521_vm0, %v6096_v1, 0.0  ;;  %v2480_v22 = vsel %vm521_vm0, %v6122_v19, 0.0  ;;  %v2481_v48 = vsel %vm521_vm0, %v6128_v39, 0.0  ;;  %7792 = vst [vmem:[#allocation206_spill] sm:$0xff] %v6327_v34 }
 0x355   : > { %v2438_v25 = vadd.f32 %v2437_v45, %v2436_v60  ;;  %v2461_v27 = vadd.f32 %v2460_v13, %v2459_v42  ;;  %v2361_v30 = vadd.f32 %v2360_v47, %v2359_v17  ;;  %v2416_v29 = vrot.slane %v2415_v58, 4  ;;  %v7790_v17 = vld [vmem:[#allocation253_spill] sm:$0xff] }
 0x356   : > { %v2390_v40 = vadd.f32 %v2389_v15, %v2388_v11  ;;  %v2482_v36 = vadd.f32 %v2481_v48, %v2480_v22  ;;  %v2483_v53 = vsel %vm521_vm0, %v6132_v61, 0.0  ;;  %v2485_v1 = vsel %vm521_vm0, %v6144_v31, 0.0  ;;  %v6338_v11 = vld [vmem:[%s3670_s19 + $0x2f8] sm:$0xff] }
 0x357   : > { %v2440_v9 = vadd.f32 %v2439_v32, %v2438_v25  ;;  %v2463_v14 = vadd.f32 %v2462_v59, %v2461_v27  ;;  %v2333_v12 = vrot.slane %v2332_v0, 1  ;;  %v2417_v28 = vadd.f32 %v2416_v29, %v2415_v58  ;;  %v7793_v32 = vld [vmem:[#allocation257_spill] sm:$0xff]  ;;  %7795 = vst [vmem:[#allocation220_spill] sm:$0xff] %v6338_v11 }
 0x358   : > { %v2466_v19 = vsel %vm521_vm0, %v7789_v6, 0.0  ;;  %v2484_v46 = vadd.f32 %v2483_v53, %v2482_v36  ;;  %v2468_v37 = vsel %vm521_vm0, %v7790_v17, 0.0  ;;  %v2487_v7 = vsel %vm521_vm0, %v6148_v35, 0.0 }
 0x359   : > { %v2442_v8 = vadd.f32 %v2441_v41, %v2440_v9  ;;  %v2465_v39 = vadd.f32 %v2464_v44, %v2463_v14  ;;  %v2362_v33 = vrot.slane %v2361_v30, 1  ;;  %v2391_v61 = vrot.slane %v2390_v40, 1  ;;  %v7796_v9 = vld [vmem:[#allocation11_spill] sm:$0xff]  ;;  %v7797_v14 = vld [vmem:[#allocation141_spill] sm:$0xff] }
 0x35a   : > { %v2418_v54 = vrot.slane %v2417_v28, 2  ;;  %v2486_v43 = vadd.f32 %v2485_v1, %v2484_v46  ;;  %v6318_v31 = vadd.f32 %v2304_v16, %v6164_v63  ;;  %v2489_v62 = vsel %vm521_vm0, %v6152_v26, 0.0  ;;  %v7794_v16 = vld [vmem:[#allocation260_spill] sm:$0xff] }
 0x35b   : > { %v2444_v57 = vadd.f32 %v2443_v10, %v2442_v8  ;;  %v2467_v3 = vadd.f32 %v2466_v19, %v2465_v39  ;;  %v6322_v5 = vadd.f32 %v2333_v12, %v2332_v0  ;;  %v2470_v35 = vsel %vm521_vm0, %v7791_v51, 0.0  ;;  %v7798_v12 = vld [vmem:[#allocation12_spill] sm:$0xff] }
 0x35c   : > { %v2419_v21 = vadd.f32 %v2418_v54, %v2417_v28  ;;  %v2488_v45 = vadd.f32 %v2487_v7, %v2486_v43  ;;  %v2472_v63 = vsel %vm521_vm0, %v7793_v32, 0.0  ;;  %v2491_v23 = vsel %vm521_vm0, %v7794_v16, 0.0  ;;  %v7799_v28 = vld [vmem:[#allocation142_spill] sm:$0xff]  ;;  %v7803_v32 = vld [vmem:[#allocation144_spill] sm:$0xff]  ;;  %v7804_v16 = vld [vmem:[#allocation15_spill] sm:$0xff] }
 0x35d   : > { %v2445_v24 = vrot.slane %v2444_v57, 4  ;;  %v2469_v50 = vadd.f32 %v2468_v37, %v2467_v3  ;;  %v6333_v41 = vadd.f32 %v2362_v33, %v2361_v30  ;;  %v6335_v26 = vadd.f32 %v2391_v61, %v2390_v40 }
 0x35e   : > { %v2420_v4 = vrot.slane %v2419_v21, 1  ;;  %v2490_v47 = vadd.f32 %v2489_v62, %v2488_v45  ;;  %v2493_v13 = vsel %vm521_vm0, %v6162_v2, 0.0  ;;  %3274 = vrsqrt.f32 %v6318_v31  ;;  %v7801_v45 = vld [vmem:[#allocation143_spill] sm:$0xff] }
 0x35f   : > { %v2446_v55 = vadd.f32 %v2445_v24, %v2444_v57  ;;  %v2471_v38 = vadd.f32 %v2470_v35, %v2469_v50  ;;  %v2275_v0 = vmul.f32 %v6327_v34, %v6327_v34  ;;  %v2495_v18 = vsel %vm521_vm0, %v6176_v20, 0.0  ;;  %v7800_v35 = vld [vmem:[#allocation13_spill] sm:$0xff]  ;;  %v7802_v50 = vld [vmem:[#allocation14_spill] sm:$0xff] }
 0x360   : > { %v2492_v60 = vadd.f32 %v2491_v23, %v2490_v47  ;;  %v6347_v10 = vadd.f32 %v2420_v4, %v2419_v21  ;;  %3276 = vrsqrt.f32 %v6322_v5  ;;  %v2276_v58 = vmul.f32 %v6338_v11, %v6338_v11  ;;  %v7805_v23 = vld [vmem:[#allocation145_spill] sm:$0xff]  ;;  %v7904_v34 = vld [vmem:[#allocation58_spill] sm:$0xff] }
 0x361   : > { %v2447_v42 = vrot.slane %v2446_v55, 2  ;;  %v2473_v15 = vadd.f32 %v2472_v63, %v2471_v38  ;;  %3278 = vrsqrt.f32 %v6333_v41  ;;  %v2497_v44 = vsel %vm521_vm0, %v6180_v56, 0.0  ;;  %v7901_v11 = vld [vmem:[#allocation57_spill] sm:$0xff] }
 0x362   : > { %v2494_v49 = vadd.f32 %v2493_v13, %v2492_v60  ;;  %3280 = vrsqrt.f32 %v6335_v26  ;;  %v2499_v22 = vsel %vm521_vm0, %v2275_v0, 0.0  ;;  %v2501_v29 = vsel %vm521_vm0, %v2276_v58, 0.0  ;;  %v7806_v0 = vld [vmem:[#allocation16_spill] sm:$0xff]  ;;  %v7807_v60 = vld [vmem:[#allocation146_spill] sm:$0xff] }
 0x363   : > { %v2448_v2 = vadd.f32 %v2447_v42, %v2446_v55  ;;  %v2474_v59 = vrot.slane %v2473_v15, 4  ;;  %3282 = vrsqrt.f32 %v6347_v10  ;;  %v6363_v53 = vmul.f32 %v7797_v14, %v7796_v9  ;;  %v7808_v42 = vld [vmem:[#allocation17_spill] sm:$0xff]  ;;  %v7815_v9 = vld [vmem:[#allocation20_spill] sm:$0xff]  ;;  %v7816_v14 = vld [vmem:[#allocation150_spill] sm:$0xff] }
 0x364   : > { %v2496_v20 = vadd.f32 %v2495_v18, %v2494_v49  ;;  %vm2511_vm6 = vcmp.eq.f32.partialorder %v6318_v31, inf  ;;  %v6369_v6 = vmul.f32 %v7799_v28, %v7798_v12  ;;  %vm2513_vm7 = vcmp.eq.f32.partialorder %v6318_v31, 0.0  ;;  %v7810_v49 = vld [vmem:[#allocation18_spill] sm:$0xff] }
 0x365   : > { %v2449_v25 = vrot.slane %v2448_v2, 1  ;;  %v2475_v27 = vadd.f32 %v2474_v59, %v2473_v15  ;;  %v2514_v46 = vand.u32 2147483648, %v6318_v31  ;;  %vm2518_vm8 = vcmp.eq.f32.partialorder %v6322_v5, inf  ;;  %v7809_v15 = vld [vmem:[#allocation147_spill] sm:$0xff] }
 0x366   : > { %v2498_v48 = vadd.f32 %v2497_v44, %v2496_v20  ;;  %vm2520_vm9 = vcmp.eq.f32.partialorder %v6322_v5, 0.0  ;;  %v2521_v17 = vand.u32 2147483648, %v6322_v5  ;;  %vm2525_vm10 = vcmp.eq.f32.partialorder %v6333_v41, inf  ;;  %v7812_v44 = vld [vmem:[#allocation19_spill] sm:$0xff]  ;;  %v7813_v20 = vld [vmem:[#allocation149_spill] sm:$0xff] }
 0x367   : > { %v6358_v30 = vadd.f32 %v2449_v25, %v2448_v2  ;;  %v2476_v40 = vrot.slane %v2475_v27, 2  ;;  %vm2527_vm11 = vcmp.eq.f32.partialorder %v6333_v41, 0.0  ;;  %v2528_v61 = vand.u32 2147483648, %v6333_v41  ;;  %v7811_v2 = vld [vmem:[#allocation148_spill] sm:$0xff] }
 0x368   : > { %v2500_v36 = vadd.f32 %v2499_v22, %v2498_v48  ;;  %v3275_v56 = vpop.eup %3274  ;;  %vm2532_vm12 = vcmp.eq.f32.partialorder %v6335_v26, inf  ;;  %vm2534_vm13 = vcmp.eq.f32.partialorder %v6335_v26, 0.0  ;;  %v2535_v57 = vand.u32 2147483648, %v6335_v26 }
 0x369   : > { %v2477_v1 = vadd.f32 %v2476_v40, %v2475_v27  ;;  %3284 = vrsqrt.f32 %v6358_v30  ;;  %v2510_v33 = vmul.f32 %v3275_v56, %v6318_v31  ;;  %vm2539_vm14 = vcmp.eq.f32.partialorder %v6347_v10, inf }
 0x36a   : > { %v2502_v19 = vadd.f32 %v2501_v29, %v2500_v36  ;;  %v3277_v8 = vpop.eup %3276  ;;  %vm2541_vm15 = vcmp.eq.f32.partialorder %v6347_v10, 0.0  ;;  %v2542_v21 = vand.u32 2147483648, %v6347_v10  ;;  %v6392_v24 = vmul.f32 %v7801_v45, %v7800_v35 }
 0x36b   : > { %v2478_v39 = vrot.slane %v2477_v1, 1  ;;  %v3279_v37 = vpop.eup %3278  ;;  %v2517_v62 = vmul.f32 %v3277_v8, %v6322_v5  ;;  %v6396_v63 = vmul.f32 %v7803_v32, %v7802_v50  ;;  %v6400_v4 = vmul.f32 %v7805_v23, %v7804_v16  ;;  %v7826_v50 = vld [vmem:[#allocation25_spill] sm:$0xff]  ;;  %v7827_v32 = vld [vmem:[#allocation155_spill] sm:$0xff] }
 0x36c   : > { %v2503_v7 = vrot.slane %v2502_v19, 4  ;;  %v3281_v54 = vpop.eup %3280  ;;  %v2512_v55 = vsel %vm2511_vm6, %v6318_v31, %v2510_v33  ;;  %v2524_v38 = vmul.f32 %v3279_v37, %v6333_v41  ;;  %v6409_v18 = vmul.f32 %v7807_v60, %v7806_v0  ;;  %v7817_v31 = vld [vmem:[#allocation21_spill] sm:$0xff]  ;;  %v7821_v37 = vld [vmem:[#allocation152_spill] sm:$0xff]  ;;  %v7822_v33 = vld [vmem:[#allocation23_spill] sm:$0xff] }
 0x36d   : > { %v6381_v43 = vadd.f32 %v2478_v39, %v2477_v1  ;;  %v3283_v51 = vpop.eup %3282  ;;  %v2531_v13 = vmul.f32 %v3281_v54, %v6335_v26  ;;  %v6413_v58 = vmul.f32 %v7809_v15, %v7808_v42  ;;  %v6417_v59 = vmul.f32 %v7811_v2, %v7810_v49  ;;  %v7820_v39 = vld [vmem:[#allocation22_spill] sm:$0xff]  ;;  %v7823_v54 = vld [vmem:[#allocation153_spill] sm:$0xff]  ;;  %v7832_v60 = vld [vmem:[#allocation27_spill] sm:$0xff] }
 0x36e   : > { %v2504_v3 = vadd.f32 %v2503_v7, %v2502_v19  ;;  %v6421_v25 = vmul.f32 %v7813_v20, %v7812_v44  ;;  %v2519_v22 = vsel %vm2518_vm8, %v6322_v5, %v2517_v62  ;;  %v2538_v48 = vmul.f32 %v3283_v51, %v6347_v10  ;;  %v7818_v19 = vld [vmem:[#allocation151_spill] sm:$0xff]  ;;  %v7824_v62 = vld [vmem:[#allocation24_spill] sm:$0xff]  ;;  %v7825_v51 = vld [vmem:[#allocation154_spill] sm:$0xff] }
 0x36f   : > { %3286 = vrsqrt.f32 %v6381_v43  ;;  %vm2546_vm1 = vcmp.eq.f32.partialorder %v6358_v30, inf  ;;  %v6430_v29 = vsel %vm2513_vm7, %v2514_v46, %v2512_v55  ;;  %vm2548_vm2 = vcmp.eq.f32.partialorder %v6358_v30, 0.0  ;;  %v7836_v15 = vld [vmem:[#allocation158_spill] sm:$0xff]  ;;  %v7837_v2 = vld [vmem:[#allocation29_spill] sm:$0xff]  ;;  %v7838_v44 = vld [vmem:[#allocation159_spill] sm:$0xff] }
 0x370   : > { %v2505_v47 = vrot.slane %v2504_v3, 2  ;;  %7814 = vst [vmem:[#allocation221_spill] sm:$0xff] %v6430_v29  ;;  %v2549_v36 = vand.u32 2147483648, %v6358_v30  ;;  %v6436_v56 = vmul.f32 %v7816_v14, %v7815_v9  ;;  %v2526_v12 = vsel %vm2525_vm10, %v6333_v41, %v2524_v38  ;;  %v7830_v38 = vld [vmem:[#allocation26_spill] sm:$0xff]  ;;  %v7833_v41 = vld [vmem:[#allocation157_spill] sm:$0xff]  ;;  %v7841_v9 = vld [vmem:[#allocation31_spill] sm:$0xff] }
 0x371   : > { %v2533_v28 = vsel %vm2532_vm12, %v6335_v26, %v2531_v13  ;;  %v6446_v46 = vmul.f32 %v7818_v19, %v7817_v31  ;;  %v6450_v8 = vsel %vm2520_vm9, %v2521_v17, %v2519_v22  ;;  %v6454_v7 = vmul.f32 %v7821_v37, %v7820_v39  ;;  %v7831_v13 = vld [vmem:[#allocation156_spill] sm:$0xff]  ;;  %v7846_v31 = vld [vmem:[#allocation163_spill] sm:$0xff]  ;;  %v7847_v37 = vld [vmem:[#allocation34_spill] sm:$0xff] }
 0x372   : > { %v2506_v27 = vadd.f32 %v2505_v47, %v2504_v3  ;;  %7819 = vst [vmem:[#allocation210_spill] sm:$0xff] %v6450_v8  ;;  %v6458_v3 = vmul.f32 %v7823_v54, %v7822_v33  ;;  %v6462_v35 = vmul.f32 %v7825_v51, %v7824_v62  ;;  %v2540_v5 = vsel %vm2539_vm14, %v6347_v10, %v2538_v48  ;;  %v7840_v22 = vld [vmem:[#allocation160_spill] sm:$0xff]  ;;  %v7842_v10 = vld [vmem:[#allocation161_spill] sm:$0xff]  ;;  %v7850_v62 = vld [vmem:[#allocation35_spill] sm:$0xff] }
 0x373   : > { %v3285_v40 = vpop.eup %3284  ;;  %v6472_v16 = vmul.f32 %v7827_v32, %v7826_v50  ;;  %v6476_v23 = vsel %vm2527_vm11, %v2528_v61, %v2526_v12  ;;  %v6480_v47 = vsel %vm2534_vm13, %v2535_v57, %v2533_v28  ;;  %vm2553_vm3 = vcmp.eq.f32.partialorder %v6381_v43, inf  ;;  %v7835_v57 = vld [vmem:[#allocation28_spill] sm:$0xff]  ;;  %v7845_v28 = vld [vmem:[#allocation33_spill] sm:$0xff]  ;;  %v7853_v50 = vld [vmem:[#allocation166_spill] sm:$0xff] }
 0x374   : > { %v2507_v1 = vrot.slane %v2506_v27, 1  ;;  %v2545_v17 = vmul.f32 %v3285_v40, %v6358_v30  ;;  %7828 = vst [vmem:[#allocation211_spill] sm:$0xff] %v6476_v23  ;;  %7829 = vst [vmem:[#allocation222_spill] sm:$0xff] %v6480_v47  ;;  %vm2555_vm4 = vcmp.eq.f32.partialorder %v6381_v43, 0.0  ;;  %v2556_v55 = vand.u32 2147483648, %v6381_v43  ;;  %v7843_v14 = vld [vmem:[#allocation32_spill] sm:$0xff] }
 0x375   : > { %v6488_v0 = vmul.f32 %v7831_v13, %v7830_v38  ;;  %v6492_v61 = vmul.f32 %v7833_v41, %v7832_v60  ;;  %v6496_v26 = vsel %vm2541_vm15, %v2542_v21, %v2540_v5  ;;  %v6500_v49 = vmul.f32 %v7836_v15, %v7835_v57  ;;  %v7848_v33 = vld [vmem:[#allocation164_spill] sm:$0xff]  ;;  %v7851_v51 = vld [vmem:[#allocation165_spill] sm:$0xff]  ;;  %v7855_v13 = vld [vmem:[#allocation167_spill] sm:$0xff] }
 0x376   : > { %v6464_v45 = vadd.f32 %v2507_v1, %v2506_v27  ;;  %7834 = vst [vmem:[#allocation212_spill] sm:$0xff] %v6496_v26  ;;  %v6504_v20 = vmul.f32 %v7838_v44, %v7837_v2  ;;  %v7839_v27 = vld [vmem:[#allocation30_spill] sm:$0xff]  ;;  %v2547_v40 = vsel %vm2546_vm1, %v6358_v30, %v2545_v17  ;;  %v6515_v21 = vmul.f32 %v7842_v10, %v7841_v9  ;;  %v7852_v17 = vld [vmem:[#allocation36_spill] sm:$0xff]  ;;  %v7854_v38 = vld [vmem:[#allocation37_spill] sm:$0xff] }
 0x377   : > { %v6508_v48 = vmul.f32 %v7840_v22, %v7839_v27  ;;  %v7844_v1 = vld [vmem:[#allocation162_spill] sm:$0xff]  ;;  %v6523_v19 = vmul.f32 %v7846_v31, %v7845_v28  ;;  %v6528_v54 = vmul.f32 %v7848_v33, %v7847_v37  ;;  %v6532_v5 = vmul.f32 %v7851_v51, %v7850_v62  ;;  %v7857_v57 = vld [vmem:[#allocation168_spill] sm:$0xff]  ;;  %v7859_v2 = vld [vmem:[#allocation169_spill] sm:$0xff] }
 0x378   : > { %3288 = vrsqrt.f32 %v6464_v45  ;;  %v6519_v12 = vmul.f32 %v7844_v1, %v7843_v14  ;;  %v6536_v32 = vmul.f32 %v7853_v50, %v7852_v17  ;;  %v6540_v60 = vmul.f32 %v7855_v13, %v7854_v38  ;;  %v7856_v41 = vld [vmem:[#allocation38_spill] sm:$0xff]  ;;  %v7860_v27 = vld [vmem:[#allocation40_spill] sm:$0xff]  ;;  %v7863_v14 = vld [vmem:[#allocation41_spill] sm:$0xff] }
 0x379   : > { %v3287_v42 = vpop.eup %3286  ;;  %7849 = vst [vmem:[#allocation215_spill] sm:$0xff] %v6528_v54  ;;  %v6544_v15 = vmul.f32 %v7857_v57, %v7856_v41  ;;  %v7861_v22 = vld [vmem:[#allocation170_spill] sm:$0xff]  ;;  %v6556_v10 = vsel %vm2548_vm2, %v2549_v36, %v2547_v40  ;;  %v7864_v1 = vld [vmem:[#allocation171_spill] sm:$0xff]  ;;  %v7866_v37 = vld [vmem:[#allocation172_spill] sm:$0xff]  ;;  %vm2560_vm6 = vcmp.eq.f32.partialorder %v6464_v45, inf  ;;  %v2563_v50 = vand.u32 2147483648, %v6464_v45 }
 0x37a   : > { %v2552_v39 = vmul.f32 %v3287_v42, %v6381_v43  ;;  %v7858_v42 = vld [vmem:[#allocation39_spill] sm:$0xff]  ;;  %v6552_v9 = vmul.f32 %v7861_v22, %v7860_v27  ;;  %7862 = vst [vmem:[#allocation216_spill] sm:$0xff] %v6556_v10  ;;  %v6560_v28 = vmul.f32 %v7864_v1, %v7863_v14  ;;  %v7865_v31 = vld [vmem:[#allocation42_spill] sm:$0xff]  ;;  %v7868_v51 = vld [vmem:[#allocation173_spill] sm:$0xff]  ;;  %vm2562_vm7 = vcmp.eq.f32.partialorder %v6464_v45, 0.0 }
 0x37b   : > { %v6548_v44 = vmul.f32 %v7859_v2, %v7858_v42  ;;  %v6564_v33 = vmul.f32 %v7866_v37, %v7865_v31  ;;  %v7867_v62 = vld [vmem:[#allocation43_spill] sm:$0xff]  ;;  %v7869_v38 = vld [vmem:[#allocation44_spill] sm:$0xff]  ;;  %v7870_v30 = vld [vmem:[#allocation174_spill] sm:$0xff] }
 0x37c   : > { %v6568_v17 = vmul.f32 %v7868_v51, %v7867_v62  ;;  %v6574_v36 = vmul.f32 %v7870_v30, %v7869_v38  ;;  %v7871_v40 = vld [vmem:[#allocation45_spill] sm:$0xff]  ;;  %v7872_v13 = vld [vmem:[#allocation175_spill] sm:$0xff]  ;;  %v2554_v57 = vsel %vm2553_vm3, %v6381_v43, %v2552_v39  ;;  %v7874_v42 = vld [vmem:[#allocation46_spill] sm:$0xff] }
 0x37d   : > { %v6578_v41 = vmul.f32 %v7872_v13, %v7871_v40  ;;  %v7875_v2 = vld [vmem:[#allocation176_spill] sm:$0xff]  ;;  %v7877_v22 = vld [vmem:[#allocation47_spill] sm:$0xff]  ;;  %v7878_v14 = vld [vmem:[#allocation177_spill] sm:$0xff] }
 0x37e   : > { %v6585_v27 = vmul.f32 %v7875_v2, %v7874_v42  ;;  %v6589_v1 = vmul.f32 %v7878_v14, %v7877_v22  ;;  %v7879_v31 = vld [vmem:[#allocation48_spill] sm:$0xff]  ;;  %v7880_v37 = vld [vmem:[#allocation178_spill] sm:$0xff]  ;;  %v7881_v51 = vld [vmem:[#allocation49_spill] sm:$0xff] }
 0x37f   : > { %7873 = vst [vmem:[#allocation226_spill] sm:$0xff] %v6578_v41  ;;  %v6593_v62 = vmul.f32 %v7880_v37, %v7879_v31  ;;  %v7882_v38 = vld [vmem:[#allocation179_spill] sm:$0xff]  ;;  %v7883_v40 = vld [vmem:[#allocation50_spill] sm:$0xff]  ;;  %v7884_v13 = vld [vmem:[#allocation180_spill] sm:$0xff] }
 0x380   : > { %7876 = vst [vmem:[#allocation240_spill] sm:$0xff] %v6585_v27  ;;  %v6597_v30 = vmul.f32 %v7882_v38, %v7881_v51  ;;  %v6601_v10 = vmul.f32 %v7884_v13, %v7883_v40  ;;  %v7885_v39 = vld [vmem:[#allocation51_spill] sm:$0xff]  ;;  %v7886_v26 = vld [vmem:[#allocation181_spill] sm:$0xff]  ;;  %v7887_v2 = vld [vmem:[#allocation52_spill] sm:$0xff] }
 0x381   : > { %v6605_v42 = vmul.f32 %v7886_v26, %v7885_v39  ;;  %v7888_v47 = vld [vmem:[#allocation182_spill] sm:$0xff]  ;;  %v7889_v14 = vld [vmem:[#allocation53_spill] sm:$0xff]  ;;  %v7890_v31 = vld [vmem:[#allocation183_spill] sm:$0xff] }
 0x382   : > { %v6609_v22 = vmul.f32 %v7888_v47, %v7887_v2  ;;  %v6614_v37 = vmul.f32 %v7890_v31, %v7889_v14  ;;  %v7891_v51 = vld [vmem:[#allocation54_spill] sm:$0xff]  ;;  %v7892_v38 = vld [vmem:[#allocation184_spill] sm:$0xff]  ;;  %v7894_v40 = vld [vmem:[#allocation55_spill] sm:$0xff]  ;;  %v3289_v47 = vpop.eup %3288  ;;  %v6630_v2 = vsel %vm2555_vm4, %v2556_v55, %v2554_v57 }
 0x383   : > { %v6618_v23 = vmul.f32 %v7892_v38, %v7891_v51  ;;  %v7895_v13 = vld [vmem:[#allocation185_spill] sm:$0xff]  ;;  %v7897_v26 = vld [vmem:[#allocation56_spill] sm:$0xff]  ;;  %v7898_v39 = vld [vmem:[#allocation186_spill] sm:$0xff]  ;;  %7900 = vst [vmem:[#allocation229_spill] sm:$0xff] %v6630_v2 }
 0x384   : > { %v6622_v8 = vmul.f32 %v7895_v13, %v7894_v40  ;;  %v6626_v29 = vmul.f32 %v7898_v39, %v7897_v26  ;;  %v7902_v14 = vld [vmem:[#allocation187_spill] sm:$0xff]  ;;  %v7905_v51 = vld [vmem:[#allocation188_spill] sm:$0xff]  ;;  %v7908_v40 = vld [vmem:[#allocation189_spill] sm:$0xff] }
 0x385   : > { %7893 = vst [vmem:[#allocation227_spill] sm:$0xff] %v6618_v23  ;;  %v6634_v31 = vmul.f32 %v7902_v14, %v7901_v11  ;;  %v6638_v38 = vmul.f32 %v7905_v51, %v7904_v34  ;;  %v6642_v13 = vmul.f32 %v7908_v40, %v7907_v52  ;;  %v7909_v27 = vld [vmem:[#allocation60_spill] sm:$0xff]  ;;  %v7910_v26 = vld [vmem:[#allocation190_spill] sm:$0xff]  ;;  %v7912_v43 = vld [vmem:[#allocation191_spill] sm:$0xff] }
 0x386   : > { %7896 = vst [vmem:[#allocation228_spill] sm:$0xff] %v6622_v8  ;;  %7899 = vst [vmem:[#allocation244_spill] sm:$0xff] %v6626_v29  ;;  %v6646_v39 = vmul.f32 %v7910_v26, %v7909_v27  ;;  %v7911_v29 = vld [vmem:[#allocation61_spill] sm:$0xff]  ;;  %v7913_v57 = vld [vmem:[#allocation62_spill] sm:$0xff] }
 0x387   : > { %7903 = vst [vmem:[#allocation233_spill] sm:$0xff] %v6634_v31  ;;  %7906 = vst [vmem:[#allocation234_spill] sm:$0xff] %v6638_v38  ;;  %v6650_v55 = vmul.f32 %v7912_v43, %v7911_v29  ;;  %v7914_v2 = vld [vmem:[#allocation192_spill] sm:$0xff]  ;;  %v7915_v14 = vld [vmem:[#allocation63_spill] sm:$0xff] }
 0x388   : > { %v6654_v11 = vmul.f32 %v7914_v2, %v7913_v57  ;;  %v7916_v31 = vld [vmem:[#allocation193_spill] sm:$0xff]  ;;  %v7918_v51 = vld [vmem:[#allocation64_spill] sm:$0xff]  ;;  %v7919_v38 = vld [vmem:[#allocation194_spill] sm:$0xff]  ;;  %v2559_v57 = vmul.f32 %v3289_v47, %v6464_v45 }
 0x389   : > { %v6658_v34 = vmul.f32 %v7916_v31, %v7915_v14  ;;  %v6662_v52 = vmul.f32 %v7919_v38, %v7918_v51  ;;  %v7921_v40 = vld [vmem:[#allocation65_spill] sm:$0xff]  ;;  %v7922_v8 = vld [vmem:[#allocation195_spill] sm:$0xff]  ;;  %v7924_v26 = vld [vmem:[#allocation66_spill] sm:$0xff] }
 0x38a   : > { %v6666_v27 = vmul.f32 %v7922_v8, %v7921_v40  ;;  %v7925_v41 = vld [vmem:[#allocation196_spill] sm:$0xff]  ;;  %v7927_v43 = vld [vmem:[#allocation67_spill] sm:$0xff]  ;;  %v7928_v54 = vld [vmem:[#allocation197_spill] sm:$0xff] }
 0x38b   : > { %7917 = vst [vmem:[#allocation238_spill] sm:$0xff] %v6658_v34  ;;  %7920 = vst [vmem:[#allocation247_spill] sm:$0xff] %v6662_v52  ;;  %v6670_v29 = vmul.f32 %v7925_v41, %v7924_v26  ;;  %v6674_v2 = vmul.f32 %v7928_v54, %v7927_v43  ;;  %v7930_v31 = vld [vmem:[#allocation68_spill] sm:$0xff]  ;;  %v7931_v14 = vld [vmem:[#allocation198_spill] sm:$0xff] }
 0x38c   : > { %7923 = vst [vmem:[#allocation239_spill] sm:$0xff] %v6666_v27  ;;  %v6679_v34 = vmul.f32 %v7931_v14, %v7930_v31  ;;  %v7933_v38 = vld [vmem:[#allocation69_spill] sm:$0xff]  ;;  %v7934_v51 = vld [vmem:[#allocation199_spill] sm:$0xff]  ;;  %v7936_v8 = vld [vmem:[#allocation70_spill] sm:$0xff] }
 0x38d   : > { %7926 = vst [vmem:[#allocation248_spill] sm:$0xff] %v6670_v29  ;;  %7929 = vst [vmem:[#allocation252_spill] sm:$0xff] %v6674_v2  ;;  %v6683_v52 = vmul.f32 %v7934_v51, %v7933_v38  ;;  %v7937_v40 = vld [vmem:[#allocation200_spill] sm:$0xff]  ;;  %v7939_v41 = vld [vmem:[#allocation71_spill] sm:$0xff] }
 0x38e   : > { %7932 = vst [vmem:[#allocation253_spill] sm:$0xff] %v6679_v34  ;;  %v6687_v27 = vmul.f32 %v7937_v40, %v7936_v8  ;;  %v7940_v26 = vld [vmem:[#allocation201_spill] sm:$0xff]  ;;  %v7942_v54 = vld [vmem:[#allocation72_spill] sm:$0xff]  ;;  %v7943_v43 = vld [vmem:[#allocation202_spill] sm:$0xff] }
 0x38f   : > { %7935 = vst [vmem:[#allocation256_spill] sm:$0xff] %v6683_v52  ;;  %v6691_v29 = vmul.f32 %v7940_v26, %v7939_v41  ;;  %v6695_v2 = vmul.f32 %v7943_v43, %v7942_v54  ;;  %v7945_v47 = vld [vmem:[#allocation73_spill] sm:$0xff]  ;;  %v7946_v23 = vld [vmem:[#allocation203_spill] sm:$0xff]  ;;  %v7948_v14 = vld [vmem:[#allocation74_spill] sm:$0xff] }
 0x390   : > { %7938 = vst [vmem:[#allocation257_spill] sm:$0xff] %v6687_v27  ;;  %v6699_v31 = vmul.f32 %v7946_v23, %v7945_v47  ;;  %v7949_v34 = vld [vmem:[#allocation204_spill] sm:$0xff]  ;;  %v7951_v51 = vld [vmem:[#allocation75_spill] sm:$0xff]  ;;  %v7952_v52 = vld [vmem:[#allocation205_spill] sm:$0xff] }
 0x391   : > { %7941 = vst [vmem:[#allocation260_spill] sm:$0xff] %v6691_v29  ;;  %7944 = vst [vmem:[#allocation141_spill] sm:$0xff] %v6695_v2  ;;  %v6703_v38 = vmul.f32 %v7949_v34, %v7948_v14  ;;  %v6707_v8 = vmul.f32 %v7952_v52, %v7951_v51  ;;  %v7954_v40 = vld [vmem:[#allocation76_spill] sm:$0xff]  ;;  %v7955_v27 = vld [vmem:[#allocation207_spill] sm:$0xff] }
 0x392   : > { %7947 = vst [vmem:[#allocation142_spill] sm:$0xff] %v6699_v31  ;;  %v6711_v41 = vmul.f32 %v7955_v27, %v7954_v40  ;;  %v7957_v26 = vld [vmem:[#allocation79_spill] sm:$0xff]  ;;  %v7958_v29 = vld [vmem:[#allocation208_spill] sm:$0xff]  ;;  %v7960_v2 = vld [vmem:[#allocation209_spill] sm:$0xff] }
 0x393   : > { %7950 = vst [vmem:[#allocation143_spill] sm:$0xff] %v6703_v38  ;;  %7953 = vst [vmem:[#allocation144_spill] sm:$0xff] %v6707_v8  ;;  %v6715_v54 = vmul.f32 %v7958_v29, %v7957_v26  ;;  %v7959_v43 = vld [vmem:[#allocation80_spill] sm:$0xff]  ;;  %v7961_v47 = vld [vmem:[#allocation81_spill] sm:$0xff] }
 0x394   : > { %7956 = vst [vmem:[#allocation145_spill] sm:$0xff] %v6711_v41  ;;  %v6719_v23 = vmul.f32 %v7960_v2, %v7959_v43  ;;  %v7962_v31 = vld [vmem:[#allocation213_spill] sm:$0xff]  ;;  %v7965_v38 = vld [vmem:[#allocation214_spill] sm:$0xff]  ;;  %v2561_v2 = vsel %vm2560_vm6, %v6464_v45, %v2559_v57  ;;  %v7974_v43 = vld [vmem:[#allocation219_spill] sm:$0xff]  ;;  %v2662_v57 = vsel %vm521_vm0, %v6369_v6, 0.0  ;;  %v2690_v45 = vsel %vm521_vm0, %v6458_v3, 0.0 }
 0x395   : > { %v6723_v34 = vmul.f32 %v7962_v31, %v7961_v47  ;;  %v7964_v14 = vld [vmem:[#allocation85_spill] sm:$0xff]  ;;  %v7967_v51 = vld [vmem:[#allocation86_spill] sm:$0xff]  ;;  %v7976_v47 = vld [vmem:[#allocation91_spill] sm:$0xff] }
 0x396   : > { %v6727_v52 = vmul.f32 %v7965_v38, %v7964_v14  ;;  %v7968_v8 = vld [vmem:[#allocation217_spill] sm:$0xff]  ;;  %v7971_v41 = vld [vmem:[#allocation218_spill] sm:$0xff]  ;;  %v7979_v14 = vld [vmem:[#allocation95_spill] sm:$0xff] }
 0x397   : > { %7963 = vst [vmem:[#allocation146_spill] sm:$0xff] %v6723_v34  ;;  %v6731_v27 = vmul.f32 %v7968_v8, %v7967_v51  ;;  %v7970_v40 = vld [vmem:[#allocation89_spill] sm:$0xff]  ;;  %v7973_v26 = vld [vmem:[#allocation90_spill] sm:$0xff]  ;;  %v7977_v34 = vld [vmem:[#allocation223_spill] sm:$0xff] }
 0x398   : > { %7966 = vst [vmem:[#allocation147_spill] sm:$0xff] %v6727_v52  ;;  %v6735_v29 = vmul.f32 %v7971_v41, %v7970_v40  ;;  %v6742_v31 = vmul.f32 %v7974_v43, %v7973_v26  ;;  %v6746_v38 = vmul.f32 %v7977_v34, %v7976_v47  ;;  %v7980_v52 = vld [vmem:[#allocation224_spill] sm:$0xff]  ;;  %v2661_v40 = vsel %vm521_vm0, %v6363_v53, 0.0  ;;  %v7985_v43 = vld [vmem:[#allocation97_spill] sm:$0xff]  ;;  %v7986_v34 = vld [vmem:[#allocation230_spill] sm:$0xff] }
 0x399   : > { %7969 = vst [vmem:[#allocation148_spill] sm:$0xff] %v6731_v27  ;;  %v6750_v8 = vmul.f32 %v7980_v52, %v7979_v14  ;;  %v7982_v51 = vld [vmem:[#allocation96_spill] sm:$0xff]  ;;  %v7983_v27 = vld [vmem:[#allocation225_spill] sm:$0xff]  ;;  %v2664_v26 = vsel %vm521_vm0, %v6392_v24, 0.0  ;;  %v6764_v47 = vmul.f32 %v7986_v34, %v7985_v43  ;;  %v7988_v52 = vld [vmem:[#allocation231_spill] sm:$0xff]  ;;  %v6776_v53 = vsel %vm2562_vm7, %v2563_v50, %v2561_v2 }
 0x39a   : > { %7972 = vst [vmem:[#allocation149_spill] sm:$0xff] %v6735_v29  ;;  %7975 = vst [vmem:[#allocation150_spill] sm:$0xff] %v6742_v31  ;;  %v6754_v41 = vmul.f32 %v7983_v27, %v7982_v51  ;;  %v7987_v29 = vld [vmem:[#allocation102_spill] sm:$0xff]  ;;  %v7991_v27 = vld [vmem:[#allocation232_spill] sm:$0xff]  ;;  %v2691_v50 = vsel %vm521_vm0, %v6462_v35, 0.0 }
 0x39b   : > { %7978 = vst [vmem:[#allocation151_spill] sm:$0xff] %v6746_v38  ;;  %7981 = vst [vmem:[#allocation152_spill] sm:$0xff] %v6750_v8  ;;  %v6768_v14 = vmul.f32 %v7988_v52, %v7987_v29  ;;  %v7990_v8 = vld [vmem:[#allocation103_spill] sm:$0xff]  ;;  %v7993_v6 = vld [vmem:[#allocation104_spill] sm:$0xff]  ;;  %v2666_v29 = vsel %vm521_vm0, %v6396_v63, 0.0  ;;  %v2693_v63 = vsel %vm521_vm0, %v6472_v16, 0.0 }
 0x39c   : > { %7984 = vst [vmem:[#allocation153_spill] sm:$0xff] %v6754_v41  ;;  %v6772_v51 = vmul.f32 %v7991_v27, %v7990_v8  ;;  %v2663_v41 = vadd.f32 %v2662_v57, %v2661_v40  ;;  %7992 = vst [vmem:[#allocation155_spill] sm:$0xff] %v6776_v53  ;;  %v7994_v38 = vld [vmem:[#allocation235_spill] sm:$0xff]  ;;  %v7996_v43 = vld [vmem:[#allocation236_spill] sm:$0xff]  ;;  %v2692_v27 = vadd.f32 %v2691_v50, %v2690_v45  ;;  %v2670_v16 = vsel %vm521_vm0, %v6409_v18, 0.0 }
 0x39d   : > { %7989 = vst [vmem:[#allocation154_spill] sm:$0xff] %v6768_v14  ;;  %v6780_v24 = vmul.f32 %v7994_v38, %v7993_v6  ;;  %v7995_v31 = vld [vmem:[#allocation107_spill] sm:$0xff]  ;;  %v7997_v52 = vld [vmem:[#allocation108_spill] sm:$0xff]  ;;  %v7998_v14 = vld [vmem:[#allocation237_spill] sm:$0xff] }
 0x39e   : > { %v6784_v34 = vmul.f32 %v7996_v43, %v7995_v31  ;;  %v6790_v8 = vmul.f32 %v7998_v14, %v7997_v52  ;;  %v2665_v40 = vadd.f32 %v2664_v26, %v2663_v41  ;;  %v7999_v2 = vld [vmem:[#allocation109_spill] sm:$0xff]  ;;  %v2668_v31 = vsel %vm521_vm0, %v6400_v4, 0.0  ;;  %v8001_v14 = vld [vmem:[#allocation112_spill] sm:$0xff]  ;;  %v8002_v6 = vld [vmem:[#allocation242_spill] sm:$0xff] }
 0x39f   : > { %v8000_v38 = vld [vmem:[#allocation241_spill] sm:$0xff]  ;;  %v6806_v41 = vmul.f32 %v8002_v6, %v8001_v14  ;;  %v8004_v3 = vld [vmem:[#allocation243_spill] sm:$0xff]  ;;  %v2695_v52 = vsel %vm521_vm0, %v6488_v0, 0.0  ;;  %v8008_v45 = vld [vmem:[#allocation246_spill] sm:$0xff]  ;;  %v2694_v14 = vadd.f32 %v2693_v63, %v2692_v27  ;;  %v2720_v0 = vsel %vm521_vm0, %v6536_v32, 0.0 }
 0x3a0   : > { %v6798_v57 = vmul.f32 %v8000_v38, %v7999_v2  ;;  %v8003_v26 = vld [vmem:[#allocation113_spill] sm:$0xff]  ;;  %v2667_v35 = vadd.f32 %v2666_v29, %v2665_v40  ;;  %v8005_v2 = vld [vmem:[#allocation114_spill] sm:$0xff]  ;;  %v2719_v29 = vsel %vm521_vm0, %v6532_v5, 0.0  ;;  %v2672_v40 = vsel %vm521_vm0, %v6413_v58, 0.0 }
 0x3a1   : > { %v6810_v43 = vmul.f32 %v8004_v3, %v8003_v26  ;;  %v8006_v38 = vld [vmem:[#allocation245_spill] sm:$0xff]  ;;  %v2697_v26 = vsel %vm521_vm0, %v6492_v61, 0.0  ;;  %v2696_v3 = vadd.f32 %v2695_v52, %v2694_v14  ;;  %v2699_v61 = vsel %vm521_vm0, %v6500_v49, 0.0 }
 0x3a2   : > { %v6816_v53 = vmul.f32 %v8006_v38, %v8005_v2  ;;  %v8007_v4 = vld [vmem:[#allocation117_spill] sm:$0xff]  ;;  %v2669_v6 = vadd.f32 %v2668_v31, %v2667_v35  ;;  %v2721_v2 = vadd.f32 %v2720_v0, %v2719_v29  ;;  %v2722_v38 = vsel %vm521_vm0, %v6540_v60, 0.0 }
 0x3a3   : > { %v6820_v50 = vmul.f32 %v8008_v45, %v8007_v4  ;;  %v2674_v31 = vsel %vm521_vm0, %v6417_v59, 0.0  ;;  %v2724_v5 = vsel %vm521_vm0, %v6544_v15, 0.0  ;;  %v2676_v32 = vsel %vm521_vm0, %v6421_v25, 0.0 }
 0x3a4   : > { %v2671_v18 = vadd.f32 %v2670_v16, %v2669_v6  ;;  %v2678_v58 = vsel %vm521_vm0, %v6436_v56, 0.0  ;;  %v2698_v27 = vadd.f32 %v2697_v26, %v2696_v3  ;;  %v2723_v63 = vadd.f32 %v2722_v38, %v2721_v2 }
 0x3a5   : > { %v2701_v60 = vsel %vm521_vm0, %v6504_v20, 0.0  ;;  %v2703_v59 = vsel %vm521_vm0, %v6508_v48, 0.0  ;;  %v2726_v49 = vsel %vm521_vm0, %v6548_v44, 0.0  ;;  %v2748_v25 = vsel %vm521_vm0, %v6589_v1, 0.0 }
 0x3a6   : > { %v2673_v35 = vadd.f32 %v2672_v40, %v2671_v18  ;;  %v2700_v52 = vadd.f32 %v2699_v61, %v2698_v27  ;;  %v2725_v15 = vadd.f32 %v2724_v5, %v2723_v63  ;;  %v2749_v56 = vsel %vm521_vm0, %v6593_v62, 0.0 }
 0x3a7   : > { %v2728_v45 = vsel %vm521_vm0, %v6552_v9, 0.0  ;;  %v2750_v16 = vadd.f32 %v2749_v56, %v2748_v25  ;;  %v2751_v20 = vsel %vm521_vm0, %v6597_v30, 0.0  ;;  %v2680_v48 = vsel %vm521_vm0, %v6446_v46, 0.0  ;;  %v8013_v56 = vld [vmem:[#allocation228_spill] sm:$0xff] }
 0x3a8   : > { %v2675_v4 = vadd.f32 %v2674_v31, %v2673_v35  ;;  %v2702_v44 = vadd.f32 %v2701_v60, %v2700_v52  ;;  %v2727_v14 = vadd.f32 %v2726_v49, %v2725_v15  ;;  %v2753_v6 = vsel %vm521_vm0, %v6601_v10, 0.0  ;;  %v8009_v35 = vld [vmem:[#allocation227_spill] sm:$0xff] }
 0x3a9   : > { %v2682_v1 = vsel %vm521_vm0, %v6454_v7, 0.0  ;;  %v2705_v62 = vsel %vm521_vm0, %v6515_v21, 0.0  ;;  %v2730_v9 = vsel %vm521_vm0, %v6560_v28, 0.0  ;;  %v2752_v26 = vadd.f32 %v2751_v20, %v2750_v16 }
 0x3aa   : > { %v2677_v29 = vadd.f32 %v2676_v32, %v2675_v4  ;;  %v2704_v30 = vadd.f32 %v2703_v59, %v2702_v44  ;;  %v2729_v0 = vadd.f32 %v2728_v45, %v2727_v14  ;;  %v2755_v46 = vsel %vm521_vm0, %v6605_v42, 0.0  ;;  %v8014_v4 = vld [vmem:[#allocation247_spill] sm:$0xff]  ;;  %v8015_v44 = vld [vmem:[#allocation244_spill] sm:$0xff] }
 0x3ab   : > { %v2707_v40 = vsel %vm521_vm0, %v6519_v12, 0.0  ;;  %v2732_v10 = vsel %vm521_vm0, %v6564_v33, 0.0  ;;  %v2754_v7 = vadd.f32 %v2753_v6, %v2752_v26  ;;  %v2757_v21 = vsel %vm521_vm0, %v6609_v22, 0.0 }
 0x3ac   : > { %v2706_v3 = vadd.f32 %v2705_v62, %v2704_v30  ;;  %v2731_v2 = vadd.f32 %v2730_v9, %v2729_v0  ;;  %v2777_v28 = vsel %vm521_vm0, %v6642_v13, 0.0  ;;  %v2778_v38 = vsel %vm521_vm0, %v6646_v39, 0.0  ;;  %v8016_v9 = vld [vmem:[#allocation239_spill] sm:$0xff]  ;;  %v8018_v30 = vld [vmem:[#allocation141_spill] sm:$0xff] }
 0x3ad   : > { %v2734_v42 = vsel %vm521_vm0, %v6568_v17, 0.0  ;;  %v2756_v18 = vadd.f32 %v2755_v46, %v2754_v7  ;;  %v2779_v12 = vadd.f32 %v2778_v38, %v2777_v28  ;;  %v2780_v33 = vsel %vm521_vm0, %v6650_v55, 0.0  ;;  %v8019_v46 = vld [vmem:[#allocation240_spill] sm:$0xff]  ;;  %v8021_v38 = vld [vmem:[#allocation142_spill] sm:$0xff] }
 0x3ae   : > { %v2679_v31 = vadd.f32 %v2678_v58, %v2677_v29  ;;  %v2733_v61 = vadd.f32 %v2732_v10, %v2731_v2  ;;  %v2759_v22 = vsel %vm521_vm0, %v6614_v37, 0.0  ;;  %v2782_v5 = vsel %vm521_vm0, %v6654_v11, 0.0  ;;  %v8010_v58 = vld [vmem:[#allocation238_spill] sm:$0xff]  ;;  %v8011_v37 = vld [vmem:[#allocation215_spill] sm:$0xff]  ;;  %v8017_v29 = vld [vmem:[#allocation260_spill] sm:$0xff] }
 0x3af   : > { %v2708_v13 = vadd.f32 %v2707_v40, %v2706_v3  ;;  %v2736_v39 = vsel %vm521_vm0, %v6574_v36, 0.0  ;;  %v2758_v32 = vadd.f32 %v2757_v21, %v2756_v18  ;;  %v2781_v27 = vadd.f32 %v2780_v33, %v2779_v12  ;;  %v8012_v11 = vld [vmem:[#allocation226_spill] sm:$0xff]  ;;  %v8020_v2 = vld [vmem:[#allocation248_spill] sm:$0xff]  ;;  %v8022_v18 = vld [vmem:[#allocation143_spill] sm:$0xff] }
 0x3b0   : > { %v2709_v17 = vsel %vm521_vm0, %v6523_v19, 0.0  ;;  %v2735_v63 = vadd.f32 %v2734_v42, %v2733_v61  ;;  %v2761_v55 = vsel %vm521_vm0, %v8009_v35, 0.0  ;;  %v2784_v60 = vsel %vm521_vm0, %v8010_v58, 0.0  ;;  %v8027_v35 = vld [vmem:[#allocation249_spill] sm:$0xff] }
 0x3b1   : > { %v2711_v59 = vsel %vm521_vm0, %v8011_v37, 0.0  ;;  %v2738_v49 = vsel %vm521_vm0, %v8012_v11, 0.0  ;;  %v2760_v52 = vadd.f32 %v2759_v22, %v2758_v32  ;;  %v2783_v36 = vadd.f32 %v2782_v5, %v2781_v27  ;;  %v8024_v32 = vld [vmem:[#allocation252_spill] sm:$0xff]  ;;  %v8028_v58 = vld [vmem:[#allocation121_spill] sm:$0xff] }
 0x3b2   : > { %v2681_v15 = vadd.f32 %v2680_v48, %v2679_v31  ;;  %v2737_v25 = vadd.f32 %v2736_v39, %v2735_v63  ;;  %v2763_v19 = vsel %vm521_vm0, %v8013_v56, 0.0  ;;  %v2786_v45 = vsel %vm521_vm0, %v8014_v4, 0.0  ;;  %v8025_v27 = vld [vmem:[#allocation144_spill] sm:$0xff]  ;;  %v8026_v63 = vld [vmem:[#allocation118_spill] sm:$0xff] }
 0x3b3   : > { %v2710_v16 = vadd.f32 %v2709_v17, %v2708_v13  ;;  %v2762_v20 = vadd.f32 %v2761_v55, %v2760_v52  ;;  %v2765_v14 = vsel %vm521_vm0, %v8015_v44, 0.0  ;;  %v2785_v6 = vadd.f32 %v2784_v60, %v2783_v36  ;;  %v8023_v13 = vld [vmem:[#allocation233_spill] sm:$0xff]  ;;  %v8029_v60 = vld [vmem:[#allocation250_spill] sm:$0xff]  ;;  %v8031_v52 = vld [vmem:[#allocation251_spill] sm:$0xff] }
 0x3b4   : > { %v2739_v62 = vadd.f32 %v2738_v49, %v2737_v25  ;;  %v2788_v26 = vsel %vm521_vm0, %v8016_v9, 0.0  ;;  %v2806_v48 = vsel %vm521_vm0, %v8017_v29, 0.0  ;;  %v2807_v0 = vsel %vm521_vm0, %v8018_v30, 0.0  ;;  %v8030_v49 = vld [vmem:[#allocation122_spill] sm:$0xff]  ;;  %v8032_v25 = vld [vmem:[#allocation253_spill] sm:$0xff] }
 0x3b5   : > { %v2740_v40 = vsel %vm521_vm0, %v8019_v46, 0.0  ;;  %v2764_v10 = vadd.f32 %v2763_v19, %v2762_v20  ;;  %v2787_v7 = vadd.f32 %v2786_v45, %v2785_v6  ;;  %v2808_v21 = vadd.f32 %v2807_v0, %v2806_v48  ;;  %v8033_v19 = vld [vmem:[#allocation145_spill] sm:$0xff]  ;;  %v8035_v6 = vld [vmem:[#allocation254_spill] sm:$0xff]  ;;  %v8038_v0 = vld [vmem:[#allocation255_spill] sm:$0xff] }
 0x3b6   : > { %v2683_v3 = vadd.f32 %v2682_v1, %v2681_v15  ;;  %v2790_v28 = vsel %vm521_vm0, %v8020_v2, 0.0  ;;  %v2809_v42 = vsel %vm521_vm0, %v8021_v38, 0.0  ;;  %v2811_v12 = vsel %vm521_vm0, %v8022_v18, 0.0  ;;  %v8037_v30 = vld [vmem:[#allocation126_spill] sm:$0xff]  ;;  %v8041_v38 = vld [vmem:[#allocation256_spill] sm:$0xff] }
 0x3b7   : > { %v2712_v33 = vadd.f32 %v2711_v59, %v2710_v16  ;;  %v2766_v31 = vadd.f32 %v2765_v14, %v2764_v10  ;;  %v2789_v61 = vadd.f32 %v2788_v26, %v2787_v7  ;;  %v2810_v22 = vadd.f32 %v2809_v42, %v2808_v21  ;;  %v8034_v14 = vld [vmem:[#allocation125_spill] sm:$0xff]  ;;  %v8036_v26 = vld [vmem:[#allocation234_spill] sm:$0xff] }
 0x3b8   : > { %v2741_v5 = vadd.f32 %v2740_v40, %v2739_v62  ;;  %v2767_v39 = vsel %vm521_vm0, %v8023_v13, 0.0  ;;  %v2792_v1 = vsel %vm521_vm0, %v8024_v32, 0.0  ;;  %v2813_v17 = vsel %vm521_vm0, %v8025_v27, 0.0  ;;  %v8039_v40 = vld [vmem:[#allocation127_spill] sm:$0xff]  ;;  %v8040_v10 = vld [vmem:[#allocation258_spill] sm:$0xff] }
 0x3b9   : > { %v6928_v55 = vmul.f32 %v8027_v35, %v8026_v63  ;;  %v6932_v37 = vmul.f32 %v8029_v60, %v8028_v58  ;;  %v2791_v59 = vadd.f32 %v2790_v28, %v2789_v61  ;;  %v2812_v11 = vadd.f32 %v2811_v12, %v2810_v22  ;;  %v8042_v12 = vld [vmem:[#allocation150_spill] sm:$0xff]  ;;  %v8043_v13 = vld [vmem:[#allocation151_spill] sm:$0xff]  ;;  %v8046_v35 = vld [vmem:[#allocation129_spill] sm:$0xff] }
 0x3ba   : > { %v6936_v36 = vmul.f32 %v8031_v52, %v8030_v49  ;;  %v2684_v15 = vrot.slane %v2683_v3, 4  ;;  %v2794_v56 = vsel %vm521_vm0, %v8032_v25, 0.0  ;;  %v2815_v4 = vsel %vm521_vm0, %v8033_v19, 0.0  ;;  %v8047_v58 = vld [vmem:[#allocation259_spill] sm:$0xff]  ;;  %v8049_v49 = vld [vmem:[#allocation77_spill] sm:$0xff]  ;;  %v8050_v52 = vld [vmem:[#allocation206_spill] sm:$0xff] }
 0x3bb   : > { %v2713_v45 = vrot.slane %v2712_v33, 4  ;;  %v2768_v16 = vadd.f32 %v2767_v39, %v2766_v31  ;;  %v2793_v20 = vadd.f32 %v2792_v1, %v2791_v59  ;;  %v2814_v44 = vadd.f32 %v2813_v17, %v2812_v11  ;;  %v8044_v1 = vld [vmem:[#allocation146_spill] sm:$0xff]  ;;  %v8045_v17 = vld [vmem:[#allocation152_spill] sm:$0xff] }
 0x3bc   : > { %v6944_v62 = vmul.f32 %v8035_v6, %v8034_v14  ;;  %v2742_v9 = vrot.slane %v2741_v5, 4  ;;  %v2769_v29 = vsel %vm521_vm0, %v8036_v26, 0.0  ;;  %v2817_v48 = vsel %vm521_vm0, %v6715_v54, 0.0 }
 0x3bd   : > { %v6952_v46 = vmul.f32 %v8038_v0, %v8037_v30  ;;  %v6956_v7 = vmul.f32 %v8040_v10, %v8039_v40  ;;  %v2795_v21 = vadd.f32 %v2794_v56, %v2793_v20  ;;  %v2816_v2 = vadd.f32 %v2815_v4, %v2814_v44  ;;  %v8052_v56 = vld [vmem:[#allocation147_spill] sm:$0xff]  ;;  %v8054_v0 = vld [vmem:[#allocation149_spill] sm:$0xff]  ;;  %v8055_v10 = vld [vmem:[#allocation154_spill] sm:$0xff] }
 0x3be   : > { %v2685_v28 = vadd.f32 %v2684_v15, %v2683_v3  ;;  %v2796_v42 = vsel %vm521_vm0, %v8041_v38, 0.0  ;;  %v2819_v18 = vsel %vm521_vm0, %v6719_v23, 0.0  ;;  %v2835_v54 = vsel %vm521_vm0, %v8042_v12, 0.0 }
 0x3bf   : > { %v2714_v31 = vadd.f32 %v2713_v45, %v2712_v33  ;;  %v2770_v61 = vadd.f32 %v2769_v29, %v2768_v16  ;;  %v2818_v22 = vadd.f32 %v2817_v48, %v2816_v2  ;;  %v2836_v39 = vsel %vm521_vm0, %v8043_v13, 0.0  ;;  %v8048_v33 = vld [vmem:[#allocation153_spill] sm:$0xff]  ;;  %v8056_v13 = vld [vmem:[#allocation88_spill] sm:$0xff] }
 0x3c0   : > { %v2743_v32 = vadd.f32 %v2742_v9, %v2741_v5  ;;  %v2821_v27 = vsel %vm521_vm0, %v8044_v1, 0.0  ;;  %v2837_v3 = vadd.f32 %v2836_v39, %v2835_v54  ;;  %v2838_v63 = vsel %vm521_vm0, %v8045_v17, 0.0  ;;  %v8051_v5 = vld [vmem:[#allocation257_spill] sm:$0xff]  ;;  %v8053_v9 = vld [vmem:[#allocation148_spill] sm:$0xff] }
 0x3c1   : > { %v6972_v23 = vmul.f32 %v8047_v58, %v8046_v35  ;;  %v2797_v60 = vadd.f32 %v2796_v42, %v2795_v21  ;;  %v2820_v59 = vadd.f32 %v2819_v18, %v2818_v22  ;;  %v2840_v11 = vsel %vm521_vm0, %v8048_v33, 0.0  ;;  %v8057_v39 = vld [vmem:[#allocation220_spill] sm:$0xff]  ;;  %v8059_v33 = vld [vmem:[#allocation221_spill] sm:$0xff] }
 0x3c2   : > { %v6978_v15 = vmul.f32 %v8050_v52, %v8049_v49  ;;  %v2798_v25 = vsel %vm521_vm0, %v8051_v5, 0.0  ;;  %v2823_v19 = vsel %vm521_vm0, %v8052_v56, 0.0  ;;  %v2839_v4 = vadd.f32 %v2838_v63, %v2837_v3  ;;  %v8060_v49 = vld [vmem:[#allocation78_spill] sm:$0xff] }
 0x3c3   : > { %v2686_v45 = vrot.slane %v2685_v28, 2  ;;  %v2771_v16 = vrot.slane %v2770_v61, 4  ;;  %v2822_v20 = vadd.f32 %v2821_v27, %v2820_v59  ;;  %v2842_v44 = vsel %vm521_vm0, %v6764_v47, 0.0  ;;  %v8061_v52 = vld [vmem:[#allocation210_spill] sm:$0xff] }
 0x3c4   : > { %v2715_v14 = vrot.slane %v2714_v31, 2  ;;  %v2744_v6 = vrot.slane %v2743_v32, 2  ;;  %v2825_v26 = vsel %vm521_vm0, %v8053_v9, 0.0  ;;  %v2841_v29 = vadd.f32 %v2840_v11, %v2839_v4 }
 0x3c5   : > { %v2799_v48 = vadd.f32 %v2798_v25, %v2797_v60  ;;  %v2824_v30 = vadd.f32 %v2823_v19, %v2822_v20  ;;  %v2827_v40 = vsel %vm521_vm0, %v8054_v0, 0.0  ;;  %v2844_v21 = vsel %vm521_vm0, %v8055_v10, 0.0  ;;  %v8063_v19 = vld [vmem:[#allocation211_spill] sm:$0xff]  ;;  %v8065_v20 = vld [vmem:[#allocation222_spill] sm:$0xff]  ;;  %v8068_v0 = vld [vmem:[#allocation84_spill] sm:$0xff] }
 0x3c6   : > { %v2843_v2 = vadd.f32 %v2842_v44, %v2841_v29  ;;  %v2864_v38 = vsel %vm521_vm0, %v6810_v43, 0.0  ;;  %v2865_v47 = vsel %vm521_vm0, %v6816_v53, 0.0  ;;  %v2867_v42 = vsel %vm521_vm0, %v6820_v50, 0.0 }
 0x3c7   : > { %v6998_v18 = vadd.f32 %v2771_v16, %v2770_v61  ;;  %v2826_v12 = vadd.f32 %v2825_v26, %v2824_v30  ;;  %v2846_v54 = vsel %vm521_vm0, %v6772_v51, 0.0  ;;  %v2866_v22 = vadd.f32 %v2865_v47, %v2864_v38  ;;  %v8067_v26 = vld [vmem:[#allocation212_spill] sm:$0xff]  ;;  %v8070_v38 = vld [vmem:[#allocation87_spill] sm:$0xff]  ;;  %v8071_v47 = vld [vmem:[#allocation229_spill] sm:$0xff] }
 0x3c8   : > { %v7004_v1 = vmul.f32 %v8057_v39, %v8056_v13  ;;  %v7006_v27 = vadd.f32 %v2686_v45, %v2685_v28  ;;  %v2845_v43 = vadd.f32 %v2844_v21, %v2843_v2  ;;  %v2869_v53 = vsel %vm521_vm0, %v6928_v55, 0.0 }
 0x3c9   : > { %v7010_v3 = vadd.f32 %v2715_v14, %v2714_v31  ;;  %v2828_v50 = vadd.f32 %v2827_v40, %v2826_v12  ;;  %v2848_v61 = vsel %vm521_vm0, %v6780_v24, 0.0  ;;  %v2868_v17 = vadd.f32 %v2867_v42, %v2866_v22  ;;  %v8073_v22 = vld [vmem:[#allocation155_spill] sm:$0xff] }
 0x3ca   : > { %v7014_v63 = vadd.f32 %v2744_v6, %v2743_v32  ;;  %v2800_v51 = vrot.slane %v2799_v48, 4  ;;  %v2847_v35 = vadd.f32 %v2846_v54, %v2845_v43  ;;  %v2871_v58 = vsel %vm521_vm0, %v6932_v37, 0.0  ;;  %v8058_v32 = vld [vmem:[#allocation92_spill] sm:$0xff] }
 0x3cb   : > { %v2773_v28 = vrot.slane %v6998_v18, 2  ;;  %v2850_v60 = vsel %vm521_vm0, %v6784_v34, 0.0  ;;  %v2852_v55 = vsel %vm521_vm0, %v6790_v8, 0.0  ;;  %v2870_v31 = vadd.f32 %v2869_v53, %v2868_v17  ;;  %v8062_v34 = vld [vmem:[#allocation82_spill] sm:$0xff] }
 0x3cc   : > { %v2849_v59 = vadd.f32 %v2848_v61, %v2847_v35  ;;  %v2873_v24 = vsel %vm521_vm0, %v6936_v36, 0.0  ;;  %v2893_v11 = vmul.f32 %v8059_v33, %v8058_v32  ;;  %v2894_v5 = vmul.f32 %v8061_v52, %v8060_v49  ;;  %v8064_v36 = vld [vmem:[#allocation93_spill] sm:$0xff]  ;;  %v2925_v49 = vld [vmem:[#allocation2] sm:$0x1] }
 0x3cd   : > { %v2829_v37 = vrot.slane %v2828_v50, 4  ;;  %v2854_v25 = vsel %vm521_vm0, %v6798_v57, 0.0  ;;  %v2872_v56 = vadd.f32 %v2871_v58, %v2870_v31  ;;  %v2895_v4 = vmul.f32 %v8063_v19, %v8062_v34  ;;  %v8066_v57 = vld [vmem:[#allocation83_spill] sm:$0xff]  ;;  %v2928_v19 = vld [vmem:[#allocation2 + $0x3] sm:$0x1] }
 0x3ce   : > { %v2801_v8 = vadd.f32 %v2800_v51, %v2799_v48  ;;  %v2851_v45 = vadd.f32 %v2850_v60, %v2849_v59  ;;  %v2875_v16 = vsel %vm521_vm0, %v6944_v62, 0.0  ;;  %v2896_v44 = vmul.f32 %v8065_v20, %v8064_v36  ;;  %v8069_v48 = vld [vmem:[#allocation216_spill] sm:$0xff] }
 0x3cf   : > { %v2856_v14 = vsel %vm521_vm0, %v6806_v41, 0.0  ;;  %v2874_v6 = vadd.f32 %v2873_v24, %v2872_v56  ;;  %v2877_v9 = vsel %vm521_vm0, %v6952_v46, 0.0  ;;  %v2897_v29 = vmul.f32 %v8067_v26, %v8066_v57  ;;  %v8072_v46 = vld [vmem:[#allocation94_spill] sm:$0xff]  ;;  %v2931_v26 = vld [vmem:[#allocation2 + $0x6] sm:$0x1] }
 0x3d0   : > { %v2853_v30 = vadd.f32 %v2852_v55, %v2851_v45  ;;  %v2898_v40 = vmul.f32 %v8069_v48, %v8068_v0  ;;  %v2901_v10 = vmax.f32 %v2893_v11, 1e-08  ;;  %v2902_v21 = vmax.f32 %v2894_v5, 1e-08  ;;  %v2929_v45 = vld [vmem:[#allocation2 + $0x4] sm:$0x1] }
 0x3d1   : > { %v2830_v62 = vadd.f32 %v2829_v37, %v2828_v50  ;;  %v2876_v2 = vadd.f32 %v2875_v16, %v2874_v6  ;;  %v2899_v42 = vmul.f32 %v8071_v47, %v8070_v38  ;;  %v2903_v12 = vmax.f32 %v2895_v4, 1e-08  ;;  %v2932_v0 = vld [vmem:[#allocation2 + $0x7] sm:$0x1] }
 0x3d2   : > { %v2855_v41 = vadd.f32 %v2854_v25, %v2853_v30  ;;  %v2879_v54 = vsel %vm521_vm0, %v6956_v7, 0.0  ;;  %v2900_v13 = vmul.f32 %v8073_v22, %v8072_v46  ;;  %v2904_v39 = vmax.f32 %v2896_v44, 1e-08 }
 0x3d3   : > { %v2802_v43 = vrot.slane %v2801_v8, 2  ;;  %v2878_v53 = vadd.f32 %v2877_v9, %v2876_v2  ;;  %v2905_v61 = vmax.f32 %v2897_v29, 1e-08  ;;  %3290 = vrcp.f32 %v2901_v10 }
 0x3d4   : > { %v2857_v17 = vadd.f32 %v2856_v14, %v2855_v41  ;;  %v2881_v50 = vsel %vm521_vm0, %v6972_v23, 0.0  ;;  %v2906_v51 = vmax.f32 %v2898_v40, 1e-08  ;;  %3292 = vrcp.f32 %v2902_v21  ;;  %v2930_v14 = vld [vmem:[#allocation2 + $0x5] sm:$0x1] }
 0x3d5   : > { %v2831_v35 = vrot.slane %v2830_v62, 2  ;;  %v2880_v58 = vadd.f32 %v2879_v54, %v2878_v53  ;;  %v2907_v60 = vmax.f32 %v2899_v42, 1e-08  ;;  %3294 = vrcp.f32 %v2903_v12 }
 0x3d6   : > { %v2858_v55 = vrot.slane %v2857_v17, 4  ;;  %v2883_v7 = vsel %vm521_vm0, %v6978_v15, 0.0  ;;  %v2908_v31 = vmax.f32 %v2900_v13, 1e-08  ;;  %3296 = vrcp.f32 %v2904_v39  ;;  %v2926_v15 = vld [vmem:[#allocation2 + $0x1] sm:$0x1] }
 0x3d7   : > { %v2688_v59 = vrot.slane %v7006_v27, 1  ;;  %v2774_v24 = vadd.f32 %v2773_v28, %v6998_v18  ;;  %v2882_v32 = vadd.f32 %v2881_v50, %v2880_v58  ;;  %3298 = vrcp.f32 %v2905_v61  ;;  %v2927_v18 = vld [vmem:[#allocation2 + $0x2] sm:$0x1] }
 0x3d8   : > { %v2803_v33 = vadd.f32 %v2802_v43, %v2801_v8  ;;  %v2859_v23 = vadd.f32 %v2858_v55, %v2857_v17  ;;  %v2885_v11 = vsel %vm521_vm0, %v7004_v1, 0.0  ;;  %3300 = vrcp.f32 %v2906_v51 }
 0x3d9   : > { %v2717_v52 = vrot.slane %v7010_v3, 1  ;;  %v2832_v5 = vadd.f32 %v2831_v35, %v2830_v62  ;;  %v2884_v37 = vadd.f32 %v2883_v7, %v2882_v32  ;;  %3302 = vrcp.f32 %v2907_v60 }
 0x3da   : > { %v2746_v25 = vrot.slane %v7014_v63, 1  ;;  %v2860_v56 = vrot.slane %v2859_v23, 2  ;;  %3304 = vrcp.f32 %v2908_v31  ;;  %v2775_v28 = vrot.slane %v2774_v24, 1 }
 0x3db   : > { %v2886_v34 = vadd.f32 %v2885_v11, %v2884_v37  ;;  %3306 = vlog2.f32 %v2925_v49  ;;  %v2689_v4 = vadd.f32 %v2688_v59, %v7006_v27  ;;  %v2804_v1 = vrot.slane %v2803_v33, 1 }
 0x3dc   : > { %v2861_v8 = vadd.f32 %v2860_v56, %v2859_v23  ;;  %3308 = vlog2.f32 %v2926_v15  ;;  %v2718_v36 = vadd.f32 %v2717_v52, %v7010_v3  ;;  %v2833_v20 = vrot.slane %v2832_v5, 1 }
 0x3dd   : > { %v3291_v16 = vpop.eup %3290  ;;  %v2887_v44 = vrot.slane %v2886_v34, 4  ;;  %3310 = vlog2.f32 %v2927_v18  ;;  %v2747_v9 = vadd.f32 %v2746_v25, %v7014_v63  ;;  %v2776_v30 = vadd.f32 %v2775_v28, %v2774_v24 }
 0x3de   : > { %v3293_v6 = vpop.eup %3292  ;;  %v2862_v57 = vrot.slane %v2861_v8, 1  ;;  %3312 = vlog2.f32 %v2928_v19  ;;  %v2805_v40 = vadd.f32 %v2804_v1, %v2803_v33  ;;  %v2910_v10 = vmul.f32 %v3291_v16, %v2689_v4 }
 0x3df   : > { %v3295_v29 = vpop.eup %3294  ;;  %v2888_v27 = vadd.f32 %v2887_v44, %v2886_v34  ;;  %3314 = vlog2.f32 %v2929_v45  ;;  %v2834_v21 = vadd.f32 %v2833_v20, %v2832_v5  ;;  %v2912_v2 = vmul.f32 %v3293_v6, %v2718_v36 }
 0x3e0   : > { %v3297_v48 = vpop.eup %3296  ;;  %3316 = vlog2.f32 %v2930_v14  ;;  %v2863_v47 = vadd.f32 %v2862_v57, %v2861_v8  ;;  %v2914_v63 = vmul.f32 %v3295_v29, %v2747_v9  ;;  %v2949_v22 = vmul.f32 2.0, %v2910_v10 }
 0x3e1   : > { %v3299_v3 = vpop.eup %3298  ;;  %v2889_v62 = vrot.slane %v2888_v27, 2  ;;  %3318 = vlog2.f32 %v2931_v26  ;;  %v2916_v41 = vmul.f32 %v3297_v48, %v2776_v30  ;;  %v2950_v53 = vmul.f32 2.0, %v2912_v2 }
 0x3e2   : > { %v3301_v38 = vpop.eup %3300  ;;  %3320 = vlog2.f32 %v2932_v0  ;;  %v2918_v46 = vmul.f32 %v3299_v3, %v2805_v40  ;;  %v2951_v51 = vmul.f32 2.0, %v2914_v63 }
 0x3e3   : > { %v3303_v42 = vpop.eup %3302  ;;  %v2890_v12 = vadd.f32 %v2889_v62, %v2888_v27  ;;  %v2920_v43 = vmul.f32 %v3301_v38, %v2834_v21  ;;  %v2952_v55 = vmul.f32 2.0, %v2916_v41 }
 0x3e4   : > { %v3305_v54 = vpop.eup %3304  ;;  %v2922_v17 = vmul.f32 %v3303_v42, %v2863_v47  ;;  %v2953_v59 = vmul.f32 2.0, %v2918_v46 }
 0x3e5   : > { %v3307_v13 = vpop.eup %3306  ;;  %v2891_v39 = vrot.slane %v2890_v12, 1  ;;  %v2954_v11 = vmul.f32 2.0, %v2920_v43 }
 0x3e6   : > { %v3309_v61 = vpop.eup %3308  ;;  %v2934_v50 = vmul.f32 0.6931472, %v3307_v13  ;;  %v2955_v37 = vmul.f32 2.0, %v2922_v17 }
 0x3e7   : > { %v3311_v35 = vpop.eup %3310  ;;  %v2892_v58 = vadd.f32 %v2891_v39, %v2890_v12  ;;  %v2936_v60 = vmul.f32 0.6931472, %v3309_v61 }
 0x3e8   : > { %v3313_v7 = vpop.eup %3312  ;;  %v2938_v31 = vmul.f32 0.6931472, %v3311_v35  ;;  %v2957_v24 = vsub.f32 %v2934_v50, %v2949_v22 }
 0x3e9   : > { %v3315_v32 = vpop.eup %3314  ;;  %v2924_v33 = vmul.f32 %v3305_v54, %v2892_v58  ;;  %v2940_v23 = vmul.f32 0.6931472, %v3313_v7  ;;  %v2958_v49 = vsub.f32 %v2936_v60, %v2950_v53 }
 0x3ea   : > { %v3317_v52 = vpop.eup %3316  ;;  %v2942_v5 = vmul.f32 0.6931472, %v3315_v32  ;;  %v2959_v15 = vsub.f32 %v2938_v31, %v2951_v51  ;;  %2965 = vst.msk [vmem:[%s3660_s2] sm:$0x1] %vm2072_vm5, %v2957_v24 }
 0x3eb   : > { %v3319_v25 = vpop.eup %3318  ;;  %v2944_v56 = vmul.f32 0.6931472, %v3317_v52  ;;  %v2956_v18 = vmul.f32 2.0, %v2924_v33  ;;  %v2960_v28 = vsub.f32 %v2940_v23, %v2952_v55  ;;  %2966 = vst.msk [vmem:[%s3660_s2 + $0x1] sm:$0x1] %vm2072_vm5, %v2958_v49 }
 0x3ec   : > { %v3321_v34 = vpop.eup %3320  ;;  %v2946_v19 = vmul.f32 0.6931472, %v3319_v25  ;;  %v2961_v4 = vsub.f32 %v2942_v5, %v2953_v59  ;;  %2967 = vst.msk [vmem:[%s3660_s2 + $0x2] sm:$0x1] %vm2072_vm5, %v2959_v15 }
 0x3ed   : > { %v2948_v1 = vmul.f32 0.6931472, %v3321_v34  ;;  %v2962_v8 = vsub.f32 %v2944_v56, %v2954_v11  ;;  %2968 = vst.msk [vmem:[%s3660_s2 + $0x3] sm:$0x1] %vm2072_vm5, %v2960_v28 }
 0x3ee   : > { %v2963_v45 = vsub.f32 %v2946_v19, %v2955_v37  ;;  %2969 = vst.msk [vmem:[%s3660_s2 + $0x4] sm:$0x1] %vm2072_vm5, %v2961_v4 }
 0x3ef   : > { %v2964_v16 = vsub.f32 %v2948_v1, %v2956_v18  ;;  %2970 = vst.msk [vmem:[%s3660_s2 + $0x5] sm:$0x1] %vm2072_vm5, %v2962_v8 }
 0x3f0   : > { %2971 = vst.msk [vmem:[%s3660_s2 + $0x6] sm:$0x1] %vm2072_vm5, %v2963_v45 }
 0x3f1   : > { %2972 = vst.msk [vmem:[%s3660_s2 + $0x7] sm:$0x1] %vm2072_vm5, %v2964_v16 }
 0x3f2 PF: > { %s20_s22 = sadd.s32 1, %s3452_s22   ;;  %s8074_s28 = sld [smem:[#allocation9_spill]] }
 0x3f3   : > { %p17_p9 = scmp.ge.s32.totalorder %s20_s22, 12   ;;  %s8075_s23 = sld [smem:[#allocation10_spill]] }
 0x3f4   : > { %s8076_s15 = smov %s3428_s16  ;;  %s8077_s16 = smov %s3432_s17 }
 0x3f5   : > { %s8078_s17 = smov %s3558_s8  ;;  %s8079_s18 = smov %s3444_s20 }
 0x3f6   : > { %s8080_s19 = smov %s3448_s21  ;;  %19 = sbr.rel (!%p17_p9) target bundleno = 9 (0x9), region = 103 }
 0x3f8   : > { %s8081_s20 = smov %s8074_s28 }
 0x3f9   : > { %s8082_s21 = smov %s8075_s23 }
 0x3fd   :  { %2993 = vsyncpa [#allocation4], 1 }
 0x3fe   :  { %2995 = vsyncpa [#allocation4 + $0x1], 1 }
 0x3ff   :  { %2996 = vsyncpa [#allocation6], 1 }
 0x400   :  { %2998 = vsyncpa [#allocation6 + $0x1], 1 }

</bundles_post_ra>
